<compile_context>
chip_gen: v7x
topology: tpu7x:2x2x1
jax: 0.10.0
libtpu: 0.0.40
codegen_flags: <defaults>
</compile_context>

<pallas_src>
import functools
import math

import numpy as np
import jax
import jax.numpy as jnp
from jax.experimental import pallas as pl
from jax.experimental.pallas import tpu as pltpu


_VMEM_LIMIT = 48 * 1024 * 1024          # explicit scoped-VMEM cap; < v7x 64 MiB physical
_FUSED_CONV_VMEM_CAP = 40 * 1024 * 1024  # fall back to im2col above this estimate


def _rup(x, m):
    return ((x + m - 1) // m) * m


def _pick_tile(dim, cap):
    """Tile for a lane-ish dim: the dim itself if it fits, else the multiple of 128 (<= cap)
    minimizing padding (largest such tile on ties)."""
    if dim <= cap:
        return dim
    start = (cap // 128) * 128
    best, best_pad = 128, None
    for cand in range(start, 0, -128):
        pad = _rup(dim, cand) - dim
        if best_pad is None or pad < best_pad:
            best, best_pad = cand, pad
        if pad == 0:
            break
    return best


def _pick_tm(M, tk, tn, has_res, out_bytes):
    """VMEM-budget based row tile (multiple of 8, up to 2048)."""
    Mr = _rup(M, 8)
    budget = 14 * 2 ** 20
    cand = 2048
    while cand > 8:
        c = min(cand, Mr)
        est = (2 * c * tk * 2 + 2 * tk * tn * 2 + 2 * c * tn * out_bytes
               + c * tn * 4 + (2 * c * tn * 2 if has_res else 0))
        if est <= budget:
            break
        cand //= 2
    return max(8, min(cand, Mr))


# ----------------------------------------------------------------------------
# Fused GEMM kernels (x @ w) * scale + shift [+ residual] [+ ReLU]
# ----------------------------------------------------------------------------

def _gemm_kernel(x_ref, w_ref, scale_ref, shift_ref, *rest, relu, has_res):
    """Multi-K-step variant with an f32 VMEM accumulator."""
    if has_res:
        res_ref, o_ref, acc_ref = rest
    else:
        o_ref, acc_ref = rest
    k = pl.program_id(2)

    @pl.when(k == 0)
    def _():
        acc_ref[...] = jnp.zeros_like(acc_ref)

    acc_ref[...] += jnp.dot(x_ref[...], w_ref[...],
                            preferred_element_type=jnp.float32)

    @pl.when(k == pl.num_programs(2) - 1)
    def _():
        y = acc_ref[...] * scale_ref[...] + shift_ref[...]
        if has_res:
            y = y + res_ref[...].astype(jnp.float32)
        if relu:
            y = jnp.maximum(y, 0.0)
        o_ref[...] = y.astype(o_ref.dtype)


def _gemm_kernel_1k(x_ref, w_ref, scale_ref, shift_ref, *rest, relu, has_res):
    """Single-K-step variant: no scratch, epilogue straight from the dot result."""
    if has_res:
        res_ref, o_ref = rest
    else:
        (o_ref,) = rest
    y = jnp.dot(x_ref[...], w_ref[...], preferred_element_type=jnp.float32)
    y = y * scale_ref[...] + shift_ref[...]
    if has_res:
        y = y + res_ref[...].astype(jnp.float32)
    if relu:
        y = jnp.maximum(y, 0.0)
    o_ref[...] = y.astype(o_ref.dtype)


def matmul_fused(x, w, scale, shift, residual=None, relu=False, out_dtype=jnp.bfloat16):
    """out = maybe_relu((x @ w) * scale + shift [+ residual]); bf16 operands, f32 accumulate."""
    M, K = x.shape
    K2, N = w.shape
    assert K == K2
    tk = _pick_tile(K, 1024)
    tn = _pick_tile(N, 512)
    out_bytes = jnp.dtype(out_dtype).itemsize
    has_res = residual is not None
    tm = _pick_tm(M, tk, tn, has_res, out_bytes)
    Mp, Kp, Np = _rup(M, tm), _rup(K, tk), _rup(N, tn)

    xp = x.astype(jnp.bfloat16)
    if (Mp, Kp) != (M, K):
        xp = jnp.pad(xp, ((0, Mp - M), (0, Kp - K)))
    # Weights / scale / shift are already bf16/f32 and (K, N)/(1, N) from init; only pad if the
    # (rare) tile search left padding (not hit for this model).
    if w.shape == (Kp, Np) and w.dtype == jnp.bfloat16:
        wp = w
    else:
        wp = jnp.pad(w.astype(jnp.bfloat16), ((0, Kp - K), (0, Np - N)))
    if scale.shape == (1, Np):
        sp = scale
    else:
        sp = jnp.pad(jnp.reshape(scale.astype(jnp.float32), (1, -1)), ((0, 0), (0, Np - N)))
    if shift.shape == (1, Np):
        bp = shift
    else:
        bp = jnp.pad(jnp.reshape(shift.astype(jnp.float32), (1, -1)), ((0, 0), (0, Np - N)))

    operands = [xp, wp, sp, bp]
    if has_res:
        rp = residual.astype(jnp.bfloat16)
        if (Mp, Np) != (M, N):
            rp = jnp.pad(rp, ((0, Mp - M), (0, Np - N)))
        operands.append(rp)

    ksteps = Kp // tk
    if ksteps == 1:
        in_specs = [pl.BlockSpec((tm, tk), lambda i, j: (i, 0)),
                    pl.BlockSpec((tk, tn), lambda i, j: (0, j)),
                    pl.BlockSpec((1, tn), lambda i, j: (0, j)),
                    pl.BlockSpec((1, tn), lambda i, j: (0, j))]
        if has_res:
            in_specs.append(pl.BlockSpec((tm, tn), lambda i, j: (i, j)))
        out = pl.pallas_call(
            functools.partial(_gemm_kernel_1k, relu=relu, has_res=has_res),
            out_shape=jax.ShapeDtypeStruct((Mp, Np), out_dtype),
            grid_spec=pltpu.PrefetchScalarGridSpec(
                num_scalar_prefetch=0,
                grid=(Mp // tm, Np // tn),
                in_specs=in_specs,
                out_specs=pl.BlockSpec((tm, tn), lambda i, j: (i, j))),
            compiler_params=pltpu.CompilerParams(
                dimension_semantics=("parallel", "parallel"),
                vmem_limit_bytes=_VMEM_LIMIT),
        )(*operands)
    else:
        in_specs = [pl.BlockSpec((tm, tk), lambda i, j, k: (i, k)),
                    pl.BlockSpec((tk, tn), lambda i, j, k: (k, j)),
                    pl.BlockSpec((1, tn), lambda i, j, k: (0, j)),
                    pl.BlockSpec((1, tn), lambda i, j, k: (0, j))]
        if has_res:
            in_specs.append(pl.BlockSpec((tm, tn), lambda i, j, k: (i, j)))
        out = pl.pallas_call(
            functools.partial(_gemm_kernel, relu=relu, has_res=has_res),
            out_shape=jax.ShapeDtypeStruct((Mp, Np), out_dtype),
            grid_spec=pltpu.PrefetchScalarGridSpec(
                num_scalar_prefetch=0,
                grid=(Mp // tm, Np // tn, ksteps),
                in_specs=in_specs,
                out_specs=pl.BlockSpec((tm, tn), lambda i, j, k: (i, j)),
                scratch_shapes=[pltpu.VMEM((tm, tn), jnp.float32)]),
            compiler_params=pltpu.CompilerParams(
                dimension_semantics=("parallel", "parallel", "arbitrary"),
                vmem_limit_bytes=_VMEM_LIMIT),
        )(*operands)
    if (Mp, Np) != (M, N):
        out = out[:M, :N]
    return out


# ----------------------------------------------------------------------------
# Fused 3x3 / stride-1 / pad-1 convolution (no materialized im2col)
#
# The padded NHWC map is flattened to rows ((H+2)*(W+2), Cin); tap (ky,kx) is then a plain
# row-shift by ky*(W+2)+kx, so the conv is 9 accumulating dots over row-shifted views of the SAME
# VMEM block.  Output rows with x in {W, W+1} are junk and get sliced off afterwards.
# ----------------------------------------------------------------------------

def _conv3_kernel_1k(x_ref, w_ref, scale_ref, shift_ref, o_ref, *, offs, m_out, relu):
    xv = x_ref[0]                                    # (m_im, tc)
    y = None
    for t, off in enumerate(offs):
        d = jnp.dot(xv[off:off + m_out, :], w_ref[t],
                    preferred_element_type=jnp.float32)
        y = d if y is None else y + d
    y = y * scale_ref[...] + shift_ref[...]
    if relu:
        y = jnp.maximum(y, 0.0)
    o_ref[0] = y.astype(o_ref.dtype)


def _conv3_kernel_mk(x_ref, w_ref, scale_ref, shift_ref, o_ref, acc_ref, *, offs, m_out, relu):
    kc = pl.program_id(2)

    @pl.when(kc == 0)
    def _():
        acc_ref[...] = jnp.zeros_like(acc_ref)

    xv = x_ref[0]
    y = None
    for t, off in enumerate(offs):
        d = jnp.dot(xv[off:off + m_out, :], w_ref[t],
                    preferred_element_type=jnp.float32)
        y = d if y is None else y + d
    acc_ref[...] += y

    @pl.when(kc == pl.num_programs(2) - 1)
    def _():
        z = acc_ref[...] * scale_ref[...] + shift_ref[...]
        if relu:
            z = jnp.maximum(z, 0.0)
        o_ref[0] = z.astype(o_ref.dtype)


def conv3x3_fused(x, cp, relu=False, out_dtype=jnp.bfloat16):
    """Returns the conv output, or None if this shape should fall back to the im2col path."""
    B, H, W, Cin = x.shape
    Cout = cp['cout']
    W2 = W + 2
    m_out = H * W2                                    # output rows incl. 2 junk columns per row
    m_src = (H + 2) * W2
    m_im = _rup(m_src + 2, 8)                         # +2 so the (ky,kx)=(2,2) tap stays in bounds
    offs = tuple(ky * W2 + kx for ky in range(3) for kx in range(3))

    tn = Cout if Cout <= 512 else _pick_tile(Cout, 512)
    Np = _rup(Cout, tn)

    # Reduction (Cin) chunking: keep per-step weight block ~<=5 MiB, tc must divide Cin.
    w_budget = 5 * 2 ** 20
    if 9 * Cin * tn * 2 <= w_budget or Cin % 128 != 0:
        tc = Cin
    else:
        tc = 128
        d = (min(Cin, w_budget // (9 * tn * 2)) // 128) * 128
        while d >= 128:
            if Cin % d == 0:
                tc = d
                break
            d -= 128
    if Cin % tc != 0:
        return None
    kc_steps = Cin // tc

    out_bytes = jnp.dtype(out_dtype).itemsize
    est = (2 * m_im * tc * 2 + 2 * 9 * tc * tn * 2 + 2 * m_out * tn * out_bytes
           + m_out * tn * 4)
    if est > _FUSED_CONV_VMEM_CAP:
        return None

    xp = jnp.pad(x.astype(jnp.bfloat16), ((0, 0), (1, 1), (1, 1), (0, 0)))
    xf = xp.reshape(B, m_src, Cin)
    if m_im > m_src:
        xf = jnp.pad(xf, ((0, 0), (0, m_im - m_src), (0, 0)))

    wm, sc, sh = cp['wm'], cp['scale'], cp['shift']   # (9, Cin, Cout) bf16, (1, Cout) f32
    if Np > Cout:                                     # not hit for this model
        wm = jnp.pad(wm, ((0, 0), (0, 0), (0, Np - Cout)))
        sc = jnp.pad(sc, ((0, 0), (0, Np - Cout)))
        sh = jnp.pad(sh, ((0, 0), (0, Np - Cout)))

    common = dict(offs=offs, m_out=m_out, relu=relu)
    if kc_steps == 1:
        in_specs = [pl.BlockSpec((1, m_im, tc), lambda b, j: (b, 0, 0)),
                    pl.BlockSpec((9, tc, tn), lambda b, j: (0, 0, j)),
                    pl.BlockSpec((1, tn), lambda b, j: (0, j)),
                    pl.BlockSpec((1, tn), lambda b, j: (0, j))]
        out = pl.pallas_call(
            functools.partial(_conv3_kernel_1k, **common),
            out_shape=jax.ShapeDtypeStruct((B, m_out, Np), out_dtype),
            grid_spec=pltpu.PrefetchScalarGridSpec(
                num_scalar_prefetch=0,
                grid=(B, Np // tn),
                in_specs=in_specs,
                out_specs=pl.BlockSpec((1, m_out, tn), lambda b, j: (b, 0, j))),
            compiler_params=pltpu.CompilerParams(
                dimension_semantics=("parallel", "parallel"),
                vmem_limit_bytes=_VMEM_LIMIT),
        )(xf, wm, sc, sh)
    else:
        in_specs = [pl.BlockSpec((1, m_im, tc), lambda b, j, kc: (b, 0, kc)),
                    pl.BlockSpec((9, tc, tn), lambda b, j, kc: (0, kc, j)),
                    pl.BlockSpec((1, tn), lambda b, j, kc: (0, j)),
                    pl.BlockSpec((1, tn), lambda b, j, kc: (0, j))]
        out = pl.pallas_call(
            functools.partial(_conv3_kernel_mk, **common),
            out_shape=jax.ShapeDtypeStruct((B, m_out, Np), out_dtype),
            grid_spec=pltpu.PrefetchScalarGridSpec(
                num_scalar_prefetch=0,
                grid=(B, Np // tn, kc_steps),
                in_specs=in_specs,
                out_specs=pl.BlockSpec((1, m_out, tn), lambda b, j, kc: (b, 0, j)),
                scratch_shapes=[pltpu.VMEM((m_out, tn), jnp.float32)]),
            compiler_params=pltpu.CompilerParams(
                dimension_semantics=("parallel", "parallel", "arbitrary"),
                vmem_limit_bytes=_VMEM_LIMIT),
        )(xf, wm, sc, sh)
    if Np > Cout:
        out = out[:, :, :Cout]
    return out.reshape(B, H, W2, Cout)[:, :, :W, :]


# ----------------------------------------------------------------------------
# Max-pool 3x3 / stride 2 / pad 1 — 9-way elementwise max over lane-dense blocks
# ----------------------------------------------------------------------------

def _max9_kernel(*refs):
    o_ref = refs[-1]
    m = refs[0][...]
    for r in refs[1:-1]:
        m = jnp.maximum(m, r[...])
    o_ref[...] = m


def maxpool_3x3_s2_p1(x):
    B, H, W, C = x.shape
    Ho, Wo = (H - 1) // 2 + 1, (W - 1) // 2 + 1
    neg = jnp.finfo(x.dtype).min
    xp = jnp.pad(x, ((0, 0), (1, 1), (1, 1), (0, 0)), constant_values=neg)
    views = [xp[:, dy:dy + 2 * Ho:2, dx:dx + 2 * Wo:2, :].reshape(-1)
             for dy in range(3) for dx in range(3)]
    n = views[0].shape[0]
    rows = pl.cdiv(n, 128)
    tr = min(_rup(rows, 8), 2048)
    rows_p = _rup(rows, tr)
    total = rows_p * 128
    vs = [jnp.pad(v, (0, total - n)).reshape(rows_p, 128) for v in views]
    out = pl.pallas_call(
        _max9_kernel,
        out_shape=jax.ShapeDtypeStruct((rows_p, 128), x.dtype),
        grid=(rows_p // tr,),
        in_specs=[pl.BlockSpec((tr, 128), lambda i: (i, 0))] * 9,
        out_specs=pl.BlockSpec((tr, 128), lambda i: (i, 0)),
        compiler_params=pltpu.CompilerParams(
            dimension_semantics=("parallel",),
            vmem_limit_bytes=_VMEM_LIMIT),
    )(*vs)
    return out.reshape(-1)[:n].reshape(B, Ho, Wo, C)


# ----------------------------------------------------------------------------
# Conv / Linear wrappers
# ----------------------------------------------------------------------------

def conv2d(x, cp, stride=1, padding=0, relu=False, residual=None, out_dtype=jnp.bfloat16):
    """x: (B,H,W,Cin) bf16 NHWC; cp holds pre-folded weights {'wm','scale','shift','k','cout'}."""
    B, H, W, Cin = x.shape
    k = cp['k']
    Cout = cp['cout']
    if k == 3 and stride == 1 and padding == 1 and residual is None:
        out = conv3x3_fused(x, cp, relu=relu, out_dtype=out_dtype)
        if out is not None:
            return out
    Ho = (H + 2 * padding - k) // stride + 1
    Wo = (W + 2 * padding - k) // stride + 1
    if k == 1 and padding == 0:
        xs = x if stride == 1 else x[:, ::stride, ::stride, :]
        patches = xs.reshape(B * Ho * Wo, Cin)
        wm = cp['wm']
    else:
        xp = jnp.pad(x, ((0, 0), (padding, padding), (padding, padding), (0, 0)))
        cols = [xp[:, ky:ky + stride * Ho:stride, kx:kx + stride * Wo:stride, :]
                for ky in range(k) for kx in range(k)]
        patches = jnp.concatenate(cols, axis=-1).reshape(B * Ho * Wo, k * k * Cin)
        wm = cp['wm'].reshape(k * k * Cin, Cout)
    res2d = None if residual is None else residual.reshape(B * Ho * Wo, Cout)
    out = matmul_fused(patches, wm, cp['scale'], cp['shift'],
                       residual=res2d, relu=relu, out_dtype=out_dtype)
    return out.reshape(B, Ho, Wo, Cout)


def linear(x, p, out_dtype=jnp.float32):
    return matmul_fused(x, p['wm'], p['scale'], p['shift'], out_dtype=out_dtype)


# ----------------------------------------------------------------------------
# PSP pool / interpolation matrices (trace-time numpy constants)
# ----------------------------------------------------------------------------

def _adaptive_pool_matrix(in_h, in_w, out_s):
    P = np.zeros((out_s * out_s, in_h * in_w), np.float32)
    for oy in range(out_s):
        y0 = (oy * in_h) // out_s
        y1 = -(-((oy + 1) * in_h) // out_s)
        for ox in range(out_s):
            x0 = (ox * in_w) // out_s
            x1 = -(-((ox + 1) * in_w) // out_s)
            area = (y1 - y0) * (x1 - x0)
            for yy in range(y0, y1):
                for xx in range(x0, x1):
                    P[oy * out_s + ox, yy * in_w + xx] = 1.0 / area
    return P


def _bilinear_1d(in_s, out_s):
    # PyTorch F.interpolate(mode='bilinear', align_corners=False) semantics.
    Wm = np.zeros((out_s, in_s), np.float32)
    scale = in_s / out_s
    for o in range(out_s):
        src = (o + 0.5) * scale - 0.5
        src = max(src, 0.0)
        i0 = min(int(np.floor(src)), in_s - 1)
        i1 = min(i0 + 1, in_s - 1)
        l1 = src - i0
        Wm[o, i0] += 1.0 - l1
        Wm[o, i1] += l1
    return Wm


def _bilinear_matrix(in_s, out_h, out_w):
    return np.kron(_bilinear_1d(in_s, out_h), _bilinear_1d(in_s, out_w))


# ----------------------------------------------------------------------------
# Parameter initialization (weights pre-folded / pre-cast / pre-laid-out once)
# ----------------------------------------------------------------------------

class KeyGen:
    def __init__(self, key):
        self.key = key

    def __call__(self):
        self.key, sub = jax.random.split(self.key)
        return sub


def make_conv(kg, cin, cout, k, bias=True, bn=False):
    """Conv2d [+ eval-mode BN] folded into (wm, scale, shift); wm is (cin,cout) for 1x1, else
    (k*k, cin, cout) (tap-major), both bf16; scale/shift are (1,cout) f32."""
    fan_in = cin * k * k
    w = jax.random.normal(kg(), (cout, cin, k, k), jnp.float32) / math.sqrt(fan_in)
    b = (jax.random.normal(kg(), (cout,), jnp.float32) * 0.01 if bias
         else jnp.zeros((cout,), jnp.float32))
    if bn:
        gamma = jnp.ones((cout,), jnp.float32)
        beta = jnp.zeros((cout,), jnp.float32)
        mean = jnp.zeros((cout,), jnp.float32)
        var = jnp.ones((cout,), jnp.float32)
        s = gamma / jnp.sqrt(var + 1e-5)
        scale, shift = s, s * (b - mean) + beta
    else:
        scale, shift = jnp.ones((cout,), jnp.float32), b
    wt = w.transpose(2, 3, 1, 0).astype(jnp.bfloat16)        # (ky, kx, cin, cout)
    wm = wt.reshape(cin, cout) if k == 1 else wt.reshape(k * k, cin, cout)
    return {'wm': wm,
            'scale': scale.reshape(1, -1).astype(jnp.float32),
            'shift': shift.reshape(1, -1).astype(jnp.float32),
            'k': k, 'cin': cin, 'cout': cout}


def make_linear(kg, cin, cout):
    w = jax.random.normal(kg(), (cout, cin), jnp.float32) / math.sqrt(cin)
    b = jax.random.normal(kg(), (cout,), jnp.float32) * 0.01
    return {'wm': w.T.astype(jnp.bfloat16),
            'scale': jnp.ones((1, cout), jnp.float32),
            'shift': b.reshape(1, -1).astype(jnp.float32)}


# ---------------- ResNet50 backbone ----------------

def init_bottleneck(kg, inplanes, planes, stride):
    p = {'conv1': make_conv(kg, inplanes, planes, 1, bias=False, bn=True),
         'conv2': make_conv(kg, planes, planes, 3, bias=False, bn=True),
         'conv3': make_conv(kg, planes, planes * 4, 1, bias=False, bn=True),
         'stride': stride}
    if stride != 1 or inplanes != planes * 4:
        p['down'] = make_conv(kg, inplanes, planes * 4, 1, bias=False, bn=True)
    return p


def bottleneck_fwd(p, x):
    out = conv2d(x, p['conv1'], relu=True)
    out = conv2d(out, p['conv2'], stride=p['stride'], padding=1, relu=True)
    if 'down' in p:
        identity = conv2d(x, p['down'], stride=p['stride'])
    else:
        identity = x
    # Residual add + ReLU fused into the conv3 GEMM epilogue.
    return conv2d(out, p['conv3'], residual=identity, relu=True)


def init_resnet50(kg):
    params = {'conv1': make_conv(kg, 3, 64, 7, bias=False, bn=True)}
    inplanes = 64
    layers = []
    for planes, blocks, stride in [(64, 3, 1), (128, 4, 2), (256, 6, 2), (512, 3, 2)]:
        blks = []
        for bi in range(blocks):
            blks.append(init_bottleneck(kg, inplanes, planes, stride if bi == 0 else 1))
            inplanes = planes * 4
        layers.append(blks)
    params['layers'] = layers
    return params


# ---------------- PyramidPooler (collapsed: one GEMM + tiny spatial maps) ----------------

def init_pooler(kg, infeats, pool_sizes=(1, 2, 3, 6)):
    inter = infeats // len(pool_sizes)
    pool_convs = [make_conv(kg, infeats, inter, 1, bias=False) for _ in pool_sizes]
    wcat = jnp.concatenate([pc['wm'] for pc in pool_convs], axis=1)     # (infeats, 4*inter)
    ncat = inter * len(pool_sizes)
    return {'wcat': wcat,
            'wcat_scale': jnp.ones((1, ncat), jnp.float32),
            'wcat_shift': jnp.zeros((1, ncat), jnp.float32),
            'inter': inter,
            'bottleneck': make_conv(kg, infeats + ncat, infeats, 1, bias=True),
            'pool_sizes': pool_sizes}


def pooler_fwd(p, x):
    B, h, w, C = x.shape
    inter = p['inter']
    # One 1x1 "conv" GEMM covering all four pyramid branches.
    xw = matmul_fused(x.reshape(B * h * w, C), p['wcat'], p['wcat_scale'], p['wcat_shift'])
    xw = xw.reshape(B, h * w, -1)
    ups = []
    for si, s in enumerate(p['pool_sizes']):
        # Adaptive-avg-pool then bilinear-upsample collapse into one (h*w, h*w) f32 matrix.
        A = np.matmul(_bilinear_matrix(s, h, w), _adaptive_pool_matrix(h, w, s))
        part = xw[:, :, si * inter:(si + 1) * inter].astype(jnp.float32)
        up = jnp.einsum('pq,bqc->bpc', jnp.asarray(A, jnp.float32), part)
        ups.append(up.astype(jnp.bfloat16).reshape(B, h, w, inter))
    cat = jnp.concatenate(ups + [x], axis=-1)
    return conv2d(cat, p['bottleneck'], relu=True)


# ---------------- UHead (UNet-style upsampling head) ----------------

def init_uhead(kg, infeats, num_classes):
    dl = [1, 2, 4, 8, 32, 32]
    levels = []
    for n in range(1, 6):
        indims = infeats // dl[n - 1] + infeats // dl[n] if n < 5 else infeats // dl[n]
        levels.append(make_conv(kg, indims, infeats // dl[n], 3, bias=True, bn=True))
    return {'levels': levels, 'fin': make_conv(kg, infeats // dl[-1], num_classes, 1, bias=True)}


def uhead_fwd(p, x, prevs):
    prevs = list(prevs) + [None]
    for level, prev in zip(p['levels'], prevs):
        # TODO(synk): nearest-2x upsample is still materialized in XLA glue instead of being
        #             folded into the following conv's row gather.
        x = jnp.repeat(jnp.repeat(x, 2, axis=1), 2, axis=2)
        if prev is not None:
            x = jnp.concatenate((x, prev), axis=-1)
        x = conv2d(x, level, padding=1, relu=True)
    # N=3 output stays unpadded (tn == N), so the f32 store is tiny.
    return conv2d(x, p['fin'], out_dtype=jnp.float32)


# ---------------- NumberHead (regression head) ----------------

def init_numberhead(kg, infeats, num_out, init_size):
    downs = [make_conv(kg, infeats, infeats, 2, bias=True) for _ in range(2)]
    flat = (init_size[0] // 4) * (init_size[1] // 4) * infeats
    return {'downs': downs,
            'lin1': make_linear(kg, flat, infeats),
            'lin2': make_linear(kg, infeats, num_out)}


def numberhead_fwd(p, x):
    for d in p['downs']:
        x = conv2d(x, d, stride=2)                        # Conv2d(k=2, stride=2)
    B = x.shape[0]
    x = x.transpose(0, 3, 1, 2).reshape(B, -1)            # NCHW flatten order (matches torch .view)
    x = linear(x, p['lin1'], out_dtype=jnp.bfloat16)
    x = linear(x, p['lin2'], out_dtype=jnp.float32)
    return x.reshape(-1, x.shape[1])


# ---------------- URegHeadPSP ----------------

def init_uregheadpsp(kg, num_classes, num_outnums, input_size):
    output_size = 2048  # resnet50 fc.in_features
    return {'backbone': init_resnet50(kg),
            'pool': init_pooler(kg, output_size),
            'seg_head': init_uhead(kg, output_size, num_classes),
            'reg_head': init_numberhead(kg, output_size, num_outnums,
                                        (input_size[0] // 32, input_size[1] // 32))}


def pspfeats_fwd(params, x):
    bb = params['backbone']
    x = conv2d(x, bb['conv1'], stride=2, padding=3, relu=True)
    x1 = x
    x2 = maxpool_3x3_s2_p1(x1)
    for blk in bb['layers'][0]:
        x2 = bottleneck_fwd(blk, x2)
    x3 = x2
    for blk in bb['layers'][1]:
        x3 = bottleneck_fwd(blk, x3)
    x4 = x3
    for blk in bb['layers'][2]:
        x4 = bottleneck_fwd(blk, x4)
    x = x4
    for blk in bb['layers'][3]:
        x = bottleneck_fwd(blk, x)
    return pooler_fwd(params['pool'], x), x4, x3, x2, x1


def uregheadpsp_fwd(params, x_nchw):
    xh = jnp.transpose(x_nchw, (0, 2, 3, 1)).astype(jnp.bfloat16)   # NCHW -> NHWC bf16 once
    feats, f4, f3, f2, f1 = pspfeats_fwd(params, xh)
    seg = uhead_fwd(params['seg_head'], feats, [f4, f3, f2, f1])
    seg_mask = jnp.transpose(seg, (0, 3, 1, 2))                     # back to NCHW (f32)
    regs = numberhead_fwd(params['reg_head'], feats)
    return seg_mask, regs


# ----------------------------------------------------------------------------
# Demo
# ----------------------------------------------------------------------------

if __name__ == "__main__":
    num_classes = 3
    num_outnums = 5
    # Smallest input size for which the /32 backbone + NumberHead's two stride-2 downsteps
    # remain non-degenerate (feature map is input_size/32; must be divisible by 4).
    input_size = (128, 128)
    B = 1

    root = jax.random.PRNGKey(0)
    x = jax.random.normal(jax.random.fold_in(root, 1), (B, 3, *input_size), jnp.float32)
    params = init_uregheadpsp(KeyGen(jax.random.fold_in(root, 2)),
                              num_classes, num_outnums, input_size)

    seg_mask, regs = uregheadpsp_fwd(params, x)
    jax.block_until_ready((seg_mask, regs))

    assert seg_mask.shape == (B, num_classes, input_size[0], input_size[1]), seg_mask.shape
    assert regs.shape == (B, num_outnums), regs.shape
    assert bool(jnp.all(jnp.isfinite(seg_mask))) and bool(jnp.all(jnp.isfinite(regs)))
    print("KERNEL_OK")
</pallas_src>

<mosaic_0001>
module attributes {stable_mosaic.version = 11 : i64} {
  func.func @_gemm_kernel_1k(%arg0: i32, %arg1: i32, %arg2: memref<2048x147xbf16, #tpu.memory_space<vmem>>, %arg3: memref<147x64xbf16, #tpu.memory_space<vmem>>, %arg4: memref<1x64xf32, #tpu.memory_space<vmem>>, %arg5: memref<1x64xf32, #tpu.memory_space<vmem>>, %arg6: memref<2048x64xbf16, #tpu.memory_space<vmem>>) attributes {dimension_semantics = [#tpu.dimension_semantics<parallel>, #tpu.dimension_semantics<parallel>], iteration_bounds = array<i64: 2, 1>, scalar_prefetch = 0 : i64, scratch_operands = 0 : i64, tpu.core_type = #tpu.core_type<tc>, window_params = [{transform_indices = @transform_0, window_bounds = array<i64: 2048, 147>}, {transform_indices = @transform_1, window_bounds = array<i64: 147, 64>}, {transform_indices = @transform_2, window_bounds = array<i64: 1, 64>}, {transform_indices = @transform_3, window_bounds = array<i64: 1, 64>}, {transform_indices = @transform_4, window_bounds = array<i64: 2048, 64>}]} {
    %c0 = arith.constant 0 : index
    %c0_0 = arith.constant 0 : index
    %0 = vector.load %arg2[%c0, %c0_0] : memref<2048x147xbf16, #tpu.memory_space<vmem>>, vector<2048x147xbf16>
    %c0_1 = arith.constant 0 : index
    %c0_2 = arith.constant 0 : index
    %1 = vector.load %arg3[%c0_1, %c0_2] : memref<147x64xbf16, #tpu.memory_space<vmem>>, vector<147x64xbf16>
    %cst = arith.constant dense<0.000000e+00> : vector<2048x64xf32>
    %2 = tpu.matmul %0, %1, %cst {dimension_numbers = #tpu.dot_dimension_numbers<[1], [0], [0], [1], [0, 0, 1, 1], [], []>} : vector<2048x147xbf16>, vector<147x64xbf16>, vector<2048x64xf32> -> vector<2048x64xf32>
    %c0_3 = arith.constant 0 : index
    %c0_4 = arith.constant 0 : index
    %3 = vector.load %arg4[%c0_3, %c0_4] : memref<1x64xf32, #tpu.memory_space<vmem>>, vector<1x64xf32>
    %4 = vector.broadcast %3 : vector<1x64xf32> to vector<2048x64xf32>
    %5 = arith.mulf %2, %4 : vector<2048x64xf32>
    %c0_5 = arith.constant 0 : index
    %c0_6 = arith.constant 0 : index
    %6 = vector.load %arg5[%c0_5, %c0_6] : memref<1x64xf32, #tpu.memory_space<vmem>>, vector<1x64xf32>
    %7 = vector.broadcast %6 : vector<1x64xf32> to vector<2048x64xf32>
    %8 = arith.addf %5, %7 : vector<2048x64xf32>
    %cst_7 = arith.constant 0.000000e+00 : f32
    %9 = vector.broadcast %cst_7 : f32 to vector<2048x64xf32>
    %10 = arith.maximumf %8, %9 : vector<2048x64xf32>
    %11 = arith.truncf %10 : vector<2048x64xf32> to vector<2048x64xbf16>
    %c0_8 = arith.constant 0 : index
    %c0_9 = arith.constant 0 : index
    %12 = vector.load %arg6[%c0_8, %c0_9] : memref<2048x64xbf16, #tpu.memory_space<vmem>>, vector<2048x64xbf16>
    tpu.vector_store %arg6[%c0_8, %c0_9], %11 {strides = array<i32>} : memref<2048x64xbf16, #tpu.memory_space<vmem>>, vector<2048x64xbf16>,
    return
  }
  func.func @transform_0(%arg0: i32, %arg1: i32) -> (i32, i32) {
    %c0_i32 = arith.constant 0 : i32
    %c0_i32_0 = arith.constant 0 : i32
    return %arg0, %c0_i32 : i32, i32
  }
  func.func @transform_1(%arg0: i32, %arg1: i32) -> (i32, i32) {
    %c0_i32 = arith.constant 0 : i32
    %c0_i32_0 = arith.constant 0 : i32
    return %c0_i32, %arg1 : i32, i32
  }
  func.func @transform_2(%arg0: i32, %arg1: i32) -> (i32, i32) {
    %c0_i32 = arith.constant 0 : i32
    %c0_i32_0 = arith.constant 0 : i32
    return %c0_i32, %arg1 : i32, i32
  }
  func.func @transform_3(%arg0: i32, %arg1: i32) -> (i32, i32) {
    %c0_i32 = arith.constant 0 : i32
    %c0_i32_0 = arith.constant 0 : i32
    return %c0_i32, %arg1 : i32, i32
  }
  func.func @transform_4(%arg0: i32, %arg1: i32) -> (i32, i32) {
    %c0_i32 = arith.constant 0 : i32
    return %arg0, %arg1 : i32, i32
  }
}

</mosaic_0001>

<bundles_post_ra>
// kernel: tpu_custom_call.1
= control target key start
LH: loop header
LB: loop body
LE: loop exit
PB: predicated region body
PF: predicated region fallthrough
CT: control target
= control target key end

     0   :  { %s6803_s15 = smov 0   ;;  %s6805_s16 = smov 0   ;;  %s8320_s0 = inlined_call_operand.vmem [shape: bf16[4096,147], index: 0, kind: input, shape index: {}]   ;;  %s8321_s1 = inlined_call_operand.vmem [shape: bf16[147,64], index: 1, kind: input, shape index: {}]   ;;  %s8322_s2 = inlined_call_operand.vmem [shape: f32[1,64], index: 2, kind: input, shape index: {}]   ;;  %s8323_s3 = inlined_call_operand.vmem [shape: f32[1,64], index: 3, kind: input, shape index: {}]   ;;  %s8324_s4 = inlined_call_operand.vmem [shape: bf16[4096,64], index: 4, kind: output, shape index: {}]  }
   0x1   :  { %s6807_s17 = smov 0  }
   0x2 LB: > { %s26_s18 = sadd.s32 1, %s6770_s16  ;;  %p5387_p0 = scmp.ge.s32.totalorder %s6774_s17, 1  ;;  %s6774_s17 = sphi %s6807_s17, %s14_s17   ;;  %s6770_s16 = sphi %s6805_s16, %s8326_s16   ;;  %s6766_s15 = sphi %s6803_s15, %s8325_s15  }
   0x3   : > { %p28_p1 = scmp.ge.s32.totalorder %s26_s18, 2  ;;  %p203_p2 = scmp.lt.s32.totalorder %s6774_s17, 3 }
   0x5   : > { %s8328_s18 = smov (%p28_p1, %s26_s18), 0  ;;  %p204_p3 = pnand %p5387_p0, %p203_p2 }
   0x6   : > { %v6350_v0 = vld [vmem:[%s8321_s1] sm:$0xff] (!%p204_p3)   ;;  %v6776_v1 = vmov (!%p204_p3), 0   ;;  %v6351_v2 = vld [vmem:[%s8321_s1 + $0x8] sm:$0xff] (!%p204_p3)   ;;  %v6352_v3 = vld [vmem:[%s8321_s1 + $0x10] sm:$0xff] (!%p204_p3)   ;;  %s5388_s25 = sshll.u32 (!%p204_p3), %s6766_s15, 8  ;;  %vm1754_vm0 = vcmask (!%p204_p3), 154624  }
   0x7   : > { %207 = sbr.rel (%p204_p3) target bundleno = 774 (0x306), region = 36  ;;  %2146 = vmatprep.subr.bf16.mxu0 (!%p204_p3), %v6776_v1  ;;  %6304 = vmatprep.subr.bf16.mxu1 (!%p204_p3), %v6776_v1  ;;  %p244_p4 = scmp.lt.s32.totalorder (!%p204_p3), %s5388_s25, 511  ;;  %v6353_v4 = vld [vmem:[%s8321_s1 + $0x18] sm:$0xff] (!%p204_p3)   ;;  %v6354_v5 = vld [vmem:[%s8321_s1 + $0x20] sm:$0xff] (!%p204_p3)   ;;  %v6355_v8 = vld [vmem:[%s8321_s1 + $0x28] sm:$0xff] (!%p204_p3)   ;;  %vm2139_vm1 = vcmask (!%p204_p3), 1040384  }
   0x8   : > { %2147 = vmatpush1.bf16.msra.mxu0 (!%p204_p3), %v6350_v0  ;;  %6314 = vmatpush1.bf16.msra.mxu1 (!%p204_p3), %v6350_v0  ;;  %v6356_v9 = vld [vmem:[%s8321_s1 + $0x30] sm:$0xff] (!%p204_p3)   ;;  %v6357_v10 = vld [vmem:[%s8321_s1 + $0x38] sm:$0xff] (!%p204_p3)   ;;  %vm2140_vm2 = vcmask (!%p204_p3), 1041408   ;;  %v6777_v11 = vmov (!%p204_p3), 65535   ;;  %v6358_v13 = vld [vmem:[%s8321_s1 + $0x40] sm:$0xff] (!%p204_p3)   ;;  %vm5009_vm3 = vcmask (!%p204_p3), 519168  }
   0x9   : > { %2148 = vmatprep.subr.bf16.mxu0 (!%p204_p3), %v6776_v1  ;;  %6305 = vmatprep.subr.bf16.mxu1 (!%p204_p3), %v6776_v1  ;;  %v2141_v12 = vsel (!%p204_p3), %vm2139_vm1, 4294967295, %v6777_v11  ;;  %v6359_v14 = vld [vmem:[%s8321_s1 + $0x48] ss:$0 sps:$4 sm:$0x33] (!%p204_p3)  }
   0xa   : > { %v2142_v15 = vsel (!%p204_p3), %vm2140_vm2, %v2141_v12, 0 }
   0xb   : > { %v2144_v16 = vand.u32 (!%p204_p3), %v6359_v14, %v2142_v15 }
   0xc   : > { %2149 = vmatpush1.bf16.msra.mxu0 (!%p204_p3), %v6351_v2  ;;  %6315 = vmatpush1.bf16.msra.mxu1 (!%p204_p3), %v6351_v2 }
   0xd   : > { %2150 = vmatprep.subr.bf16.mxu0 (!%p204_p3), %v6776_v1  ;;  %6306 = vmatprep.subr.bf16.mxu1 (!%p204_p3), %v6776_v1 }
   0xe   : > { %s8330_s25 = smov (!%p244_p4, %s5388_s25), 511 }
   0xf   : > { %s6047_s28 = sshll.u32 %s8330_s25, 3  ;;  %s5392_s26 = sshll.u32 %s8330_s25, 2 }
  0x10   : > { %2151 = vmatpush1.bf16.msra.mxu0 %v6352_v3  ;;  %6316 = vmatpush1.bf16.msra.mxu1 %v6352_v3  ;;  %s6839_s5 = scalar_lea.vmem %s8320_s0, %s6047_s28  ;;  %s7051_s28 = scalar_lea.vmem %s8324_s4, %s5392_s26 }
  0x11   : > { %2152 = vmatprep.subr.bf16.mxu0 %v6776_v1  ;;  %6307 = vmatprep.subr.bf16.mxu1 %v6776_v1  ;;  %v6362_v6 = vld [vmem:[%s6839_s5 + $0x4] ss:$8 sps:$4 sm:$0xff]   ;;  %v6360_v17 = vld [vmem:[%s6839_s5] ss:$8 sps:$4 sm:$0xff]   ;;  %v6366_v19 = vld [vmem:[%s6839_s5 + $0x14] ss:$8 sps:$4 sm:$0xff]  }
  0x12   : > { %v6365_v7 = vld [vmem:[%s6839_s5 + $0x404] ss:$8 sps:$4 sm:$0xff]   ;;  %5659 = vmatprep.mubr.msk.bf16.mxu0 %vm1754_vm0, %v6362_v6  ;;  %v6363_v18 = vld [vmem:[%s6839_s5 + $0x400] ss:$8 sps:$4 sm:$0xff]   ;;  %v6368_v20 = vld [vmem:[%s6839_s5 + $0x414] ss:$8 sps:$4 sm:$0xff]  }
  0x13   : > { %5723 = vmatprep.mubr.msk.bf16.mxu1 %vm1754_vm0, %v6365_v7  ;;  %v6370_v21 = vld [vmem:[%s6839_s5 + $0x10] ss:$8 sps:$4 sm:$0xff]   ;;  %v6372_v23 = vld [vmem:[%s6839_s5 + $0x24] ss:$8 sps:$4 sm:$0xff]   ;;  %v6376_v25 = vld [vmem:[%s6839_s5 + $0x20] ss:$8 sps:$4 sm:$0xff]  }
  0x14   : > { %2153 = vmatpush1.bf16.msra.mxu0 %v6353_v4  ;;  %6317 = vmatpush1.bf16.msra.mxu1 %v6353_v4  ;;  %v6371_v22 = vld [vmem:[%s6839_s5 + $0x410] ss:$8 sps:$4 sm:$0xff]   ;;  %v6374_v24 = vld [vmem:[%s6839_s5 + $0x424] ss:$8 sps:$4 sm:$0xff]   ;;  %v6377_v26 = vld [vmem:[%s6839_s5 + $0x420] ss:$8 sps:$4 sm:$0xff]  }
  0x15   : > { %2154 = vmatprep.subr.bf16.mxu0 %v6776_v1  ;;  %6308 = vmatprep.subr.bf16.mxu1 %v6776_v1  ;;  %v6378_v27 = vld [vmem:[%s6839_s5 + $0x34] ss:$8 sps:$4 sm:$0xff]   ;;  %v6382_v29 = vld [vmem:[%s6839_s5 + $0x30] ss:$8 sps:$4 sm:$0xff]   ;;  %v6384_v31 = vld [vmem:[%s6839_s5 + $0x44] ss:$8 sps:$4 sm:$0xff]  }
  0x16   : > { %v6380_v28 = vld [vmem:[%s6839_s5 + $0x434] ss:$8 sps:$4 sm:$0xff]   ;;  %v6383_v30 = vld [vmem:[%s6839_s5 + $0x430] ss:$8 sps:$4 sm:$0xff]   ;;  %v6386_v32 = vld [vmem:[%s6839_s5 + $0x444] ss:$8 sps:$4 sm:$0xff]  }
  0x17   : > { %v6388_v33 = vld [vmem:[%s6839_s5 + $0x40] ss:$8 sps:$4 sm:$0xff]   ;;  %v6390_v35 = vld [vmem:[%s6839_s5 + $0x54] ss:$8 sps:$4 sm:$0xff]   ;;  %v6394_v37 = vld [vmem:[%s6839_s5 + $0x50] ss:$8 sps:$4 sm:$0xff]  }
  0x18   : > { %2155 = vmatpush1.bf16.msra.mxu0 %v6354_v5  ;;  %6318 = vmatpush1.bf16.msra.mxu1 %v6354_v5  ;;  %v6389_v34 = vld [vmem:[%s6839_s5 + $0x440] ss:$8 sps:$4 sm:$0xff]   ;;  %v6392_v36 = vld [vmem:[%s6839_s5 + $0x454] ss:$8 sps:$4 sm:$0xff]   ;;  %v6395_v38 = vld [vmem:[%s6839_s5 + $0x450] ss:$8 sps:$4 sm:$0xff]  }
  0x19   : > { %2156 = vmatprep.subr.bf16.mxu0 %v6776_v1  ;;  %6309 = vmatprep.subr.bf16.mxu1 %v6776_v1  ;;  %v6396_v39 = vld [vmem:[%s6839_s5 + $0x64] ss:$8 sps:$4 sm:$0xff]   ;;  %v6400_v41 = vld [vmem:[%s6839_s5 + $0x60] ss:$8 sps:$4 sm:$0xff]   ;;  %v6402_v43 = vld [vmem:[%s6839_s5 + $0x74] ss:$8 sps:$4 sm:$0xff]  }
  0x1a   : > { %v6398_v40 = vld [vmem:[%s6839_s5 + $0x464] ss:$8 sps:$4 sm:$0xff]   ;;  %v6401_v42 = vld [vmem:[%s6839_s5 + $0x460] ss:$8 sps:$4 sm:$0xff]   ;;  %v6404_v44 = vld [vmem:[%s6839_s5 + $0x474] ss:$8 sps:$4 sm:$0xff]  }
  0x1b   : > { %v6406_v45 = vld [vmem:[%s6839_s5 + $0x70] ss:$8 sps:$4 sm:$0xff]   ;;  %v6408_v47 = vld [vmem:[%s6839_s5 + $0x84] ss:$8 sps:$4 sm:$0xff]   ;;  %v6412_v49 = vld [vmem:[%s6839_s5 + $0x80] ss:$8 sps:$4 sm:$0xff]  }
  0x1c   : > { %2157 = vmatpush1.bf16.msra.mxu0 %v6355_v8  ;;  %6319 = vmatpush1.bf16.msra.mxu1 %v6355_v8  ;;  %v6407_v46 = vld [vmem:[%s6839_s5 + $0x470] ss:$8 sps:$4 sm:$0xff]   ;;  %v6410_v48 = vld [vmem:[%s6839_s5 + $0x484] ss:$8 sps:$4 sm:$0xff]   ;;  %v6413_v50 = vld [vmem:[%s6839_s5 + $0x480] ss:$8 sps:$4 sm:$0xff]  }
  0x1d   : > { %2158 = vmatprep.subr.bf16.mxu0 %v6776_v1  ;;  %6310 = vmatprep.subr.bf16.mxu1 %v6776_v1  ;;  %v6414_v51 = vld [vmem:[%s6839_s5 + $0x94] ss:$8 sps:$4 sm:$0xff]   ;;  %v6418_v53 = vld [vmem:[%s6839_s5 + $0x90] ss:$8 sps:$4 sm:$0xff]   ;;  %v6420_v55 = vld [vmem:[%s6839_s5 + $0xa4] ss:$8 sps:$4 sm:$0xff]  }
  0x1e   : > { %v6416_v52 = vld [vmem:[%s6839_s5 + $0x494] ss:$8 sps:$4 sm:$0xff]   ;;  %v6419_v54 = vld [vmem:[%s6839_s5 + $0x490] ss:$8 sps:$4 sm:$0xff]   ;;  %v6422_v56 = vld [vmem:[%s6839_s5 + $0x4a4] ss:$8 sps:$4 sm:$0xff]  }
  0x1f   : > { %v6424_v57 = vld [vmem:[%s6839_s5 + $0xa0] ss:$8 sps:$4 sm:$0xff]   ;;  %v6426_v59 = vld [vmem:[%s6839_s5 + $0xb4] ss:$8 sps:$4 sm:$0xff]   ;;  %v6430_v61 = vld [vmem:[%s6839_s5 + $0xb0] ss:$8 sps:$4 sm:$0xff]  }
  0x20   : > { %2159 = vmatpush1.bf16.msra.mxu0 %v6356_v9  ;;  %6320 = vmatpush1.bf16.msra.mxu1 %v6356_v9  ;;  %v6425_v58 = vld [vmem:[%s6839_s5 + $0x4a0] ss:$8 sps:$4 sm:$0xff]   ;;  %v6428_v60 = vld [vmem:[%s6839_s5 + $0x4b4] ss:$8 sps:$4 sm:$0xff]   ;;  %v6431_v62 = vld [vmem:[%s6839_s5 + $0x4b0] ss:$8 sps:$4 sm:$0xff]  }
  0x21   : > { %2160 = vmatprep.subr.bf16.mxu0 %v6776_v1  ;;  %6311 = vmatprep.subr.bf16.mxu1 %v6776_v1  ;;  %v6432_v63 = vld [vmem:[%s6839_s5 + $0xc4] ss:$8 sps:$4 sm:$0xff]   ;;  %v6437_v2 = vld [vmem:[%s6839_s5 + $0x4c0] ss:$8 sps:$4 sm:$0xff]   ;;  %v6438_v3 = vld [vmem:[%s6839_s5 + $0xd4] ss:$8 sps:$4 sm:$0xff]  }
  0x22   : > { %v6434_v0 = vld [vmem:[%s6839_s5 + $0x4c4] ss:$8 sps:$4 sm:$0xff]   ;;  %v6440_v4 = vld [vmem:[%s6839_s5 + $0x4d4] ss:$8 sps:$4 sm:$0xff]   ;;  %v6442_v5 = vld [vmem:[%s6839_s5 + $0xd0] ss:$8 sps:$4 sm:$0xff]  }
  0x23   : > { %v6443_v6 = vld [vmem:[%s6839_s5 + $0x4d0] ss:$8 sps:$4 sm:$0xff]   ;;  %v6444_v7 = vld [vmem:[%s6839_s5 + $0xe4] ss:$8 sps:$4 sm:$0xff]   ;;  %v6448_v9 = vld [vmem:[%s6839_s5 + $0xe0] ss:$8 sps:$4 sm:$0xff]  }
  0x24   : > { %2161 = vmatpush1.bf16.msra.mxu0 %v6357_v10  ;;  %6321 = vmatpush1.bf16.msra.mxu1 %v6357_v10  ;;  %v6446_v8 = vld [vmem:[%s6839_s5 + $0x4e4] ss:$8 sps:$4 sm:$0xff]   ;;  %v6449_v10 = vld [vmem:[%s6839_s5 + $0x4e0] ss:$8 sps:$4 sm:$0xff]   ;;  %v6450_v11 = vld [vmem:[%s6839_s5 + $0xf4] ss:$8 sps:$4 sm:$0xff]  }
  0x25   : > { %2162 = vmatprep.subr.bf16.mxu0 %v6776_v1  ;;  %6312 = vmatprep.subr.bf16.mxu1 %v6776_v1  ;;  %v6452_v12 = vld [vmem:[%s6839_s5 + $0x4f4] ss:$8 sps:$4 sm:$0xff]   ;;  %v6455_v14 = vld [vmem:[%s6839_s5 + $0x4f0] ss:$8 sps:$4 sm:$0xff]   ;;  %v6456_v15 = vld [vmem:[%s6839_s5 + $0x104] ss:$8 sps:$4 sm:$0xff]  }
  0x28   : > { %2163 = vmatpush1.bf16.msra.mxu0 %v6358_v13  ;;  %6322 = vmatpush1.bf16.msra.mxu1 %v6358_v13  ;;  %v6454_v13 = vld [vmem:[%s6839_s5 + $0xf0] ss:$8 sps:$4 sm:$0xff]  }
  0x29   : > { %2164 = vmatprep.subr.bf16.mxu0 %v6776_v1  ;;  %6313 = vmatprep.subr.bf16.mxu1 %v6776_v1  ;;  %v6436_v1 = vld [vmem:[%s6839_s5 + $0xc0] ss:$8 sps:$4 sm:$0xff]  }
  0x2c   : > { %2165 = vmatpush1.bf16.msra.mxu0 %v2144_v16  ;;  %6323 = vmatpush1.bf16.msra.mxu1 %v2144_v16  ;;  %v6458_v16 = vld [vmem:[%s6839_s5 + $0x504] ss:$8 sps:$4 sm:$0xff]  }
  0x2f   : > { %2179 = vmatmul.mubr.bf16.vlgmr.msra.gmra.mrb[0].mxu0 %v6360_v17  ;;  %2691 = vmatmul.mubr.bf16.vlgmr.msra.gmra.mrb[0].mxu1 %v6363_v18  ;;  %v6460_v17 = vld [vmem:[%s6839_s5 + $0x100] ss:$8 sps:$4 sm:$0xff]  }
  0x30   : > { %5660 = vmatprep.mubr.msk.bf16.mxu0 %vm1754_vm0, %v6366_v19  ;;  %5724 = vmatprep.mubr.msk.bf16.mxu1 %vm1754_vm0, %v6368_v20  ;;  %v6461_v18 = vld [vmem:[%s6839_s5 + $0x500] ss:$8 sps:$4 sm:$0xff]   ;;  %v6462_v19 = vld [vmem:[%s6839_s5 + $0x114] ss:$8 sps:$4 sm:$0xff]  }
  0x31   : > { %v6464_v20 = vld [vmem:[%s6839_s5 + $0x514] ss:$8 sps:$4 sm:$0xff]  }
  0x37   : > { %2187 = vmatmul.mubr.bf16.gmra.mrb[4].mxu0 %v6370_v21  ;;  %2699 = vmatmul.mubr.bf16.gmra.mrb[4].mxu1 %v6371_v22  ;;  %v6466_v21 = vld [vmem:[%s6839_s5 + $0x110] ss:$8 sps:$4 sm:$0xff]  }
  0x38   : > { %5661 = vmatprep.mubr.msk.bf16.mxu0 %vm1754_vm0, %v6372_v23  ;;  %5725 = vmatprep.mubr.msk.bf16.mxu1 %vm1754_vm0, %v6374_v24  ;;  %v6467_v22 = vld [vmem:[%s6839_s5 + $0x510] ss:$8 sps:$4 sm:$0xff]   ;;  %v6468_v23 = vld [vmem:[%s6839_s5 + $0x124] ss:$8 sps:$4 sm:$0xff]  }
  0x39   : > { %v6470_v24 = vld [vmem:[%s6839_s5 + $0x524] ss:$8 sps:$4 sm:$0xff]  }
  0x3f   : > { %2195 = vmatmul.mubr.bf16.gmra.mrb[8].mxu0 %v6376_v25  ;;  %2707 = vmatmul.mubr.bf16.gmra.mrb[8].mxu1 %v6377_v26  ;;  %v6472_v25 = vld [vmem:[%s6839_s5 + $0x120] ss:$8 sps:$4 sm:$0xff]  }
  0x40   : > { %5662 = vmatprep.mubr.msk.bf16.mxu0 %vm1754_vm0, %v6378_v27  ;;  %5726 = vmatprep.mubr.msk.bf16.mxu1 %vm1754_vm0, %v6380_v28  ;;  %v6473_v26 = vld [vmem:[%s6839_s5 + $0x520] ss:$8 sps:$4 sm:$0xff]   ;;  %v6474_v27 = vld [vmem:[%s6839_s5 + $0x134] ss:$8 sps:$4 sm:$0xff]  }
  0x41   : > { %v6476_v28 = vld [vmem:[%s6839_s5 + $0x534] ss:$8 sps:$4 sm:$0xff]  }
  0x47   : > { %2203 = vmatmul.mubr.bf16.gmra.mrb[12].mxu0 %v6382_v29  ;;  %2715 = vmatmul.mubr.bf16.gmra.mrb[12].mxu1 %v6383_v30  ;;  %v6478_v29 = vld [vmem:[%s6839_s5 + $0x130] ss:$8 sps:$4 sm:$0xff]  }
  0x48   : > { %5663 = vmatprep.mubr.msk.bf16.mxu0 %vm1754_vm0, %v6384_v31  ;;  %5727 = vmatprep.mubr.msk.bf16.mxu1 %vm1754_vm0, %v6386_v32  ;;  %v6479_v30 = vld [vmem:[%s6839_s5 + $0x530] ss:$8 sps:$4 sm:$0xff]   ;;  %v6480_v31 = vld [vmem:[%s6839_s5 + $0x144] ss:$8 sps:$4 sm:$0xff]  }
  0x49   : > { %v6482_v32 = vld [vmem:[%s6839_s5 + $0x544] ss:$8 sps:$4 sm:$0xff]  }
  0x4f   : > { %2211 = vmatmul.mubr.bf16.gmra.mrb[16].mxu0 %v6388_v33  ;;  %2723 = vmatmul.mubr.bf16.gmra.mrb[16].mxu1 %v6389_v34  ;;  %v6484_v33 = vld [vmem:[%s6839_s5 + $0x140] ss:$8 sps:$4 sm:$0xff]  }
  0x50   : > { %5664 = vmatprep.mubr.msk.bf16.mxu0 %vm1754_vm0, %v6390_v35  ;;  %5728 = vmatprep.mubr.msk.bf16.mxu1 %vm1754_vm0, %v6392_v36  ;;  %v6485_v34 = vld [vmem:[%s6839_s5 + $0x540] ss:$8 sps:$4 sm:$0xff]   ;;  %v6486_v35 = vld [vmem:[%s6839_s5 + $0x154] ss:$8 sps:$4 sm:$0xff]  }
  0x51   : > { %v6488_v36 = vld [vmem:[%s6839_s5 + $0x554] ss:$8 sps:$4 sm:$0xff]  }
  0x57   : > { %2219 = vmatmul.mubr.bf16.gmra.mrb[20].mxu0 %v6394_v37  ;;  %2731 = vmatmul.mubr.bf16.gmra.mrb[20].mxu1 %v6395_v38  ;;  %v6490_v37 = vld [vmem:[%s6839_s5 + $0x150] ss:$8 sps:$4 sm:$0xff]  }
  0x58   : > { %5665 = vmatprep.mubr.msk.bf16.mxu0 %vm1754_vm0, %v6396_v39  ;;  %5729 = vmatprep.mubr.msk.bf16.mxu1 %vm1754_vm0, %v6398_v40  ;;  %v6491_v38 = vld [vmem:[%s6839_s5 + $0x550] ss:$8 sps:$4 sm:$0xff]   ;;  %v6492_v39 = vld [vmem:[%s6839_s5 + $0x164] ss:$8 sps:$4 sm:$0xff]  }
  0x59   : > { %v6494_v40 = vld [vmem:[%s6839_s5 + $0x564] ss:$8 sps:$4 sm:$0xff]  }
  0x5f   : > { %2227 = vmatmul.mubr.bf16.gmra.mrb[24].mxu0 %v6400_v41  ;;  %2739 = vmatmul.mubr.bf16.gmra.mrb[24].mxu1 %v6401_v42  ;;  %v6496_v41 = vld [vmem:[%s6839_s5 + $0x160] ss:$8 sps:$4 sm:$0xff]  }
  0x60   : > { %5666 = vmatprep.mubr.msk.bf16.mxu0 %vm1754_vm0, %v6402_v43  ;;  %5730 = vmatprep.mubr.msk.bf16.mxu1 %vm1754_vm0, %v6404_v44  ;;  %v6497_v42 = vld [vmem:[%s6839_s5 + $0x560] ss:$8 sps:$4 sm:$0xff]   ;;  %v6498_v43 = vld [vmem:[%s6839_s5 + $0x174] ss:$8 sps:$4 sm:$0xff]  }
  0x61   : > { %v6500_v44 = vld [vmem:[%s6839_s5 + $0x574] ss:$8 sps:$4 sm:$0xff]  }
  0x67   : > { %2235 = vmatmul.mubr.bf16.gmra.mrb[28].mxu0 %v6406_v45  ;;  %2747 = vmatmul.mubr.bf16.gmra.mrb[28].mxu1 %v6407_v46  ;;  %v6502_v45 = vld [vmem:[%s6839_s5 + $0x170] ss:$8 sps:$4 sm:$0xff]  }
  0x68   : > { %5667 = vmatprep.mubr.msk.bf16.mxu0 %vm1754_vm0, %v6408_v47  ;;  %5731 = vmatprep.mubr.msk.bf16.mxu1 %vm1754_vm0, %v6410_v48  ;;  %v6503_v46 = vld [vmem:[%s6839_s5 + $0x570] ss:$8 sps:$4 sm:$0xff]   ;;  %v6504_v47 = vld [vmem:[%s6839_s5 + $0x184] ss:$8 sps:$4 sm:$0xff]  }
  0x69   : > { %v6506_v48 = vld [vmem:[%s6839_s5 + $0x584] ss:$8 sps:$4 sm:$0xff]  }
  0x6f   : > { %2243 = vmatmul.mubr.bf16.gmra.mrb[32].mxu0 %v6412_v49  ;;  %2755 = vmatmul.mubr.bf16.gmra.mrb[32].mxu1 %v6413_v50  ;;  %v6508_v49 = vld [vmem:[%s6839_s5 + $0x180] ss:$8 sps:$4 sm:$0xff]  }
  0x70   : > { %5668 = vmatprep.mubr.msk.bf16.mxu0 %vm1754_vm0, %v6414_v51  ;;  %5732 = vmatprep.mubr.msk.bf16.mxu1 %vm1754_vm0, %v6416_v52  ;;  %v6509_v50 = vld [vmem:[%s6839_s5 + $0x580] ss:$8 sps:$4 sm:$0xff]   ;;  %v6510_v51 = vld [vmem:[%s6839_s5 + $0x194] ss:$8 sps:$4 sm:$0xff]  }
  0x71   : > { %v6512_v52 = vld [vmem:[%s6839_s5 + $0x594] ss:$8 sps:$4 sm:$0xff]  }
  0x77   : > { %2251 = vmatmul.mubr.bf16.gmra.mrb[36].mxu0 %v6418_v53  ;;  %2763 = vmatmul.mubr.bf16.gmra.mrb[36].mxu1 %v6419_v54  ;;  %v6514_v53 = vld [vmem:[%s6839_s5 + $0x190] ss:$8 sps:$4 sm:$0xff]  }
  0x78   : > { %5669 = vmatprep.mubr.msk.bf16.mxu0 %vm1754_vm0, %v6420_v55  ;;  %5733 = vmatprep.mubr.msk.bf16.mxu1 %vm1754_vm0, %v6422_v56  ;;  %v6515_v54 = vld [vmem:[%s6839_s5 + $0x590] ss:$8 sps:$4 sm:$0xff]   ;;  %v6516_v55 = vld [vmem:[%s6839_s5 + $0x1a4] ss:$8 sps:$4 sm:$0xff]  }
  0x79   : > { %v6518_v56 = vld [vmem:[%s6839_s5 + $0x5a4] ss:$8 sps:$4 sm:$0xff]  }
  0x7f   : > { %2259 = vmatmul.mubr.bf16.gmra.mrb[40].mxu0 %v6424_v57  ;;  %2771 = vmatmul.mubr.bf16.gmra.mrb[40].mxu1 %v6425_v58  ;;  %v6520_v57 = vld [vmem:[%s6839_s5 + $0x1a0] ss:$8 sps:$4 sm:$0xff]  }
  0x80   : > { %5670 = vmatprep.mubr.msk.bf16.mxu0 %vm1754_vm0, %v6426_v59  ;;  %5734 = vmatprep.mubr.msk.bf16.mxu1 %vm1754_vm0, %v6428_v60  ;;  %v6521_v58 = vld [vmem:[%s6839_s5 + $0x5a0] ss:$8 sps:$4 sm:$0xff]   ;;  %v6522_v59 = vld [vmem:[%s6839_s5 + $0x1b4] ss:$8 sps:$4 sm:$0xff]  }
  0x81   : > { %v6524_v60 = vld [vmem:[%s6839_s5 + $0x5b4] ss:$8 sps:$4 sm:$0xff]  }
  0x87   : > { %2267 = vmatmul.mubr.bf16.gmra.mrb[44].mxu0 %v6430_v61  ;;  %2779 = vmatmul.mubr.bf16.gmra.mrb[44].mxu1 %v6431_v62  ;;  %v7026_v61 = vld [vmem:[%s8322_s2] ss:$0 sm:$0xff] }
  0x88   : > { %5671 = vmatprep.mubr.msk.bf16.mxu0 %vm1754_vm0, %v6432_v63  ;;  %5735 = vmatprep.mubr.msk.bf16.mxu1 %vm1754_vm0, %v6434_v0  ;;  %v7033_v63 = vld [vmem:[%s8323_s3] ss:$0 sm:$0xff] }
  0x8f   : > { %2275 = vmatmul.mubr.bf16.gmra.mrb[48].mxu0 %v6436_v1  ;;  %2787 = vmatmul.mubr.bf16.gmra.mrb[48].mxu1 %v6437_v2 }
  0x90   : > { %5672 = vmatprep.mubr.msk.bf16.mxu0 %vm1754_vm0, %v6438_v3  ;;  %5736 = vmatprep.mubr.msk.bf16.mxu1 %vm1754_vm0, %v6440_v4 }
  0x97   : > { %2283 = vmatmul.mubr.bf16.gmra.mrb[52].mxu0 %v6442_v5  ;;  %2795 = vmatmul.mubr.bf16.gmra.mrb[52].mxu1 %v6443_v6  ;;  %v6526_v5 = vld [vmem:[%s6839_s5 + $0x1b0] ss:$8 sps:$4 sm:$0xff]  }
  0x98   : > { %5673 = vmatprep.mubr.msk.bf16.mxu0 %vm1754_vm0, %v6444_v7  ;;  %5737 = vmatprep.mubr.msk.bf16.mxu1 %vm1754_vm0, %v6446_v8  ;;  %v6527_v6 = vld [vmem:[%s6839_s5 + $0x5b0] ss:$8 sps:$4 sm:$0xff]  }
  0x9f   : > { %2291 = vmatmul.mubr.bf16.gmra.mrb[56].mxu0 %v6448_v9  ;;  %2803 = vmatmul.mubr.bf16.gmra.mrb[56].mxu1 %v6449_v10  ;;  %v6528_v9 = vld [vmem:[%s6839_s5 + $0x1c4] ss:$8 sps:$4 sm:$0xff]  }
  0xa0   : > { %5674 = vmatprep.mubr.msk.bf16.mxu0 %vm1754_vm0, %v6450_v11  ;;  %5738 = vmatprep.mubr.msk.bf16.mxu1 %vm1754_vm0, %v6452_v12  ;;  %v6530_v10 = vld [vmem:[%s6839_s5 + $0x5c4] ss:$8 sps:$4 sm:$0xff]  }
  0xa7   : > { %2299 = vmatmul.mubr.bf16.gmra.mrb[60].mxu0 %v6454_v13  ;;  %2811 = vmatmul.mubr.bf16.gmra.mrb[60].mxu1 %v6455_v14 }
  0xa8   : > { %5675 = vmatprep.mubr.msk.bf16.mxu0 %vm1754_vm0, %v6456_v15  ;;  %5739 = vmatprep.mubr.msk.bf16.mxu1 %vm1754_vm0, %v6458_v16 }
  0xaf   : > { %2307 = vmatmul.mubr.bf16.gmra.mrb[64].mxu0 %v6460_v17  ;;  %2819 = vmatmul.mubr.bf16.gmra.mrb[64].mxu1 %v6461_v18 }
  0xb0   : > { %5676 = vmatprep.mubr.msk.bf16.mxu0 %vm1754_vm0, %v6462_v19  ;;  %5740 = vmatprep.mubr.msk.bf16.mxu1 %vm1754_vm0, %v6464_v20 }
  0xb7   : > { %2315 = vmatmul.mubr.bf16.gmra.mrb[68].mxu0 %v6466_v21  ;;  %2827 = vmatmul.mubr.bf16.gmra.mrb[68].mxu1 %v6467_v22 }
  0xb8   : > { %5677 = vmatprep.mubr.msk.bf16.mxu0 %vm1754_vm0, %v6468_v23  ;;  %5741 = vmatprep.mubr.msk.bf16.mxu1 %vm1754_vm0, %v6470_v24 }
  0xbf   : > { %2323 = vmatmul.mubr.bf16.gmra.mrb[72].mxu0 %v6472_v25  ;;  %2835 = vmatmul.mubr.bf16.gmra.mrb[72].mxu1 %v6473_v26 }
  0xc0   : > { %5678 = vmatprep.mubr.msk.bf16.mxu0 %vm1754_vm0, %v6474_v27  ;;  %5742 = vmatprep.mubr.msk.bf16.mxu1 %vm1754_vm0, %v6476_v28 }
  0xc7   : > { %2331 = vmatmul.mubr.bf16.gmra.mrb[76].mxu0 %v6478_v29  ;;  %2843 = vmatmul.mubr.bf16.gmra.mrb[76].mxu1 %v6479_v30 }
  0xc8   : > { %5679 = vmatprep.mubr.msk.bf16.mxu0 %vm1754_vm0, %v6480_v31  ;;  %5743 = vmatprep.mubr.msk.bf16.mxu1 %vm1754_vm0, %v6482_v32 }
  0xcf   : > { %2339 = vmatmul.mubr.bf16.gmra.mrb[80].mxu0 %v6484_v33  ;;  %2851 = vmatmul.mubr.bf16.gmra.mrb[80].mxu1 %v6485_v34  ;;  %v6532_v33 = vld [vmem:[%s6839_s5 + $0x1c0] ss:$8 sps:$4 sm:$0xff]  }
  0xd0   : > { %5680 = vmatprep.mubr.msk.bf16.mxu0 %vm1754_vm0, %v6486_v35  ;;  %5744 = vmatprep.mubr.msk.bf16.mxu1 %vm1754_vm0, %v6488_v36  ;;  %v6533_v34 = vld [vmem:[%s6839_s5 + $0x5c0] ss:$8 sps:$4 sm:$0xff]  }
  0xd7   : > { %2347 = vmatmul.mubr.bf16.gmra.mrb[84].mxu0 %v6490_v37  ;;  %2859 = vmatmul.mubr.bf16.gmra.mrb[84].mxu1 %v6491_v38  ;;  %v6534_v37 = vld [vmem:[%s6839_s5 + $0x1d4] ss:$8 sps:$4 sm:$0xff]  }
  0xd8   : > { %5681 = vmatprep.mubr.msk.bf16.mxu0 %vm1754_vm0, %v6492_v39  ;;  %5745 = vmatprep.mubr.msk.bf16.mxu1 %vm1754_vm0, %v6494_v40  ;;  %v6536_v38 = vld [vmem:[%s6839_s5 + $0x5d4] ss:$8 sps:$4 sm:$0xff]  }
  0xdf   : > { %2355 = vmatmul.mubr.bf16.gmra.mrb[88].mxu0 %v6496_v41  ;;  %2867 = vmatmul.mubr.bf16.gmra.mrb[88].mxu1 %v6497_v42 }
  0xe0   : > { %5682 = vmatprep.mubr.msk.bf16.mxu0 %vm1754_vm0, %v6498_v43  ;;  %5746 = vmatprep.mubr.msk.bf16.mxu1 %vm1754_vm0, %v6500_v44 }
  0xe7   : > { %2363 = vmatmul.mubr.bf16.gmra.mrb[92].mxu0 %v6502_v45  ;;  %2875 = vmatmul.mubr.bf16.gmra.mrb[92].mxu1 %v6503_v46 }
  0xe8   : > { %5683 = vmatprep.mubr.msk.bf16.mxu0 %vm1754_vm0, %v6504_v47  ;;  %5747 = vmatprep.mubr.msk.bf16.mxu1 %vm1754_vm0, %v6506_v48 }
  0xef   : > { %2371 = vmatmul.mubr.bf16.gmra.mrb[96].mxu0 %v6508_v49  ;;  %2883 = vmatmul.mubr.bf16.gmra.mrb[96].mxu1 %v6509_v50 }
  0xf0   : > { %5684 = vmatprep.mubr.msk.bf16.mxu0 %vm1754_vm0, %v6510_v51  ;;  %5748 = vmatprep.mubr.msk.bf16.mxu1 %vm1754_vm0, %v6512_v52 }
  0xf7   : > { %2379 = vmatmul.mubr.bf16.gmra.mrb[100].mxu0 %v6514_v53  ;;  %2891 = vmatmul.mubr.bf16.gmra.mrb[100].mxu1 %v6515_v54 }
  0xf8   : > { %5685 = vmatprep.mubr.msk.bf16.mxu0 %vm1754_vm0, %v6516_v55  ;;  %5749 = vmatprep.mubr.msk.bf16.mxu1 %vm1754_vm0, %v6518_v56 }
  0xff   : > { %2387 = vmatmul.mubr.bf16.gmra.mrb[104].mxu0 %v6520_v57  ;;  %2899 = vmatmul.mubr.bf16.gmra.mrb[104].mxu1 %v6521_v58 }
 0x100   : > { %5686 = vmatprep.mubr.msk.bf16.mxu0 %vm1754_vm0, %v6522_v59  ;;  %5750 = vmatprep.mubr.msk.bf16.mxu1 %vm1754_vm0, %v6524_v60 }
 0x102   : > { %v2180_v62 = vpop.f32.mrb[0].mxu0  ;;  %v2692_v0 = vpop.f32.mrb[0].mxu1 }
 0x103   : > { %v3210_v1 = vmul.f32 %v7026_v61, %v2180_v62  ;;  %v3338_v2 = vmul.f32 %v7026_v61, %v2692_v0  ;;  %v2182_v3 = vpop.f32.mrb[1].mxu0  ;;  %v2694_v4 = vpop.f32.mrb[1].mxu1  ;;  %v6538_v62 = vld [vmem:[%s6839_s5 + $0x1d0] ss:$8 sps:$4 sm:$0xff]  }
 0x104   : > { %v2183_v7 = vpop.f32.mrb[2].mxu0  ;;  %v2695_v8 = vpop.f32.mrb[2].mxu1  ;;  %v6539_v0 = vld [vmem:[%s6839_s5 + $0x5d0] ss:$8 sps:$4 sm:$0xff]   ;;  %v6540_v3 = vld [vmem:[%s6839_s5 + $0x1e4] ss:$8 sps:$4 sm:$0xff]  }
 0x105   : > { %v3473_v11 = vadd.f32 %v7033_v63, %v3210_v1  ;;  %v3601_v12 = vadd.f32 %v7033_v63, %v3338_v2  ;;  %v3211_v13 = vmul.f32 %v7026_v61, %v2183_v7  ;;  %v3339_v14 = vmul.f32 %v7026_v61, %v2695_v8  ;;  %v2185_v15 = vpop.f32.mrb[3].mxu0  ;;  %v2697_v16 = vpop.f32.mrb[3].mxu1  ;;  %v6542_v4 = vld [vmem:[%s6839_s5 + $0x5e4] ss:$8 sps:$4 sm:$0xff]  }
 0x107   : > { %v3729_v17 = vmax.f32 %v3473_v11, 0.0  ;;  %v3857_v18 = vmax.f32 %v3601_v12, 0.0  ;;  %v3474_v19 = vadd.f32 %v7033_v63, %v3211_v13  ;;  %v3602_v20 = vadd.f32 %v7033_v63, %v3339_v14  ;;  %2395 = vmatmul.mubr.bf16.gmra.mrb[108].mxu0 %v6526_v5  ;;  %2907 = vmatmul.mubr.bf16.gmra.mrb[108].mxu1 %v6527_v6 }
 0x108   : > { %5687 = vmatprep.mubr.msk.bf16.mxu0 %vm1754_vm0, %v6528_v9  ;;  %5751 = vmatprep.mubr.msk.bf16.mxu1 %vm1754_vm0, %v6530_v10 }
 0x109   : > { %v6048_v21 = vpack.c.bf16 %v3729_v17, %v3729_v17  ;;  %v6176_v22 = vpack.c.bf16 %v3857_v18, %v3857_v18  ;;  %v3730_v23 = vmax.f32 %v3474_v19, 0.0  ;;  %v3858_v24 = vmax.f32 %v3602_v20, 0.0 }
 0x10a   : > { %v2188_v25 = vpop.f32.mrb[4].mxu0  ;;  %v2700_v26 = vpop.f32.mrb[4].mxu1 }
 0x10b   : > { %5010 = vst.msk [vmem:[%s7051_s28] sm:$0xf] %vm5009_vm3, %v6048_v21  ;;  %5138 = vst.msk [vmem:[%s7051_s28 + $0x200] sm:$0xf] %vm5009_vm3, %v6176_v22  ;;  %v6049_v27 = vpack.c.bf16 %v3730_v23, %v3730_v23  ;;  %v6177_v28 = vpack.c.bf16 %v3858_v24, %v3858_v24  ;;  %v3212_v29 = vmul.f32 %v7026_v61, %v2188_v25  ;;  %v2190_v31 = vpop.f32.mrb[5].mxu0  ;;  %v2702_v32 = vpop.f32.mrb[5].mxu1 }
 0x10c   : > { %v3340_v30 = vmul.f32 %v7026_v61, %v2700_v26  ;;  %v2191_v35 = vpop.f32.mrb[6].mxu0  ;;  %v2703_v36 = vpop.f32.mrb[6].mxu1  ;;  %v6546_v31 = vld [vmem:[%s6839_s5 + $0x1f4] ss:$8 sps:$4 sm:$0xff]  }
 0x10d   : > { %5011 = vst.msk [vmem:[%s7051_s28 + $0x4] sm:$0xf] %vm5009_vm3, %v6049_v27  ;;  %5139 = vst.msk [vmem:[%s7051_s28 + $0x204] sm:$0xf] %vm5009_vm3, %v6177_v28  ;;  %v3475_v39 = vadd.f32 %v7033_v63, %v3212_v29  ;;  %v3213_v41 = vmul.f32 %v7026_v61, %v2191_v35  ;;  %v3341_v42 = vmul.f32 %v7026_v61, %v2703_v36  ;;  %v2193_v43 = vpop.f32.mrb[7].mxu0  ;;  %v2705_v44 = vpop.f32.mrb[7].mxu1 }
 0x10e   : > { %v3603_v40 = vadd.f32 %v7033_v63, %v3340_v30  ;;  %v6544_v27 = vld [vmem:[%s6839_s5 + $0x1e0] ss:$8 sps:$4 sm:$0xff]   ;;  %v6548_v32 = vld [vmem:[%s6839_s5 + $0x5f4] ss:$8 sps:$4 sm:$0xff]  }
 0x10f   : > { %v3731_v45 = vmax.f32 %v3475_v39, 0.0  ;;  %v3476_v47 = vadd.f32 %v7033_v63, %v3213_v41  ;;  %v3604_v48 = vadd.f32 %v7033_v63, %v3341_v42  ;;  %2403 = vmatmul.mubr.bf16.gmra.mrb[112].mxu0 %v6532_v33  ;;  %2915 = vmatmul.mubr.bf16.gmra.mrb[112].mxu1 %v6533_v34  ;;  %v6545_v28 = vld [vmem:[%s6839_s5 + $0x5e0] ss:$8 sps:$4 sm:$0xff]  }
 0x110   : > { %v3859_v46 = vmax.f32 %v3603_v40, 0.0  ;;  %5688 = vmatprep.mubr.msk.bf16.mxu0 %vm1754_vm0, %v6534_v37  ;;  %5752 = vmatprep.mubr.msk.bf16.mxu1 %vm1754_vm0, %v6536_v38 }
 0x111   : > { %v6050_v49 = vpack.c.bf16 %v3731_v45, %v3731_v45  ;;  %v3732_v51 = vmax.f32 %v3476_v47, 0.0  ;;  %v3860_v52 = vmax.f32 %v3604_v48, 0.0 }
 0x112   : > { %v6178_v50 = vpack.c.bf16 %v3859_v46, %v3859_v46  ;;  %v2196_v53 = vpop.f32.mrb[8].mxu0  ;;  %v2708_v54 = vpop.f32.mrb[8].mxu1 }
 0x113   : > { %5012 = vst.msk [vmem:[%s7051_s28 + $0x8] sm:$0xf] %vm5009_vm3, %v6050_v49  ;;  %v6051_v55 = vpack.c.bf16 %v3732_v51, %v3732_v51  ;;  %v6179_v56 = vpack.c.bf16 %v3860_v52, %v3860_v52  ;;  %v3214_v57 = vmul.f32 %v7026_v61, %v2196_v53  ;;  %v3342_v58 = vmul.f32 %v7026_v61, %v2708_v54  ;;  %v2198_v59 = vpop.f32.mrb[9].mxu0  ;;  %v2710_v60 = vpop.f32.mrb[9].mxu1 }
 0x114   : > { %5140 = vst.msk [vmem:[%s7051_s28 + $0x208] sm:$0xf] %vm5009_vm3, %v6178_v50  ;;  %v2199_v1 = vpop.f32.mrb[10].mxu0  ;;  %v2711_v2 = vpop.f32.mrb[10].mxu1  ;;  %v6552_v59 = vld [vmem:[%s6839_s5 + $0x204] ss:$8 sps:$4 sm:$0xff]  }
 0x115   : > { %5013 = vst.msk [vmem:[%s7051_s28 + $0xc] sm:$0xf] %vm5009_vm3, %v6051_v55  ;;  %5141 = vst.msk [vmem:[%s7051_s28 + $0x20c] sm:$0xf] %vm5009_vm3, %v6179_v56  ;;  %v3477_v5 = vadd.f32 %v7033_v63, %v3214_v57  ;;  %v3605_v6 = vadd.f32 %v7033_v63, %v3342_v58  ;;  %v3215_v7 = vmul.f32 %v7026_v61, %v2199_v1  ;;  %v2201_v9 = vpop.f32.mrb[11].mxu0  ;;  %v2713_v10 = vpop.f32.mrb[11].mxu1 }
 0x116   : > { %v3343_v8 = vmul.f32 %v7026_v61, %v2711_v2  ;;  %v6550_v55 = vld [vmem:[%s6839_s5 + $0x1f0] ss:$8 sps:$4 sm:$0xff]   ;;  %v6554_v60 = vld [vmem:[%s6839_s5 + $0x604] ss:$8 sps:$4 sm:$0xff]  }
 0x117   : > { %v3733_v11 = vmax.f32 %v3477_v5, 0.0  ;;  %v3861_v12 = vmax.f32 %v3605_v6, 0.0  ;;  %v3478_v13 = vadd.f32 %v7033_v63, %v3215_v7  ;;  %2411 = vmatmul.mubr.bf16.gmra.mrb[116].mxu0 %v6538_v62  ;;  %2923 = vmatmul.mubr.bf16.gmra.mrb[116].mxu1 %v6539_v0  ;;  %v6551_v56 = vld [vmem:[%s6839_s5 + $0x5f0] ss:$8 sps:$4 sm:$0xff]  }
 0x118   : > { %v3606_v14 = vadd.f32 %v7033_v63, %v3343_v8  ;;  %5689 = vmatprep.mubr.msk.bf16.mxu0 %vm1754_vm0, %v6540_v3  ;;  %5753 = vmatprep.mubr.msk.bf16.mxu1 %vm1754_vm0, %v6542_v4 }
 0x119   : > { %v6052_v15 = vpack.c.bf16 %v3733_v11, %v3733_v11  ;;  %v6180_v16 = vpack.c.bf16 %v3861_v12, %v3861_v12  ;;  %v3734_v17 = vmax.f32 %v3478_v13, 0.0 }
 0x11a   : > { %v3862_v18 = vmax.f32 %v3606_v14, 0.0  ;;  %v2204_v19 = vpop.f32.mrb[12].mxu0  ;;  %v2716_v20 = vpop.f32.mrb[12].mxu1 }
 0x11b   : > { %5014 = vst.msk [vmem:[%s7051_s28 + $0x10] sm:$0xf] %vm5009_vm3, %v6052_v15  ;;  %5142 = vst.msk [vmem:[%s7051_s28 + $0x210] sm:$0xf] %vm5009_vm3, %v6180_v16  ;;  %v6053_v21 = vpack.c.bf16 %v3734_v17, %v3734_v17  ;;  %v3216_v23 = vmul.f32 %v7026_v61, %v2204_v19  ;;  %v3344_v24 = vmul.f32 %v7026_v61, %v2716_v20  ;;  %v2206_v25 = vpop.f32.mrb[13].mxu0  ;;  %v2718_v26 = vpop.f32.mrb[13].mxu1 }
 0x11c   : > { %v6181_v22 = vpack.c.bf16 %v3862_v18, %v3862_v18  ;;  %v2207_v29 = vpop.f32.mrb[14].mxu0  ;;  %v2719_v30 = vpop.f32.mrb[14].mxu1  ;;  %v6558_v25 = vld [vmem:[%s6839_s5 + $0x214] ss:$8 sps:$4 sm:$0xff]  }
 0x11d   : > { %5015 = vst.msk [vmem:[%s7051_s28 + $0x14] sm:$0xf] %vm5009_vm3, %v6053_v21  ;;  %v3479_v33 = vadd.f32 %v7033_v63, %v3216_v23  ;;  %v3607_v34 = vadd.f32 %v7033_v63, %v3344_v24  ;;  %v3217_v35 = vmul.f32 %v7026_v61, %v2207_v29  ;;  %v3345_v36 = vmul.f32 %v7026_v61, %v2719_v30  ;;  %v2209_v37 = vpop.f32.mrb[15].mxu0  ;;  %v2721_v38 = vpop.f32.mrb[15].mxu1  ;;  %v6556_v21 = vld [vmem:[%s6839_s5 + $0x200] ss:$8 sps:$4 sm:$0xff]  }
 0x11e   : > { %5143 = vst.msk [vmem:[%s7051_s28 + $0x214] sm:$0xf] %vm5009_vm3, %v6181_v22  ;;  %v6557_v22 = vld [vmem:[%s6839_s5 + $0x600] ss:$8 sps:$4 sm:$0xff]   ;;  %v6560_v26 = vld [vmem:[%s6839_s5 + $0x614] ss:$8 sps:$4 sm:$0xff]  }
 0x11f   : > { %v3735_v39 = vmax.f32 %v3479_v33, 0.0  ;;  %v3863_v40 = vmax.f32 %v3607_v34, 0.0  ;;  %v3480_v41 = vadd.f32 %v7033_v63, %v3217_v35  ;;  %v3608_v42 = vadd.f32 %v7033_v63, %v3345_v36  ;;  %2419 = vmatmul.mubr.bf16.gmra.mrb[120].mxu0 %v6544_v27  ;;  %2931 = vmatmul.mubr.bf16.gmra.mrb[120].mxu1 %v6545_v28 }
 0x120   : > { %5690 = vmatprep.mubr.msk.bf16.mxu0 %vm1754_vm0, %v6546_v31  ;;  %5754 = vmatprep.mubr.msk.bf16.mxu1 %vm1754_vm0, %v6548_v32 }
 0x121   : > { %v6054_v43 = vpack.c.bf16 %v3735_v39, %v3735_v39  ;;  %v6182_v44 = vpack.c.bf16 %v3863_v40, %v3863_v40  ;;  %v3736_v45 = vmax.f32 %v3480_v41, 0.0  ;;  %v3864_v46 = vmax.f32 %v3608_v42, 0.0 }
 0x122   : > { %v2212_v47 = vpop.f32.mrb[16].mxu0  ;;  %v2724_v48 = vpop.f32.mrb[16].mxu1 }
 0x123   : > { %5016 = vst.msk [vmem:[%s7051_s28 + $0x18] sm:$0xf] %vm5009_vm3, %v6054_v43  ;;  %5144 = vst.msk [vmem:[%s7051_s28 + $0x218] sm:$0xf] %vm5009_vm3, %v6182_v44  ;;  %v6055_v49 = vpack.c.bf16 %v3736_v45, %v3736_v45  ;;  %v6183_v50 = vpack.c.bf16 %v3864_v46, %v3864_v46  ;;  %v3218_v51 = vmul.f32 %v7026_v61, %v2212_v47  ;;  %v2214_v53 = vpop.f32.mrb[17].mxu0  ;;  %v2726_v54 = vpop.f32.mrb[17].mxu1 }
 0x124   : > { %v3346_v52 = vmul.f32 %v7026_v61, %v2724_v48  ;;  %v2215_v57 = vpop.f32.mrb[18].mxu0  ;;  %v2727_v58 = vpop.f32.mrb[18].mxu1  ;;  %v6564_v53 = vld [vmem:[%s6839_s5 + $0x224] ss:$8 sps:$4 sm:$0xff]  }
 0x125   : > { %5017 = vst.msk [vmem:[%s7051_s28 + $0x1c] sm:$0xf] %vm5009_vm3, %v6055_v49  ;;  %5145 = vst.msk [vmem:[%s7051_s28 + $0x21c] sm:$0xf] %vm5009_vm3, %v6183_v50  ;;  %v3481_v62 = vadd.f32 %v7033_v63, %v3218_v51  ;;  %v3219_v1 = vmul.f32 %v7026_v61, %v2215_v57  ;;  %v3347_v2 = vmul.f32 %v7026_v61, %v2727_v58  ;;  %v2217_v3 = vpop.f32.mrb[19].mxu0  ;;  %v2729_v4 = vpop.f32.mrb[19].mxu1 }
 0x126   : > { %v3609_v0 = vadd.f32 %v7033_v63, %v3346_v52  ;;  %v6562_v49 = vld [vmem:[%s6839_s5 + $0x210] ss:$8 sps:$4 sm:$0xff]   ;;  %v6566_v54 = vld [vmem:[%s6839_s5 + $0x624] ss:$8 sps:$4 sm:$0xff]  }
 0x127   : > { %v3737_v5 = vmax.f32 %v3481_v62, 0.0  ;;  %v3482_v7 = vadd.f32 %v7033_v63, %v3219_v1  ;;  %v3610_v8 = vadd.f32 %v7033_v63, %v3347_v2  ;;  %2427 = vmatmul.mubr.bf16.gmra.mrb[124].mxu0 %v6550_v55  ;;  %2939 = vmatmul.mubr.bf16.gmra.mrb[124].mxu1 %v6551_v56  ;;  %v6563_v50 = vld [vmem:[%s6839_s5 + $0x610] ss:$8 sps:$4 sm:$0xff]  }
 0x128   : > { %v3865_v6 = vmax.f32 %v3609_v0, 0.0  ;;  %5691 = vmatprep.mubr.msk.bf16.mxu0 %vm1754_vm0, %v6552_v59  ;;  %5755 = vmatprep.mubr.msk.bf16.mxu1 %vm1754_vm0, %v6554_v60 }
 0x129   : > { %v6056_v9 = vpack.c.bf16 %v3737_v5, %v3737_v5  ;;  %v3738_v11 = vmax.f32 %v3482_v7, 0.0  ;;  %v3866_v12 = vmax.f32 %v3610_v8, 0.0 }
 0x12a   : > { %v6184_v10 = vpack.c.bf16 %v3865_v6, %v3865_v6  ;;  %v2220_v13 = vpop.f32.mrb[20].mxu0  ;;  %v2732_v14 = vpop.f32.mrb[20].mxu1 }
 0x12b   : > { %5018 = vst.msk [vmem:[%s7051_s28 + $0x20] sm:$0xf] %vm5009_vm3, %v6056_v9  ;;  %v6057_v15 = vpack.c.bf16 %v3738_v11, %v3738_v11  ;;  %v6185_v16 = vpack.c.bf16 %v3866_v12, %v3866_v12  ;;  %v3220_v17 = vmul.f32 %v7026_v61, %v2220_v13  ;;  %v3348_v18 = vmul.f32 %v7026_v61, %v2732_v14  ;;  %v2222_v19 = vpop.f32.mrb[21].mxu0  ;;  %v2734_v20 = vpop.f32.mrb[21].mxu1 }
 0x12c   : > { %5146 = vst.msk [vmem:[%s7051_s28 + $0x220] sm:$0xf] %vm5009_vm3, %v6184_v10  ;;  %v2223_v23 = vpop.f32.mrb[22].mxu0  ;;  %v2735_v24 = vpop.f32.mrb[22].mxu1  ;;  %v6570_v19 = vld [vmem:[%s6839_s5 + $0x234] ss:$8 sps:$4 sm:$0xff]  }
 0x12d   : > { %5019 = vst.msk [vmem:[%s7051_s28 + $0x24] sm:$0xf] %vm5009_vm3, %v6057_v15  ;;  %5147 = vst.msk [vmem:[%s7051_s28 + $0x224] sm:$0xf] %vm5009_vm3, %v6185_v16  ;;  %v3483_v27 = vadd.f32 %v7033_v63, %v3220_v17  ;;  %v3611_v28 = vadd.f32 %v7033_v63, %v3348_v18  ;;  %v3221_v29 = vmul.f32 %v7026_v61, %v2223_v23  ;;  %v2225_v31 = vpop.f32.mrb[23].mxu0  ;;  %v2737_v32 = vpop.f32.mrb[23].mxu1 }
 0x12e   : > { %v3349_v30 = vmul.f32 %v7026_v61, %v2735_v24  ;;  %v6568_v15 = vld [vmem:[%s6839_s5 + $0x220] ss:$8 sps:$4 sm:$0xff]   ;;  %v6572_v20 = vld [vmem:[%s6839_s5 + $0x634] ss:$8 sps:$4 sm:$0xff]  }
 0x12f   : > { %v3739_v33 = vmax.f32 %v3483_v27, 0.0  ;;  %v3867_v34 = vmax.f32 %v3611_v28, 0.0  ;;  %v3484_v35 = vadd.f32 %v7033_v63, %v3221_v29  ;;  %2435 = vmatmul.mubr.bf16.gmra.mrb[128].mxu0 %v6556_v21  ;;  %2947 = vmatmul.mubr.bf16.gmra.mrb[128].mxu1 %v6557_v22  ;;  %v6569_v16 = vld [vmem:[%s6839_s5 + $0x620] ss:$8 sps:$4 sm:$0xff]  }
 0x130   : > { %v3612_v36 = vadd.f32 %v7033_v63, %v3349_v30  ;;  %5692 = vmatprep.mubr.msk.bf16.mxu0 %vm1754_vm0, %v6558_v25  ;;  %5756 = vmatprep.mubr.msk.bf16.mxu1 %vm1754_vm0, %v6560_v26 }
 0x131   : > { %v6058_v37 = vpack.c.bf16 %v3739_v33, %v3739_v33  ;;  %v6186_v38 = vpack.c.bf16 %v3867_v34, %v3867_v34  ;;  %v3740_v39 = vmax.f32 %v3484_v35, 0.0 }
 0x132   : > { %v3868_v40 = vmax.f32 %v3612_v36, 0.0  ;;  %v2228_v41 = vpop.f32.mrb[24].mxu0  ;;  %v2740_v42 = vpop.f32.mrb[24].mxu1 }
 0x133   : > { %5020 = vst.msk [vmem:[%s7051_s28 + $0x28] sm:$0xf] %vm5009_vm3, %v6058_v37  ;;  %5148 = vst.msk [vmem:[%s7051_s28 + $0x228] sm:$0xf] %vm5009_vm3, %v6186_v38  ;;  %v6059_v43 = vpack.c.bf16 %v3740_v39, %v3740_v39  ;;  %v3222_v45 = vmul.f32 %v7026_v61, %v2228_v41  ;;  %v3350_v46 = vmul.f32 %v7026_v61, %v2740_v42  ;;  %v2230_v47 = vpop.f32.mrb[25].mxu0  ;;  %v2742_v48 = vpop.f32.mrb[25].mxu1 }
 0x134   : > { %v6187_v44 = vpack.c.bf16 %v3868_v40, %v3868_v40  ;;  %v2231_v51 = vpop.f32.mrb[26].mxu0  ;;  %v2743_v52 = vpop.f32.mrb[26].mxu1  ;;  %v6576_v47 = vld [vmem:[%s6839_s5 + $0x244] ss:$8 sps:$4 sm:$0xff]  }
 0x135   : > { %5021 = vst.msk [vmem:[%s7051_s28 + $0x2c] sm:$0xf] %vm5009_vm3, %v6059_v43  ;;  %v3485_v55 = vadd.f32 %v7033_v63, %v3222_v45  ;;  %v3613_v56 = vadd.f32 %v7033_v63, %v3350_v46  ;;  %v3223_v57 = vmul.f32 %v7026_v61, %v2231_v51  ;;  %v3351_v58 = vmul.f32 %v7026_v61, %v2743_v52  ;;  %v2233_v59 = vpop.f32.mrb[27].mxu0  ;;  %v2745_v60 = vpop.f32.mrb[27].mxu1  ;;  %v6574_v43 = vld [vmem:[%s6839_s5 + $0x230] ss:$8 sps:$4 sm:$0xff]  }
 0x136   : > { %5149 = vst.msk [vmem:[%s7051_s28 + $0x22c] sm:$0xf] %vm5009_vm3, %v6187_v44  ;;  %v6575_v44 = vld [vmem:[%s6839_s5 + $0x630] ss:$8 sps:$4 sm:$0xff]   ;;  %v6578_v48 = vld [vmem:[%s6839_s5 + $0x644] ss:$8 sps:$4 sm:$0xff]  }
 0x137   : > { %v3741_v62 = vmax.f32 %v3485_v55, 0.0  ;;  %v3869_v0 = vmax.f32 %v3613_v56, 0.0  ;;  %v3486_v1 = vadd.f32 %v7033_v63, %v3223_v57  ;;  %v3614_v2 = vadd.f32 %v7033_v63, %v3351_v58  ;;  %2443 = vmatmul.mubr.bf16.gmra.mrb[132].mxu0 %v6562_v49  ;;  %2955 = vmatmul.mubr.bf16.gmra.mrb[132].mxu1 %v6563_v50 }
 0x138   : > { %5693 = vmatprep.mubr.msk.bf16.mxu0 %vm1754_vm0, %v6564_v53  ;;  %5757 = vmatprep.mubr.msk.bf16.mxu1 %vm1754_vm0, %v6566_v54 }
 0x139   : > { %v6060_v3 = vpack.c.bf16 %v3741_v62, %v3741_v62  ;;  %v6188_v4 = vpack.c.bf16 %v3869_v0, %v3869_v0  ;;  %v3742_v5 = vmax.f32 %v3486_v1, 0.0  ;;  %v3870_v6 = vmax.f32 %v3614_v2, 0.0 }
 0x13a   : > { %v2236_v7 = vpop.f32.mrb[28].mxu0  ;;  %v2748_v8 = vpop.f32.mrb[28].mxu1 }
 0x13b   : > { %5022 = vst.msk [vmem:[%s7051_s28 + $0x30] sm:$0xf] %vm5009_vm3, %v6060_v3  ;;  %5150 = vst.msk [vmem:[%s7051_s28 + $0x230] sm:$0xf] %vm5009_vm3, %v6188_v4  ;;  %v6061_v9 = vpack.c.bf16 %v3742_v5, %v3742_v5  ;;  %v6189_v10 = vpack.c.bf16 %v3870_v6, %v3870_v6  ;;  %v3224_v11 = vmul.f32 %v7026_v61, %v2236_v7  ;;  %v2238_v13 = vpop.f32.mrb[29].mxu0  ;;  %v2750_v14 = vpop.f32.mrb[29].mxu1 }
 0x13c   : > { %v3352_v12 = vmul.f32 %v7026_v61, %v2748_v8  ;;  %v2239_v17 = vpop.f32.mrb[30].mxu0  ;;  %v2751_v18 = vpop.f32.mrb[30].mxu1  ;;  %v6582_v13 = vld [vmem:[%s6839_s5 + $0x254] ss:$8 sps:$4 sm:$0xff]  }
 0x13d   : > { %5023 = vst.msk [vmem:[%s7051_s28 + $0x34] sm:$0xf] %vm5009_vm3, %v6061_v9  ;;  %5151 = vst.msk [vmem:[%s7051_s28 + $0x234] sm:$0xf] %vm5009_vm3, %v6189_v10  ;;  %v3487_v21 = vadd.f32 %v7033_v63, %v3224_v11  ;;  %v3225_v23 = vmul.f32 %v7026_v61, %v2239_v17  ;;  %v3353_v24 = vmul.f32 %v7026_v61, %v2751_v18  ;;  %v2241_v25 = vpop.f32.mrb[31].mxu0  ;;  %v2753_v26 = vpop.f32.mrb[31].mxu1 }
 0x13e   : > { %v3615_v22 = vadd.f32 %v7033_v63, %v3352_v12  ;;  %v6580_v9 = vld [vmem:[%s6839_s5 + $0x240] ss:$8 sps:$4 sm:$0xff]   ;;  %v6584_v14 = vld [vmem:[%s6839_s5 + $0x654] ss:$8 sps:$4 sm:$0xff]  }
 0x13f   : > { %v3743_v27 = vmax.f32 %v3487_v21, 0.0  ;;  %v3488_v29 = vadd.f32 %v7033_v63, %v3225_v23  ;;  %v3616_v30 = vadd.f32 %v7033_v63, %v3353_v24  ;;  %2451 = vmatmul.mubr.bf16.gmra.mrb[136].mxu0 %v6568_v15  ;;  %2963 = vmatmul.mubr.bf16.gmra.mrb[136].mxu1 %v6569_v16  ;;  %v6581_v10 = vld [vmem:[%s6839_s5 + $0x640] ss:$8 sps:$4 sm:$0xff]  }
 0x140   : > { %v3871_v28 = vmax.f32 %v3615_v22, 0.0  ;;  %5694 = vmatprep.mubr.msk.bf16.mxu0 %vm1754_vm0, %v6570_v19  ;;  %5758 = vmatprep.mubr.msk.bf16.mxu1 %vm1754_vm0, %v6572_v20 }
 0x141   : > { %v6062_v31 = vpack.c.bf16 %v3743_v27, %v3743_v27  ;;  %v3744_v33 = vmax.f32 %v3488_v29, 0.0  ;;  %v3872_v34 = vmax.f32 %v3616_v30, 0.0 }
 0x142   : > { %v6190_v32 = vpack.c.bf16 %v3871_v28, %v3871_v28  ;;  %v2244_v35 = vpop.f32.mrb[32].mxu0  ;;  %v2756_v36 = vpop.f32.mrb[32].mxu1 }
 0x143   : > { %5024 = vst.msk [vmem:[%s7051_s28 + $0x38] sm:$0xf] %vm5009_vm3, %v6062_v31  ;;  %v6063_v37 = vpack.c.bf16 %v3744_v33, %v3744_v33  ;;  %v6191_v38 = vpack.c.bf16 %v3872_v34, %v3872_v34  ;;  %v3226_v39 = vmul.f32 %v7026_v61, %v2244_v35  ;;  %v3354_v40 = vmul.f32 %v7026_v61, %v2756_v36  ;;  %v2246_v41 = vpop.f32.mrb[33].mxu0  ;;  %v2758_v42 = vpop.f32.mrb[33].mxu1 }
 0x144   : > { %5152 = vst.msk [vmem:[%s7051_s28 + $0x238] sm:$0xf] %vm5009_vm3, %v6190_v32  ;;  %v2247_v45 = vpop.f32.mrb[34].mxu0  ;;  %v2759_v46 = vpop.f32.mrb[34].mxu1  ;;  %v6588_v41 = vld [vmem:[%s6839_s5 + $0x264] ss:$8 sps:$4 sm:$0xff]  }
 0x145   : > { %5025 = vst.msk [vmem:[%s7051_s28 + $0x3c] sm:$0xf] %vm5009_vm3, %v6063_v37  ;;  %5153 = vst.msk [vmem:[%s7051_s28 + $0x23c] sm:$0xf] %vm5009_vm3, %v6191_v38  ;;  %v3489_v49 = vadd.f32 %v7033_v63, %v3226_v39  ;;  %v3617_v50 = vadd.f32 %v7033_v63, %v3354_v40  ;;  %v3227_v51 = vmul.f32 %v7026_v61, %v2247_v45  ;;  %v2249_v53 = vpop.f32.mrb[35].mxu0  ;;  %v2761_v54 = vpop.f32.mrb[35].mxu1 }
 0x146   : > { %v3355_v52 = vmul.f32 %v7026_v61, %v2759_v46  ;;  %v6586_v37 = vld [vmem:[%s6839_s5 + $0x250] ss:$8 sps:$4 sm:$0xff]   ;;  %v6590_v42 = vld [vmem:[%s6839_s5 + $0x664] ss:$8 sps:$4 sm:$0xff]  }
 0x147   : > { %v3745_v55 = vmax.f32 %v3489_v49, 0.0  ;;  %v3873_v56 = vmax.f32 %v3617_v50, 0.0  ;;  %v3490_v57 = vadd.f32 %v7033_v63, %v3227_v51  ;;  %2459 = vmatmul.mubr.bf16.gmra.mrb[140].mxu0 %v6574_v43  ;;  %2971 = vmatmul.mubr.bf16.gmra.mrb[140].mxu1 %v6575_v44  ;;  %v6587_v38 = vld [vmem:[%s6839_s5 + $0x650] ss:$8 sps:$4 sm:$0xff]  }
 0x148   : > { %v3618_v58 = vadd.f32 %v7033_v63, %v3355_v52  ;;  %5695 = vmatprep.mubr.msk.bf16.mxu0 %vm1754_vm0, %v6576_v47  ;;  %5759 = vmatprep.mubr.msk.bf16.mxu1 %vm1754_vm0, %v6578_v48 }
 0x149   : > { %v6064_v59 = vpack.c.bf16 %v3745_v55, %v3745_v55  ;;  %v6192_v60 = vpack.c.bf16 %v3873_v56, %v3873_v56  ;;  %v3746_v62 = vmax.f32 %v3490_v57, 0.0 }
 0x14a   : > { %v3874_v0 = vmax.f32 %v3618_v58, 0.0  ;;  %v2252_v1 = vpop.f32.mrb[36].mxu0  ;;  %v2764_v2 = vpop.f32.mrb[36].mxu1 }
 0x14b   : > { %5026 = vst.msk [vmem:[%s7051_s28 + $0x40] sm:$0xf] %vm5009_vm3, %v6064_v59  ;;  %5154 = vst.msk [vmem:[%s7051_s28 + $0x240] sm:$0xf] %vm5009_vm3, %v6192_v60  ;;  %v6065_v3 = vpack.c.bf16 %v3746_v62, %v3746_v62  ;;  %v3228_v5 = vmul.f32 %v7026_v61, %v2252_v1  ;;  %v3356_v6 = vmul.f32 %v7026_v61, %v2764_v2  ;;  %v2254_v7 = vpop.f32.mrb[37].mxu0  ;;  %v2766_v8 = vpop.f32.mrb[37].mxu1 }
 0x14c   : > { %v6193_v4 = vpack.c.bf16 %v3874_v0, %v3874_v0  ;;  %v2255_v11 = vpop.f32.mrb[38].mxu0  ;;  %v2767_v12 = vpop.f32.mrb[38].mxu1  ;;  %v6594_v7 = vld [vmem:[%s6839_s5 + $0x274] ss:$8 sps:$4 sm:$0xff]  }
 0x14d   : > { %5027 = vst.msk [vmem:[%s7051_s28 + $0x44] sm:$0xf] %vm5009_vm3, %v6065_v3  ;;  %v3491_v15 = vadd.f32 %v7033_v63, %v3228_v5  ;;  %v3619_v16 = vadd.f32 %v7033_v63, %v3356_v6  ;;  %v3229_v17 = vmul.f32 %v7026_v61, %v2255_v11  ;;  %v3357_v18 = vmul.f32 %v7026_v61, %v2767_v12  ;;  %v2257_v19 = vpop.f32.mrb[39].mxu0  ;;  %v2769_v20 = vpop.f32.mrb[39].mxu1  ;;  %v6592_v3 = vld [vmem:[%s6839_s5 + $0x260] ss:$8 sps:$4 sm:$0xff]  }
 0x14e   : > { %5155 = vst.msk [vmem:[%s7051_s28 + $0x244] sm:$0xf] %vm5009_vm3, %v6193_v4  ;;  %v6593_v4 = vld [vmem:[%s6839_s5 + $0x660] ss:$8 sps:$4 sm:$0xff]   ;;  %v6596_v8 = vld [vmem:[%s6839_s5 + $0x674] ss:$8 sps:$4 sm:$0xff]  }
 0x14f   : > { %v3747_v21 = vmax.f32 %v3491_v15, 0.0  ;;  %v3875_v22 = vmax.f32 %v3619_v16, 0.0  ;;  %v3492_v23 = vadd.f32 %v7033_v63, %v3229_v17  ;;  %v3620_v24 = vadd.f32 %v7033_v63, %v3357_v18  ;;  %2467 = vmatmul.mubr.bf16.gmra.mrb[144].mxu0 %v6580_v9  ;;  %2979 = vmatmul.mubr.bf16.gmra.mrb[144].mxu1 %v6581_v10 }
 0x150   : > { %5696 = vmatprep.mubr.msk.bf16.mxu0 %vm1754_vm0, %v6582_v13  ;;  %5760 = vmatprep.mubr.msk.bf16.mxu1 %vm1754_vm0, %v6584_v14 }
 0x151   : > { %v6066_v25 = vpack.c.bf16 %v3747_v21, %v3747_v21  ;;  %v6194_v26 = vpack.c.bf16 %v3875_v22, %v3875_v22  ;;  %v3748_v27 = vmax.f32 %v3492_v23, 0.0  ;;  %v3876_v28 = vmax.f32 %v3620_v24, 0.0 }
 0x152   : > { %v2260_v29 = vpop.f32.mrb[40].mxu0  ;;  %v2772_v30 = vpop.f32.mrb[40].mxu1 }
 0x153   : > { %5028 = vst.msk [vmem:[%s7051_s28 + $0x48] sm:$0xf] %vm5009_vm3, %v6066_v25  ;;  %5156 = vst.msk [vmem:[%s7051_s28 + $0x248] sm:$0xf] %vm5009_vm3, %v6194_v26  ;;  %v6067_v31 = vpack.c.bf16 %v3748_v27, %v3748_v27  ;;  %v6195_v32 = vpack.c.bf16 %v3876_v28, %v3876_v28  ;;  %v3230_v33 = vmul.f32 %v7026_v61, %v2260_v29  ;;  %v2262_v35 = vpop.f32.mrb[41].mxu0  ;;  %v2774_v36 = vpop.f32.mrb[41].mxu1 }
 0x154   : > { %v3358_v34 = vmul.f32 %v7026_v61, %v2772_v30  ;;  %v2263_v39 = vpop.f32.mrb[42].mxu0  ;;  %v2775_v40 = vpop.f32.mrb[42].mxu1  ;;  %v6600_v35 = vld [vmem:[%s6839_s5 + $0x284] ss:$8 sps:$4 sm:$0xff]  }
 0x155   : > { %5029 = vst.msk [vmem:[%s7051_s28 + $0x4c] sm:$0xf] %vm5009_vm3, %v6067_v31  ;;  %5157 = vst.msk [vmem:[%s7051_s28 + $0x24c] sm:$0xf] %vm5009_vm3, %v6195_v32  ;;  %v3493_v43 = vadd.f32 %v7033_v63, %v3230_v33  ;;  %v3231_v45 = vmul.f32 %v7026_v61, %v2263_v39  ;;  %v3359_v46 = vmul.f32 %v7026_v61, %v2775_v40  ;;  %v2265_v47 = vpop.f32.mrb[43].mxu0  ;;  %v2777_v48 = vpop.f32.mrb[43].mxu1 }
 0x156   : > { %v3621_v44 = vadd.f32 %v7033_v63, %v3358_v34  ;;  %v6598_v31 = vld [vmem:[%s6839_s5 + $0x270] ss:$8 sps:$4 sm:$0xff]   ;;  %v6602_v36 = vld [vmem:[%s6839_s5 + $0x684] ss:$8 sps:$4 sm:$0xff]  }
 0x157   : > { %v3749_v49 = vmax.f32 %v3493_v43, 0.0  ;;  %v3494_v51 = vadd.f32 %v7033_v63, %v3231_v45  ;;  %v3622_v52 = vadd.f32 %v7033_v63, %v3359_v46  ;;  %2475 = vmatmul.mubr.bf16.gmra.mrb[148].mxu0 %v6586_v37  ;;  %2987 = vmatmul.mubr.bf16.gmra.mrb[148].mxu1 %v6587_v38  ;;  %v6599_v32 = vld [vmem:[%s6839_s5 + $0x670] ss:$8 sps:$4 sm:$0xff]  }
 0x158   : > { %v3877_v50 = vmax.f32 %v3621_v44, 0.0  ;;  %5697 = vmatprep.mubr.msk.bf16.mxu0 %vm1754_vm0, %v6588_v41  ;;  %5761 = vmatprep.mubr.msk.bf16.mxu1 %vm1754_vm0, %v6590_v42 }
 0x159   : > { %v6068_v53 = vpack.c.bf16 %v3749_v49, %v3749_v49  ;;  %v3750_v55 = vmax.f32 %v3494_v51, 0.0  ;;  %v3878_v56 = vmax.f32 %v3622_v52, 0.0 }
 0x15a   : > { %v6196_v54 = vpack.c.bf16 %v3877_v50, %v3877_v50  ;;  %v2268_v57 = vpop.f32.mrb[44].mxu0  ;;  %v2780_v58 = vpop.f32.mrb[44].mxu1 }
 0x15b   : > { %5030 = vst.msk [vmem:[%s7051_s28 + $0x50] sm:$0xf] %vm5009_vm3, %v6068_v53  ;;  %v6069_v59 = vpack.c.bf16 %v3750_v55, %v3750_v55  ;;  %v6197_v60 = vpack.c.bf16 %v3878_v56, %v3878_v56  ;;  %v3232_v62 = vmul.f32 %v7026_v61, %v2268_v57  ;;  %v3360_v0 = vmul.f32 %v7026_v61, %v2780_v58  ;;  %v2270_v1 = vpop.f32.mrb[45].mxu0  ;;  %v2782_v2 = vpop.f32.mrb[45].mxu1 }
 0x15c   : > { %5158 = vst.msk [vmem:[%s7051_s28 + $0x250] sm:$0xf] %vm5009_vm3, %v6196_v54  ;;  %v2271_v5 = vpop.f32.mrb[46].mxu0  ;;  %v2783_v6 = vpop.f32.mrb[46].mxu1  ;;  %v6606_v1 = vld [vmem:[%s6839_s5 + $0x294] ss:$8 sps:$4 sm:$0xff]  }
 0x15d   : > { %5031 = vst.msk [vmem:[%s7051_s28 + $0x54] sm:$0xf] %vm5009_vm3, %v6069_v59  ;;  %5159 = vst.msk [vmem:[%s7051_s28 + $0x254] sm:$0xf] %vm5009_vm3, %v6197_v60  ;;  %v3495_v9 = vadd.f32 %v7033_v63, %v3232_v62  ;;  %v3623_v10 = vadd.f32 %v7033_v63, %v3360_v0  ;;  %v3233_v11 = vmul.f32 %v7026_v61, %v2271_v5  ;;  %v2273_v13 = vpop.f32.mrb[47].mxu0  ;;  %v2785_v14 = vpop.f32.mrb[47].mxu1 }
 0x15e   : > { %v3361_v12 = vmul.f32 %v7026_v61, %v2783_v6  ;;  %v6604_v59 = vld [vmem:[%s6839_s5 + $0x280] ss:$8 sps:$4 sm:$0xff]   ;;  %v6608_v2 = vld [vmem:[%s6839_s5 + $0x694] ss:$8 sps:$4 sm:$0xff]  }
 0x15f   : > { %v3751_v15 = vmax.f32 %v3495_v9, 0.0  ;;  %v3879_v16 = vmax.f32 %v3623_v10, 0.0  ;;  %v3496_v17 = vadd.f32 %v7033_v63, %v3233_v11  ;;  %2483 = vmatmul.mubr.bf16.gmra.mrb[152].mxu0 %v6592_v3  ;;  %2995 = vmatmul.mubr.bf16.gmra.mrb[152].mxu1 %v6593_v4  ;;  %v6605_v60 = vld [vmem:[%s6839_s5 + $0x680] ss:$8 sps:$4 sm:$0xff]  }
 0x160   : > { %v3624_v18 = vadd.f32 %v7033_v63, %v3361_v12  ;;  %5698 = vmatprep.mubr.msk.bf16.mxu0 %vm1754_vm0, %v6594_v7  ;;  %5762 = vmatprep.mubr.msk.bf16.mxu1 %vm1754_vm0, %v6596_v8 }
 0x161   : > { %v6070_v19 = vpack.c.bf16 %v3751_v15, %v3751_v15  ;;  %v6198_v20 = vpack.c.bf16 %v3879_v16, %v3879_v16  ;;  %v3752_v21 = vmax.f32 %v3496_v17, 0.0 }
 0x162   : > { %v3880_v22 = vmax.f32 %v3624_v18, 0.0  ;;  %v2276_v23 = vpop.f32.mrb[48].mxu0  ;;  %v2788_v24 = vpop.f32.mrb[48].mxu1 }
 0x163   : > { %5032 = vst.msk [vmem:[%s7051_s28 + $0x58] sm:$0xf] %vm5009_vm3, %v6070_v19  ;;  %5160 = vst.msk [vmem:[%s7051_s28 + $0x258] sm:$0xf] %vm5009_vm3, %v6198_v20  ;;  %v6071_v25 = vpack.c.bf16 %v3752_v21, %v3752_v21  ;;  %v3234_v27 = vmul.f32 %v7026_v61, %v2276_v23  ;;  %v3362_v28 = vmul.f32 %v7026_v61, %v2788_v24  ;;  %v2278_v29 = vpop.f32.mrb[49].mxu0  ;;  %v2790_v30 = vpop.f32.mrb[49].mxu1 }
 0x164   : > { %v6199_v26 = vpack.c.bf16 %v3880_v22, %v3880_v22  ;;  %v2279_v33 = vpop.f32.mrb[50].mxu0  ;;  %v2791_v34 = vpop.f32.mrb[50].mxu1  ;;  %v7349_v21 = vld [vmem:[%s8322_s2] ss:$0 sm:$0xff]  ;;  %v6612_v29 = vld [vmem:[%s6839_s5 + $0x2a4] ss:$8 sps:$4 sm:$0xff]  }
 0x165   : > { %5033 = vst.msk [vmem:[%s7051_s28 + $0x5c] sm:$0xf] %vm5009_vm3, %v6071_v25  ;;  %v3497_v37 = vadd.f32 %v7033_v63, %v3234_v27  ;;  %v3625_v38 = vadd.f32 %v7033_v63, %v3362_v28  ;;  %v3235_v39 = vmul.f32 %v7026_v61, %v2279_v33  ;;  %v3363_v40 = vmul.f32 %v7026_v61, %v2791_v34  ;;  %v2281_v41 = vpop.f32.mrb[51].mxu0  ;;  %v2793_v42 = vpop.f32.mrb[51].mxu1  ;;  %v6610_v25 = vld [vmem:[%s6839_s5 + $0x290] ss:$8 sps:$4 sm:$0xff]  }
 0x166   : > { %5161 = vst.msk [vmem:[%s7051_s28 + $0x25c] sm:$0xf] %vm5009_vm3, %v6199_v26  ;;  %v6611_v26 = vld [vmem:[%s6839_s5 + $0x690] ss:$8 sps:$4 sm:$0xff]   ;;  %v6614_v30 = vld [vmem:[%s6839_s5 + $0x6a4] ss:$8 sps:$4 sm:$0xff]  }
 0x167   : > { %v3753_v43 = vmax.f32 %v3497_v37, 0.0  ;;  %v3881_v44 = vmax.f32 %v3625_v38, 0.0  ;;  %v3498_v45 = vadd.f32 %v7033_v63, %v3235_v39  ;;  %v3626_v46 = vadd.f32 %v7033_v63, %v3363_v40  ;;  %2491 = vmatmul.mubr.bf16.gmra.mrb[156].mxu0 %v6598_v31  ;;  %3003 = vmatmul.mubr.bf16.gmra.mrb[156].mxu1 %v6599_v32 }
 0x168   : > { %5699 = vmatprep.mubr.msk.bf16.mxu0 %vm1754_vm0, %v6600_v35  ;;  %5763 = vmatprep.mubr.msk.bf16.mxu1 %vm1754_vm0, %v6602_v36 }
 0x169   : > { %v6072_v47 = vpack.c.bf16 %v3753_v43, %v3753_v43  ;;  %v6200_v48 = vpack.c.bf16 %v3881_v44, %v3881_v44  ;;  %v3754_v49 = vmax.f32 %v3498_v45, 0.0  ;;  %v3882_v50 = vmax.f32 %v3626_v46, 0.0 }
 0x16a   : > { %v2284_v51 = vpop.f32.mrb[52].mxu0  ;;  %v2796_v52 = vpop.f32.mrb[52].mxu1 }
 0x16b   : > { %5034 = vst.msk [vmem:[%s7051_s28 + $0x60] sm:$0xf] %vm5009_vm3, %v6072_v47  ;;  %5162 = vst.msk [vmem:[%s7051_s28 + $0x260] sm:$0xf] %vm5009_vm3, %v6200_v48  ;;  %v6073_v53 = vpack.c.bf16 %v3754_v49, %v3754_v49  ;;  %v6201_v54 = vpack.c.bf16 %v3882_v50, %v3882_v50  ;;  %v3236_v55 = vmul.f32 %v7026_v61, %v2284_v51  ;;  %v2286_v57 = vpop.f32.mrb[53].mxu0  ;;  %v2798_v58 = vpop.f32.mrb[53].mxu1 }
 0x16c   : > { %v3364_v56 = vmul.f32 %v7026_v61, %v2796_v52  ;;  %v2287_v62 = vpop.f32.mrb[54].mxu0  ;;  %v2799_v0 = vpop.f32.mrb[54].mxu1  ;;  %v6618_v57 = vld [vmem:[%s6839_s5 + $0x2b4] ss:$8 sps:$4 sm:$0xff]  }
 0x16d   : > { %5035 = vst.msk [vmem:[%s7051_s28 + $0x64] sm:$0xf] %vm5009_vm3, %v6073_v53  ;;  %5163 = vst.msk [vmem:[%s7051_s28 + $0x264] sm:$0xf] %vm5009_vm3, %v6201_v54  ;;  %v3499_v3 = vadd.f32 %v7033_v63, %v3236_v55  ;;  %v3237_v5 = vmul.f32 %v7026_v61, %v2287_v62  ;;  %v3365_v6 = vmul.f32 %v7026_v61, %v2799_v0  ;;  %v2289_v7 = vpop.f32.mrb[55].mxu0  ;;  %v2801_v8 = vpop.f32.mrb[55].mxu1 }
 0x16e   : > { %v3627_v4 = vadd.f32 %v7033_v63, %v3364_v56  ;;  %v6616_v53 = vld [vmem:[%s6839_s5 + $0x2a0] ss:$8 sps:$4 sm:$0xff]   ;;  %v6620_v58 = vld [vmem:[%s6839_s5 + $0x6b4] ss:$8 sps:$4 sm:$0xff]  }
 0x16f   : > { %v3755_v9 = vmax.f32 %v3499_v3, 0.0  ;;  %v3500_v11 = vadd.f32 %v7033_v63, %v3237_v5  ;;  %v3628_v12 = vadd.f32 %v7033_v63, %v3365_v6  ;;  %2499 = vmatmul.mubr.bf16.gmra.mrb[160].mxu0 %v6604_v59  ;;  %3011 = vmatmul.mubr.bf16.gmra.mrb[160].mxu1 %v6605_v60  ;;  %v6617_v54 = vld [vmem:[%s6839_s5 + $0x6a0] ss:$8 sps:$4 sm:$0xff]  }
 0x170   : > { %v3883_v10 = vmax.f32 %v3627_v4, 0.0  ;;  %5700 = vmatprep.mubr.msk.bf16.mxu0 %vm1754_vm0, %v6606_v1  ;;  %5764 = vmatprep.mubr.msk.bf16.mxu1 %vm1754_vm0, %v6608_v2 }
 0x171   : > { %v6074_v13 = vpack.c.bf16 %v3755_v9, %v3755_v9  ;;  %v3756_v15 = vmax.f32 %v3500_v11, 0.0  ;;  %v3884_v16 = vmax.f32 %v3628_v12, 0.0 }
 0x172   : > { %v6202_v14 = vpack.c.bf16 %v3883_v10, %v3883_v10  ;;  %v2292_v17 = vpop.f32.mrb[56].mxu0  ;;  %v2804_v18 = vpop.f32.mrb[56].mxu1 }
 0x173   : > { %5036 = vst.msk [vmem:[%s7051_s28 + $0x68] sm:$0xf] %vm5009_vm3, %v6074_v13  ;;  %v6075_v63 = vpack.c.bf16 %v3756_v15, %v3756_v15  ;;  %v6203_v19 = vpack.c.bf16 %v3884_v16, %v3884_v16  ;;  %v3238_v20 = vmul.f32 %v7026_v61, %v2292_v17  ;;  %v3366_v22 = vmul.f32 %v7349_v21, %v2804_v18  ;;  %v2294_v23 = vpop.f32.mrb[57].mxu0  ;;  %v2806_v24 = vpop.f32.mrb[57].mxu1  ;;  %v7363_v61 = vld [vmem:[%s8323_s3] ss:$0 sm:$0xff] }
 0x174   : > { %5164 = vst.msk [vmem:[%s7051_s28 + $0x268] sm:$0xf] %vm5009_vm3, %v6202_v14  ;;  %v2295_v27 = vpop.f32.mrb[58].mxu0  ;;  %v2807_v28 = vpop.f32.mrb[58].mxu1  ;;  %v6624_v23 = vld [vmem:[%s6839_s5 + $0x2c4] ss:$8 sps:$4 sm:$0xff]  }
 0x175   : > { %5037 = vst.msk [vmem:[%s7051_s28 + $0x6c] sm:$0xf] %vm5009_vm3, %v6075_v63  ;;  %5165 = vst.msk [vmem:[%s7051_s28 + $0x26c] sm:$0xf] %vm5009_vm3, %v6203_v19  ;;  %v3501_v31 = vadd.f32 %v7363_v61, %v3238_v20  ;;  %v3629_v32 = vadd.f32 %v7363_v61, %v3366_v22  ;;  %v3239_v33 = vmul.f32 %v7349_v21, %v2295_v27  ;;  %v2297_v35 = vpop.f32.mrb[59].mxu0  ;;  %v2809_v36 = vpop.f32.mrb[59].mxu1 }
 0x176   : > { %v3367_v34 = vmul.f32 %v7349_v21, %v2807_v28  ;;  %v6622_v63 = vld [vmem:[%s6839_s5 + $0x2b0] ss:$8 sps:$4 sm:$0xff]   ;;  %v6626_v24 = vld [vmem:[%s6839_s5 + $0x6c4] ss:$8 sps:$4 sm:$0xff]  }
 0x177   : > { %v3757_v37 = vmax.f32 %v3501_v31, 0.0  ;;  %v3885_v38 = vmax.f32 %v3629_v32, 0.0  ;;  %v3502_v39 = vadd.f32 %v7363_v61, %v3239_v33  ;;  %2507 = vmatmul.mubr.bf16.gmra.mrb[164].mxu0 %v6610_v25  ;;  %3019 = vmatmul.mubr.bf16.gmra.mrb[164].mxu1 %v6611_v26  ;;  %v6623_v19 = vld [vmem:[%s6839_s5 + $0x6b0] ss:$8 sps:$4 sm:$0xff]  }
 0x178   : > { %v3630_v40 = vadd.f32 %v7363_v61, %v3367_v34  ;;  %5701 = vmatprep.mubr.msk.bf16.mxu0 %vm1754_vm0, %v6612_v29  ;;  %5765 = vmatprep.mubr.msk.bf16.mxu1 %vm1754_vm0, %v6614_v30 }
 0x179   : > { %v6076_v41 = vpack.c.bf16 %v3757_v37, %v3757_v37  ;;  %v6204_v42 = vpack.c.bf16 %v3885_v38, %v3885_v38  ;;  %v3758_v43 = vmax.f32 %v3502_v39, 0.0 }
 0x17a   : > { %v3886_v44 = vmax.f32 %v3630_v40, 0.0  ;;  %v2300_v45 = vpop.f32.mrb[60].mxu0  ;;  %v2812_v46 = vpop.f32.mrb[60].mxu1 }
 0x17b   : > { %5038 = vst.msk [vmem:[%s7051_s28 + $0x70] sm:$0xf] %vm5009_vm3, %v6076_v41  ;;  %5166 = vst.msk [vmem:[%s7051_s28 + $0x270] sm:$0xf] %vm5009_vm3, %v6204_v42  ;;  %v6077_v47 = vpack.c.bf16 %v3758_v43, %v3758_v43  ;;  %v3240_v49 = vmul.f32 %v7349_v21, %v2300_v45  ;;  %v3368_v50 = vmul.f32 %v7349_v21, %v2812_v46  ;;  %v2302_v51 = vpop.f32.mrb[61].mxu0  ;;  %v2814_v52 = vpop.f32.mrb[61].mxu1 }
 0x17c   : > { %v6205_v48 = vpack.c.bf16 %v3886_v44, %v3886_v44  ;;  %v2303_v55 = vpop.f32.mrb[62].mxu0  ;;  %v2815_v56 = vpop.f32.mrb[62].mxu1  ;;  %v6630_v51 = vld [vmem:[%s6839_s5 + $0x2d4] ss:$8 sps:$4 sm:$0xff]  }
 0x17d   : > { %5039 = vst.msk [vmem:[%s7051_s28 + $0x74] sm:$0xf] %vm5009_vm3, %v6077_v47  ;;  %v3503_v59 = vadd.f32 %v7363_v61, %v3240_v49  ;;  %v3631_v60 = vadd.f32 %v7363_v61, %v3368_v50  ;;  %v3241_v62 = vmul.f32 %v7349_v21, %v2303_v55  ;;  %v3369_v0 = vmul.f32 %v7349_v21, %v2815_v56  ;;  %v2305_v1 = vpop.f32.mrb[63].mxu0  ;;  %v2817_v2 = vpop.f32.mrb[63].mxu1  ;;  %v6628_v47 = vld [vmem:[%s6839_s5 + $0x2c0] ss:$8 sps:$4 sm:$0xff]  }
 0x17e   : > { %5167 = vst.msk [vmem:[%s7051_s28 + $0x274] sm:$0xf] %vm5009_vm3, %v6205_v48  ;;  %v6629_v48 = vld [vmem:[%s6839_s5 + $0x6c0] ss:$8 sps:$4 sm:$0xff]   ;;  %v6632_v52 = vld [vmem:[%s6839_s5 + $0x6d4] ss:$8 sps:$4 sm:$0xff]  }
 0x17f   : > { %v3759_v3 = vmax.f32 %v3503_v59, 0.0  ;;  %v3887_v4 = vmax.f32 %v3631_v60, 0.0  ;;  %v3504_v5 = vadd.f32 %v7363_v61, %v3241_v62  ;;  %v3632_v6 = vadd.f32 %v7363_v61, %v3369_v0  ;;  %2515 = vmatmul.mubr.bf16.gmra.mrb[168].mxu0 %v6616_v53  ;;  %3027 = vmatmul.mubr.bf16.gmra.mrb[168].mxu1 %v6617_v54 }
 0x180   : > { %5702 = vmatprep.mubr.msk.bf16.mxu0 %vm1754_vm0, %v6618_v57  ;;  %5766 = vmatprep.mubr.msk.bf16.mxu1 %vm1754_vm0, %v6620_v58 }
 0x181   : > { %v6078_v7 = vpack.c.bf16 %v3759_v3, %v3759_v3  ;;  %v6206_v8 = vpack.c.bf16 %v3887_v4, %v3887_v4  ;;  %v3760_v9 = vmax.f32 %v3504_v5, 0.0  ;;  %v3888_v10 = vmax.f32 %v3632_v6, 0.0 }
 0x182   : > { %v2308_v11 = vpop.f32.mrb[64].mxu0  ;;  %v2820_v12 = vpop.f32.mrb[64].mxu1 }
 0x183   : > { %5040 = vst.msk [vmem:[%s7051_s28 + $0x78] sm:$0xf] %vm5009_vm3, %v6078_v7  ;;  %5168 = vst.msk [vmem:[%s7051_s28 + $0x278] sm:$0xf] %vm5009_vm3, %v6206_v8  ;;  %v6079_v13 = vpack.c.bf16 %v3760_v9, %v3760_v9  ;;  %v6207_v14 = vpack.c.bf16 %v3888_v10, %v3888_v10  ;;  %v3242_v15 = vmul.f32 %v7349_v21, %v2308_v11  ;;  %v2310_v17 = vpop.f32.mrb[65].mxu0  ;;  %v2822_v18 = vpop.f32.mrb[65].mxu1 }
 0x184   : > { %v3370_v16 = vmul.f32 %v7349_v21, %v2820_v12  ;;  %v2311_v20 = vpop.f32.mrb[66].mxu0  ;;  %v2823_v22 = vpop.f32.mrb[66].mxu1  ;;  %v6636_v17 = vld [vmem:[%s6839_s5 + $0x2e4] ss:$8 sps:$4 sm:$0xff]  }
 0x185   : > { %5041 = vst.msk [vmem:[%s7051_s28 + $0x7c] sm:$0xf] %vm5009_vm3, %v6079_v13  ;;  %5169 = vst.msk [vmem:[%s7051_s28 + $0x27c] sm:$0xf] %vm5009_vm3, %v6207_v14  ;;  %v3505_v25 = vadd.f32 %v7363_v61, %v3242_v15  ;;  %v3243_v27 = vmul.f32 %v7349_v21, %v2311_v20  ;;  %v3371_v28 = vmul.f32 %v7349_v21, %v2823_v22  ;;  %v2313_v29 = vpop.f32.mrb[67].mxu0  ;;  %v2825_v30 = vpop.f32.mrb[67].mxu1 }
 0x186   : > { %v3633_v26 = vadd.f32 %v7363_v61, %v3370_v16  ;;  %v6634_v13 = vld [vmem:[%s6839_s5 + $0x2d0] ss:$8 sps:$4 sm:$0xff]   ;;  %v6638_v18 = vld [vmem:[%s6839_s5 + $0x6e4] ss:$8 sps:$4 sm:$0xff]  }
 0x187   : > { %v3761_v31 = vmax.f32 %v3505_v25, 0.0  ;;  %v3506_v33 = vadd.f32 %v7363_v61, %v3243_v27  ;;  %v3634_v34 = vadd.f32 %v7363_v61, %v3371_v28  ;;  %2523 = vmatmul.mubr.bf16.gmra.mrb[172].mxu0 %v6622_v63  ;;  %3035 = vmatmul.mubr.bf16.gmra.mrb[172].mxu1 %v6623_v19  ;;  %v6635_v14 = vld [vmem:[%s6839_s5 + $0x6d0] ss:$8 sps:$4 sm:$0xff]  }
 0x188   : > { %v3889_v32 = vmax.f32 %v3633_v26, 0.0  ;;  %5703 = vmatprep.mubr.msk.bf16.mxu0 %vm1754_vm0, %v6624_v23  ;;  %5767 = vmatprep.mubr.msk.bf16.mxu1 %vm1754_vm0, %v6626_v24 }
 0x189   : > { %v6080_v35 = vpack.c.bf16 %v3761_v31, %v3761_v31  ;;  %v3762_v37 = vmax.f32 %v3506_v33, 0.0  ;;  %v3890_v38 = vmax.f32 %v3634_v34, 0.0 }
 0x18a   : > { %v6208_v36 = vpack.c.bf16 %v3889_v32, %v3889_v32  ;;  %v2316_v39 = vpop.f32.mrb[68].mxu0  ;;  %v2828_v40 = vpop.f32.mrb[68].mxu1 }
 0x18b   : > { %5042 = vst.msk [vmem:[%s7051_s28 + $0x80] sm:$0xf] %vm5009_vm3, %v6080_v35  ;;  %v6081_v41 = vpack.c.bf16 %v3762_v37, %v3762_v37  ;;  %v6209_v42 = vpack.c.bf16 %v3890_v38, %v3890_v38  ;;  %v3244_v43 = vmul.f32 %v7349_v21, %v2316_v39  ;;  %v3372_v44 = vmul.f32 %v7349_v21, %v2828_v40  ;;  %v2318_v45 = vpop.f32.mrb[69].mxu0  ;;  %v2830_v46 = vpop.f32.mrb[69].mxu1 }
 0x18c   : > { %5170 = vst.msk [vmem:[%s7051_s28 + $0x280] sm:$0xf] %vm5009_vm3, %v6208_v36  ;;  %v2319_v49 = vpop.f32.mrb[70].mxu0  ;;  %v2831_v50 = vpop.f32.mrb[70].mxu1  ;;  %v6642_v45 = vld [vmem:[%s6839_s5 + $0x2f4] ss:$8 sps:$4 sm:$0xff]  }
 0x18d   : > { %5043 = vst.msk [vmem:[%s7051_s28 + $0x84] sm:$0xf] %vm5009_vm3, %v6081_v41  ;;  %5171 = vst.msk [vmem:[%s7051_s28 + $0x284] sm:$0xf] %vm5009_vm3, %v6209_v42  ;;  %v3507_v53 = vadd.f32 %v7363_v61, %v3244_v43  ;;  %v3635_v54 = vadd.f32 %v7363_v61, %v3372_v44  ;;  %v3245_v55 = vmul.f32 %v7349_v21, %v2319_v49  ;;  %v2321_v57 = vpop.f32.mrb[71].mxu0  ;;  %v2833_v58 = vpop.f32.mrb[71].mxu1 }
 0x18e   : > { %v3373_v56 = vmul.f32 %v7349_v21, %v2831_v50  ;;  %v6640_v41 = vld [vmem:[%s6839_s5 + $0x2e0] ss:$8 sps:$4 sm:$0xff]   ;;  %v6644_v46 = vld [vmem:[%s6839_s5 + $0x6f4] ss:$8 sps:$4 sm:$0xff]  }
 0x18f   : > { %v3763_v59 = vmax.f32 %v3507_v53, 0.0  ;;  %v3891_v60 = vmax.f32 %v3635_v54, 0.0  ;;  %v3508_v62 = vadd.f32 %v7363_v61, %v3245_v55  ;;  %2531 = vmatmul.mubr.bf16.gmra.mrb[176].mxu0 %v6628_v47  ;;  %3043 = vmatmul.mubr.bf16.gmra.mrb[176].mxu1 %v6629_v48  ;;  %v6641_v42 = vld [vmem:[%s6839_s5 + $0x6e0] ss:$8 sps:$4 sm:$0xff]  }
 0x190   : > { %v3636_v0 = vadd.f32 %v7363_v61, %v3373_v56  ;;  %5704 = vmatprep.mubr.msk.bf16.mxu0 %vm1754_vm0, %v6630_v51  ;;  %5768 = vmatprep.mubr.msk.bf16.mxu1 %vm1754_vm0, %v6632_v52 }
 0x191   : > { %v6082_v1 = vpack.c.bf16 %v3763_v59, %v3763_v59  ;;  %v6210_v2 = vpack.c.bf16 %v3891_v60, %v3891_v60  ;;  %v3764_v3 = vmax.f32 %v3508_v62, 0.0 }
 0x192   : > { %v3892_v4 = vmax.f32 %v3636_v0, 0.0  ;;  %v2324_v5 = vpop.f32.mrb[72].mxu0  ;;  %v2836_v6 = vpop.f32.mrb[72].mxu1 }
 0x193   : > { %5044 = vst.msk [vmem:[%s7051_s28 + $0x88] sm:$0xf] %vm5009_vm3, %v6082_v1  ;;  %5172 = vst.msk [vmem:[%s7051_s28 + $0x288] sm:$0xf] %vm5009_vm3, %v6210_v2  ;;  %v6083_v7 = vpack.c.bf16 %v3764_v3, %v3764_v3  ;;  %v3246_v9 = vmul.f32 %v7349_v21, %v2324_v5  ;;  %v3374_v10 = vmul.f32 %v7349_v21, %v2836_v6  ;;  %v2326_v11 = vpop.f32.mrb[73].mxu0  ;;  %v2838_v12 = vpop.f32.mrb[73].mxu1 }
 0x194   : > { %v6211_v8 = vpack.c.bf16 %v3892_v4, %v3892_v4  ;;  %v2327_v15 = vpop.f32.mrb[74].mxu0  ;;  %v2839_v16 = vpop.f32.mrb[74].mxu1  ;;  %v6648_v11 = vld [vmem:[%s6839_s5 + $0x304] ss:$8 sps:$4 sm:$0xff]  }
 0x195   : > { %5045 = vst.msk [vmem:[%s7051_s28 + $0x8c] sm:$0xf] %vm5009_vm3, %v6083_v7  ;;  %v3509_v63 = vadd.f32 %v7363_v61, %v3246_v9  ;;  %v3637_v19 = vadd.f32 %v7363_v61, %v3374_v10  ;;  %v3247_v20 = vmul.f32 %v7349_v21, %v2327_v15  ;;  %v3375_v22 = vmul.f32 %v7349_v21, %v2839_v16  ;;  %v2329_v23 = vpop.f32.mrb[75].mxu0  ;;  %v2841_v24 = vpop.f32.mrb[75].mxu1  ;;  %v6646_v7 = vld [vmem:[%s6839_s5 + $0x2f0] ss:$8 sps:$4 sm:$0xff]  }
 0x196   : > { %5173 = vst.msk [vmem:[%s7051_s28 + $0x28c] sm:$0xf] %vm5009_vm3, %v6211_v8  ;;  %v6647_v8 = vld [vmem:[%s6839_s5 + $0x6f0] ss:$8 sps:$4 sm:$0xff]   ;;  %v6650_v12 = vld [vmem:[%s6839_s5 + $0x704] ss:$8 sps:$4 sm:$0xff]  }
 0x197   : > { %v3765_v25 = vmax.f32 %v3509_v63, 0.0  ;;  %v3893_v26 = vmax.f32 %v3637_v19, 0.0  ;;  %v3510_v27 = vadd.f32 %v7363_v61, %v3247_v20  ;;  %v3638_v28 = vadd.f32 %v7363_v61, %v3375_v22  ;;  %2539 = vmatmul.mubr.bf16.gmra.mrb[180].mxu0 %v6634_v13  ;;  %3051 = vmatmul.mubr.bf16.gmra.mrb[180].mxu1 %v6635_v14 }
 0x198   : > { %5705 = vmatprep.mubr.msk.bf16.mxu0 %vm1754_vm0, %v6636_v17  ;;  %5769 = vmatprep.mubr.msk.bf16.mxu1 %vm1754_vm0, %v6638_v18 }
 0x199   : > { %v6084_v29 = vpack.c.bf16 %v3765_v25, %v3765_v25  ;;  %v6212_v30 = vpack.c.bf16 %v3893_v26, %v3893_v26  ;;  %v3766_v31 = vmax.f32 %v3510_v27, 0.0  ;;  %v3894_v32 = vmax.f32 %v3638_v28, 0.0 }
 0x19a   : > { %v2332_v33 = vpop.f32.mrb[76].mxu0  ;;  %v2844_v34 = vpop.f32.mrb[76].mxu1 }
 0x19b   : > { %5046 = vst.msk [vmem:[%s7051_s28 + $0x90] sm:$0xf] %vm5009_vm3, %v6084_v29  ;;  %5174 = vst.msk [vmem:[%s7051_s28 + $0x290] sm:$0xf] %vm5009_vm3, %v6212_v30  ;;  %v6085_v35 = vpack.c.bf16 %v3766_v31, %v3766_v31  ;;  %v6213_v36 = vpack.c.bf16 %v3894_v32, %v3894_v32  ;;  %v3248_v37 = vmul.f32 %v7349_v21, %v2332_v33  ;;  %v2334_v39 = vpop.f32.mrb[77].mxu0  ;;  %v2846_v40 = vpop.f32.mrb[77].mxu1 }
 0x19c   : > { %v3376_v38 = vmul.f32 %v7349_v21, %v2844_v34  ;;  %v2335_v43 = vpop.f32.mrb[78].mxu0  ;;  %v2847_v44 = vpop.f32.mrb[78].mxu1  ;;  %v6654_v39 = vld [vmem:[%s6839_s5 + $0x314] ss:$8 sps:$4 sm:$0xff]  }
 0x19d   : > { %5047 = vst.msk [vmem:[%s7051_s28 + $0x94] sm:$0xf] %vm5009_vm3, %v6085_v35  ;;  %5175 = vst.msk [vmem:[%s7051_s28 + $0x294] sm:$0xf] %vm5009_vm3, %v6213_v36  ;;  %v3511_v47 = vadd.f32 %v7363_v61, %v3248_v37  ;;  %v3249_v49 = vmul.f32 %v7349_v21, %v2335_v43  ;;  %v3377_v50 = vmul.f32 %v7349_v21, %v2847_v44  ;;  %v2337_v51 = vpop.f32.mrb[79].mxu0  ;;  %v2849_v52 = vpop.f32.mrb[79].mxu1 }
 0x19e   : > { %v3639_v48 = vadd.f32 %v7363_v61, %v3376_v38  ;;  %v6652_v35 = vld [vmem:[%s6839_s5 + $0x300] ss:$8 sps:$4 sm:$0xff]   ;;  %v6656_v40 = vld [vmem:[%s6839_s5 + $0x714] ss:$8 sps:$4 sm:$0xff]  }
 0x19f   : > { %v3767_v53 = vmax.f32 %v3511_v47, 0.0  ;;  %v3512_v55 = vadd.f32 %v7363_v61, %v3249_v49  ;;  %v3640_v56 = vadd.f32 %v7363_v61, %v3377_v50  ;;  %2547 = vmatmul.mubr.bf16.gmra.mrb[184].mxu0 %v6640_v41  ;;  %3059 = vmatmul.mubr.bf16.gmra.mrb[184].mxu1 %v6641_v42  ;;  %v6653_v36 = vld [vmem:[%s6839_s5 + $0x700] ss:$8 sps:$4 sm:$0xff]  }
 0x1a0   : > { %v3895_v54 = vmax.f32 %v3639_v48, 0.0  ;;  %5706 = vmatprep.mubr.msk.bf16.mxu0 %vm1754_vm0, %v6642_v45  ;;  %5770 = vmatprep.mubr.msk.bf16.mxu1 %vm1754_vm0, %v6644_v46 }
 0x1a1   : > { %v6086_v57 = vpack.c.bf16 %v3767_v53, %v3767_v53  ;;  %v3768_v59 = vmax.f32 %v3512_v55, 0.0  ;;  %v3896_v60 = vmax.f32 %v3640_v56, 0.0 }
 0x1a2   : > { %v6214_v58 = vpack.c.bf16 %v3895_v54, %v3895_v54  ;;  %v2340_v62 = vpop.f32.mrb[80].mxu0  ;;  %v2852_v0 = vpop.f32.mrb[80].mxu1 }
 0x1a3   : > { %5048 = vst.msk [vmem:[%s7051_s28 + $0x98] sm:$0xf] %vm5009_vm3, %v6086_v57  ;;  %v6087_v1 = vpack.c.bf16 %v3768_v59, %v3768_v59  ;;  %v6215_v2 = vpack.c.bf16 %v3896_v60, %v3896_v60  ;;  %v3250_v3 = vmul.f32 %v7349_v21, %v2340_v62  ;;  %v3378_v4 = vmul.f32 %v7349_v21, %v2852_v0  ;;  %v2342_v5 = vpop.f32.mrb[81].mxu0  ;;  %v2854_v6 = vpop.f32.mrb[81].mxu1 }
 0x1a4   : > { %5176 = vst.msk [vmem:[%s7051_s28 + $0x298] sm:$0xf] %vm5009_vm3, %v6214_v58  ;;  %v2343_v9 = vpop.f32.mrb[82].mxu0  ;;  %v2855_v10 = vpop.f32.mrb[82].mxu1  ;;  %v6660_v5 = vld [vmem:[%s6839_s5 + $0x324] ss:$8 sps:$4 sm:$0xff]  }
 0x1a5   : > { %5049 = vst.msk [vmem:[%s7051_s28 + $0x9c] sm:$0xf] %vm5009_vm3, %v6087_v1  ;;  %5177 = vst.msk [vmem:[%s7051_s28 + $0x29c] sm:$0xf] %vm5009_vm3, %v6215_v2  ;;  %v3513_v13 = vadd.f32 %v7363_v61, %v3250_v3  ;;  %v3641_v14 = vadd.f32 %v7363_v61, %v3378_v4  ;;  %v3251_v15 = vmul.f32 %v7349_v21, %v2343_v9  ;;  %v2345_v17 = vpop.f32.mrb[83].mxu0  ;;  %v2857_v18 = vpop.f32.mrb[83].mxu1 }
 0x1a6   : > { %v3379_v16 = vmul.f32 %v7349_v21, %v2855_v10  ;;  %v6658_v1 = vld [vmem:[%s6839_s5 + $0x310] ss:$8 sps:$4 sm:$0xff]   ;;  %v6662_v6 = vld [vmem:[%s6839_s5 + $0x724] ss:$8 sps:$4 sm:$0xff]  }
 0x1a7   : > { %v3769_v63 = vmax.f32 %v3513_v13, 0.0  ;;  %v3897_v19 = vmax.f32 %v3641_v14, 0.0  ;;  %v3514_v20 = vadd.f32 %v7363_v61, %v3251_v15  ;;  %2555 = vmatmul.mubr.bf16.gmra.mrb[188].mxu0 %v6646_v7  ;;  %3067 = vmatmul.mubr.bf16.gmra.mrb[188].mxu1 %v6647_v8  ;;  %v6659_v2 = vld [vmem:[%s6839_s5 + $0x710] ss:$8 sps:$4 sm:$0xff]  }
 0x1a8   : > { %v3642_v22 = vadd.f32 %v7363_v61, %v3379_v16  ;;  %5707 = vmatprep.mubr.msk.bf16.mxu0 %vm1754_vm0, %v6648_v11  ;;  %5771 = vmatprep.mubr.msk.bf16.mxu1 %vm1754_vm0, %v6650_v12 }
 0x1a9   : > { %v6088_v23 = vpack.c.bf16 %v3769_v63, %v3769_v63  ;;  %v6216_v24 = vpack.c.bf16 %v3897_v19, %v3897_v19  ;;  %v3770_v25 = vmax.f32 %v3514_v20, 0.0 }
 0x1aa   : > { %v3898_v26 = vmax.f32 %v3642_v22, 0.0  ;;  %v2348_v27 = vpop.f32.mrb[84].mxu0  ;;  %v2860_v28 = vpop.f32.mrb[84].mxu1 }
 0x1ab   : > { %5050 = vst.msk [vmem:[%s7051_s28 + $0xa0] sm:$0xf] %vm5009_vm3, %v6088_v23  ;;  %5178 = vst.msk [vmem:[%s7051_s28 + $0x2a0] sm:$0xf] %vm5009_vm3, %v6216_v24  ;;  %v6089_v29 = vpack.c.bf16 %v3770_v25, %v3770_v25  ;;  %v3252_v31 = vmul.f32 %v7349_v21, %v2348_v27  ;;  %v3380_v32 = vmul.f32 %v7349_v21, %v2860_v28  ;;  %v2350_v33 = vpop.f32.mrb[85].mxu0  ;;  %v2862_v34 = vpop.f32.mrb[85].mxu1 }
 0x1ac   : > { %v6217_v30 = vpack.c.bf16 %v3898_v26, %v3898_v26  ;;  %v2351_v37 = vpop.f32.mrb[86].mxu0  ;;  %v2863_v38 = vpop.f32.mrb[86].mxu1  ;;  %v6666_v33 = vld [vmem:[%s6839_s5 + $0x334] ss:$8 sps:$4 sm:$0xff]  }
 0x1ad   : > { %5051 = vst.msk [vmem:[%s7051_s28 + $0xa4] sm:$0xf] %vm5009_vm3, %v6089_v29  ;;  %v3515_v41 = vadd.f32 %v7363_v61, %v3252_v31  ;;  %v3643_v42 = vadd.f32 %v7363_v61, %v3380_v32  ;;  %v3253_v43 = vmul.f32 %v7349_v21, %v2351_v37  ;;  %v3381_v44 = vmul.f32 %v7349_v21, %v2863_v38  ;;  %v2353_v45 = vpop.f32.mrb[87].mxu0  ;;  %v2865_v46 = vpop.f32.mrb[87].mxu1  ;;  %v6664_v29 = vld [vmem:[%s6839_s5 + $0x320] ss:$8 sps:$4 sm:$0xff]  }
 0x1ae   : > { %5179 = vst.msk [vmem:[%s7051_s28 + $0x2a4] sm:$0xf] %vm5009_vm3, %v6217_v30  ;;  %v6665_v30 = vld [vmem:[%s6839_s5 + $0x720] ss:$8 sps:$4 sm:$0xff]   ;;  %v6668_v34 = vld [vmem:[%s6839_s5 + $0x734] ss:$8 sps:$4 sm:$0xff]  }
 0x1af   : > { %v3771_v47 = vmax.f32 %v3515_v41, 0.0  ;;  %v3899_v48 = vmax.f32 %v3643_v42, 0.0  ;;  %v3516_v49 = vadd.f32 %v7363_v61, %v3253_v43  ;;  %v3644_v50 = vadd.f32 %v7363_v61, %v3381_v44  ;;  %2563 = vmatmul.mubr.bf16.gmra.mrb[192].mxu0 %v6652_v35  ;;  %3075 = vmatmul.mubr.bf16.gmra.mrb[192].mxu1 %v6653_v36 }
 0x1b0   : > { %5708 = vmatprep.mubr.msk.bf16.mxu0 %vm1754_vm0, %v6654_v39  ;;  %5772 = vmatprep.mubr.msk.bf16.mxu1 %vm1754_vm0, %v6656_v40 }
 0x1b1   : > { %v6090_v51 = vpack.c.bf16 %v3771_v47, %v3771_v47  ;;  %v6218_v52 = vpack.c.bf16 %v3899_v48, %v3899_v48  ;;  %v3772_v53 = vmax.f32 %v3516_v49, 0.0  ;;  %v3900_v54 = vmax.f32 %v3644_v50, 0.0 }
 0x1b2   : > { %v2356_v55 = vpop.f32.mrb[88].mxu0  ;;  %v2868_v56 = vpop.f32.mrb[88].mxu1 }
 0x1b3   : > { %5052 = vst.msk [vmem:[%s7051_s28 + $0xa8] sm:$0xf] %vm5009_vm3, %v6090_v51  ;;  %5180 = vst.msk [vmem:[%s7051_s28 + $0x2a8] sm:$0xf] %vm5009_vm3, %v6218_v52  ;;  %v6091_v57 = vpack.c.bf16 %v3772_v53, %v3772_v53  ;;  %v6219_v58 = vpack.c.bf16 %v3900_v54, %v3900_v54  ;;  %v3254_v59 = vmul.f32 %v7349_v21, %v2356_v55  ;;  %v2358_v62 = vpop.f32.mrb[89].mxu0  ;;  %v2870_v0 = vpop.f32.mrb[89].mxu1 }
 0x1b4   : > { %v3382_v60 = vmul.f32 %v7349_v21, %v2868_v56  ;;  %v2359_v3 = vpop.f32.mrb[90].mxu0  ;;  %v2871_v4 = vpop.f32.mrb[90].mxu1  ;;  %v6672_v62 = vld [vmem:[%s6839_s5 + $0x344] ss:$8 sps:$4 sm:$0xff]  }
 0x1b5   : > { %5053 = vst.msk [vmem:[%s7051_s28 + $0xac] sm:$0xf] %vm5009_vm3, %v6091_v57  ;;  %5181 = vst.msk [vmem:[%s7051_s28 + $0x2ac] sm:$0xf] %vm5009_vm3, %v6219_v58  ;;  %v3517_v7 = vadd.f32 %v7363_v61, %v3254_v59  ;;  %v3255_v9 = vmul.f32 %v7349_v21, %v2359_v3  ;;  %v3383_v10 = vmul.f32 %v7349_v21, %v2871_v4  ;;  %v2361_v11 = vpop.f32.mrb[91].mxu0  ;;  %v2873_v12 = vpop.f32.mrb[91].mxu1 }
 0x1b6   : > { %v3645_v8 = vadd.f32 %v7363_v61, %v3382_v60  ;;  %v6670_v57 = vld [vmem:[%s6839_s5 + $0x330] ss:$8 sps:$4 sm:$0xff]   ;;  %v6674_v0 = vld [vmem:[%s6839_s5 + $0x744] ss:$8 sps:$4 sm:$0xff]  }
 0x1b7   : > { %v3773_v13 = vmax.f32 %v3517_v7, 0.0  ;;  %v3518_v15 = vadd.f32 %v7363_v61, %v3255_v9  ;;  %v3646_v16 = vadd.f32 %v7363_v61, %v3383_v10  ;;  %2571 = vmatmul.mubr.bf16.gmra.mrb[196].mxu0 %v6658_v1  ;;  %3083 = vmatmul.mubr.bf16.gmra.mrb[196].mxu1 %v6659_v2  ;;  %v6671_v58 = vld [vmem:[%s6839_s5 + $0x730] ss:$8 sps:$4 sm:$0xff]  }
 0x1b8   : > { %v3901_v14 = vmax.f32 %v3645_v8, 0.0  ;;  %5709 = vmatprep.mubr.msk.bf16.mxu0 %vm1754_vm0, %v6660_v5  ;;  %5773 = vmatprep.mubr.msk.bf16.mxu1 %vm1754_vm0, %v6662_v6 }
 0x1b9   : > { %v6092_v17 = vpack.c.bf16 %v3773_v13, %v3773_v13  ;;  %v3774_v63 = vmax.f32 %v3518_v15, 0.0  ;;  %v3902_v19 = vmax.f32 %v3646_v16, 0.0 }
 0x1ba   : > { %v6220_v18 = vpack.c.bf16 %v3901_v14, %v3901_v14  ;;  %v2364_v20 = vpop.f32.mrb[92].mxu0  ;;  %v2876_v22 = vpop.f32.mrb[92].mxu1 }
 0x1bb   : > { %5054 = vst.msk [vmem:[%s7051_s28 + $0xb0] sm:$0xf] %vm5009_vm3, %v6092_v17  ;;  %v6093_v23 = vpack.c.bf16 %v3774_v63, %v3774_v63  ;;  %v6221_v24 = vpack.c.bf16 %v3902_v19, %v3902_v19  ;;  %v3256_v25 = vmul.f32 %v7349_v21, %v2364_v20  ;;  %v3384_v26 = vmul.f32 %v7349_v21, %v2876_v22  ;;  %v2366_v27 = vpop.f32.mrb[93].mxu0  ;;  %v2878_v28 = vpop.f32.mrb[93].mxu1 }
 0x1bc   : > { %5182 = vst.msk [vmem:[%s7051_s28 + $0x2b0] sm:$0xf] %vm5009_vm3, %v6220_v18  ;;  %v2367_v31 = vpop.f32.mrb[94].mxu0  ;;  %v2879_v32 = vpop.f32.mrb[94].mxu1  ;;  %v6678_v27 = vld [vmem:[%s6839_s5 + $0x354] ss:$8 sps:$4 sm:$0xff]  }
 0x1bd   : > { %5055 = vst.msk [vmem:[%s7051_s28 + $0xb4] sm:$0xf] %vm5009_vm3, %v6093_v23  ;;  %5183 = vst.msk [vmem:[%s7051_s28 + $0x2b4] sm:$0xf] %vm5009_vm3, %v6221_v24  ;;  %v3519_v35 = vadd.f32 %v7363_v61, %v3256_v25  ;;  %v3647_v36 = vadd.f32 %v7363_v61, %v3384_v26  ;;  %v3257_v37 = vmul.f32 %v7349_v21, %v2367_v31  ;;  %v2369_v39 = vpop.f32.mrb[95].mxu0  ;;  %v2881_v40 = vpop.f32.mrb[95].mxu1 }
 0x1be   : > { %v3385_v38 = vmul.f32 %v7349_v21, %v2879_v32  ;;  %v6676_v23 = vld [vmem:[%s6839_s5 + $0x340] ss:$8 sps:$4 sm:$0xff]   ;;  %v6680_v28 = vld [vmem:[%s6839_s5 + $0x754] ss:$8 sps:$4 sm:$0xff]  }
 0x1bf   : > { %v3775_v41 = vmax.f32 %v3519_v35, 0.0  ;;  %v3903_v42 = vmax.f32 %v3647_v36, 0.0  ;;  %v3520_v43 = vadd.f32 %v7363_v61, %v3257_v37  ;;  %2579 = vmatmul.mubr.bf16.gmra.mrb[200].mxu0 %v6664_v29  ;;  %3091 = vmatmul.mubr.bf16.gmra.mrb[200].mxu1 %v6665_v30  ;;  %v6677_v24 = vld [vmem:[%s6839_s5 + $0x740] ss:$8 sps:$4 sm:$0xff]  }
 0x1c0   : > { %v3648_v44 = vadd.f32 %v7363_v61, %v3385_v38  ;;  %5710 = vmatprep.mubr.msk.bf16.mxu0 %vm1754_vm0, %v6666_v33  ;;  %5774 = vmatprep.mubr.msk.bf16.mxu1 %vm1754_vm0, %v6668_v34 }
 0x1c1   : > { %v6094_v45 = vpack.c.bf16 %v3775_v41, %v3775_v41  ;;  %v6222_v46 = vpack.c.bf16 %v3903_v42, %v3903_v42  ;;  %v3776_v47 = vmax.f32 %v3520_v43, 0.0 }
 0x1c2   : > { %v3904_v48 = vmax.f32 %v3648_v44, 0.0  ;;  %v2372_v49 = vpop.f32.mrb[96].mxu0  ;;  %v2884_v50 = vpop.f32.mrb[96].mxu1 }
 0x1c3   : > { %5056 = vst.msk [vmem:[%s7051_s28 + $0xb8] sm:$0xf] %vm5009_vm3, %v6094_v45  ;;  %5184 = vst.msk [vmem:[%s7051_s28 + $0x2b8] sm:$0xf] %vm5009_vm3, %v6222_v46  ;;  %v6095_v51 = vpack.c.bf16 %v3776_v47, %v3776_v47  ;;  %v3258_v53 = vmul.f32 %v7349_v21, %v2372_v49  ;;  %v3386_v54 = vmul.f32 %v7349_v21, %v2884_v50  ;;  %v2374_v55 = vpop.f32.mrb[97].mxu0  ;;  %v2886_v56 = vpop.f32.mrb[97].mxu1 }
 0x1c4   : > { %v6223_v52 = vpack.c.bf16 %v3904_v48, %v3904_v48  ;;  %v2375_v59 = vpop.f32.mrb[98].mxu0  ;;  %v2887_v60 = vpop.f32.mrb[98].mxu1  ;;  %v6684_v55 = vld [vmem:[%s6839_s5 + $0x364] ss:$8 sps:$4 sm:$0xff]  }
 0x1c5   : > { %5057 = vst.msk [vmem:[%s7051_s28 + $0xbc] sm:$0xf] %vm5009_vm3, %v6095_v51  ;;  %v3521_v1 = vadd.f32 %v7363_v61, %v3258_v53  ;;  %v3649_v2 = vadd.f32 %v7363_v61, %v3386_v54  ;;  %v3259_v3 = vmul.f32 %v7349_v21, %v2375_v59  ;;  %v3387_v4 = vmul.f32 %v7349_v21, %v2887_v60  ;;  %v2377_v5 = vpop.f32.mrb[99].mxu0  ;;  %v2889_v6 = vpop.f32.mrb[99].mxu1  ;;  %v6682_v51 = vld [vmem:[%s6839_s5 + $0x350] ss:$8 sps:$4 sm:$0xff]  }
 0x1c6   : > { %5185 = vst.msk [vmem:[%s7051_s28 + $0x2bc] sm:$0xf] %vm5009_vm3, %v6223_v52  ;;  %v6683_v52 = vld [vmem:[%s6839_s5 + $0x750] ss:$8 sps:$4 sm:$0xff]   ;;  %v6686_v56 = vld [vmem:[%s6839_s5 + $0x764] ss:$8 sps:$4 sm:$0xff]  }
 0x1c7   : > { %v3777_v7 = vmax.f32 %v3521_v1, 0.0  ;;  %v3905_v8 = vmax.f32 %v3649_v2, 0.0  ;;  %v3522_v9 = vadd.f32 %v7363_v61, %v3259_v3  ;;  %v3650_v10 = vadd.f32 %v7363_v61, %v3387_v4  ;;  %2587 = vmatmul.mubr.bf16.gmra.mrb[204].mxu0 %v6670_v57  ;;  %3099 = vmatmul.mubr.bf16.gmra.mrb[204].mxu1 %v6671_v58 }
 0x1c8   : > { %5711 = vmatprep.mubr.msk.bf16.mxu0 %vm1754_vm0, %v6672_v62  ;;  %5775 = vmatprep.mubr.msk.bf16.mxu1 %vm1754_vm0, %v6674_v0 }
 0x1c9   : > { %v6096_v11 = vpack.c.bf16 %v3777_v7, %v3777_v7  ;;  %v6224_v12 = vpack.c.bf16 %v3905_v8, %v3905_v8  ;;  %v3778_v13 = vmax.f32 %v3522_v9, 0.0  ;;  %v3906_v14 = vmax.f32 %v3650_v10, 0.0 }
 0x1ca   : > { %v2380_v15 = vpop.f32.mrb[100].mxu0  ;;  %v2892_v16 = vpop.f32.mrb[100].mxu1 }
 0x1cb   : > { %5058 = vst.msk [vmem:[%s7051_s28 + $0xc0] sm:$0xf] %vm5009_vm3, %v6096_v11  ;;  %5186 = vst.msk [vmem:[%s7051_s28 + $0x2c0] sm:$0xf] %vm5009_vm3, %v6224_v12  ;;  %v6097_v17 = vpack.c.bf16 %v3778_v13, %v3778_v13  ;;  %v6225_v18 = vpack.c.bf16 %v3906_v14, %v3906_v14  ;;  %v3260_v63 = vmul.f32 %v7349_v21, %v2380_v15  ;;  %v2382_v20 = vpop.f32.mrb[101].mxu0  ;;  %v2894_v22 = vpop.f32.mrb[101].mxu1 }
 0x1cc   : > { %v3388_v19 = vmul.f32 %v7349_v21, %v2892_v16  ;;  %v2383_v25 = vpop.f32.mrb[102].mxu0  ;;  %v2895_v26 = vpop.f32.mrb[102].mxu1  ;;  %v6690_v20 = vld [vmem:[%s6839_s5 + $0x374] ss:$8 sps:$4 sm:$0xff]  }
 0x1cd   : > { %5059 = vst.msk [vmem:[%s7051_s28 + $0xc4] sm:$0xf] %vm5009_vm3, %v6097_v17  ;;  %5187 = vst.msk [vmem:[%s7051_s28 + $0x2c4] sm:$0xf] %vm5009_vm3, %v6225_v18  ;;  %v3523_v29 = vadd.f32 %v7363_v61, %v3260_v63  ;;  %v3261_v31 = vmul.f32 %v7349_v21, %v2383_v25  ;;  %v3389_v32 = vmul.f32 %v7349_v21, %v2895_v26  ;;  %v2385_v33 = vpop.f32.mrb[103].mxu0  ;;  %v2897_v34 = vpop.f32.mrb[103].mxu1 }
 0x1ce   : > { %v3651_v30 = vadd.f32 %v7363_v61, %v3388_v19  ;;  %v6688_v17 = vld [vmem:[%s6839_s5 + $0x360] ss:$8 sps:$4 sm:$0xff]   ;;  %v6692_v22 = vld [vmem:[%s6839_s5 + $0x774] ss:$8 sps:$4 sm:$0xff]  }
 0x1cf   : > { %v3779_v35 = vmax.f32 %v3523_v29, 0.0  ;;  %v3524_v37 = vadd.f32 %v7363_v61, %v3261_v31  ;;  %v3652_v38 = vadd.f32 %v7363_v61, %v3389_v32  ;;  %2595 = vmatmul.mubr.bf16.gmra.mrb[208].mxu0 %v6676_v23  ;;  %3107 = vmatmul.mubr.bf16.gmra.mrb[208].mxu1 %v6677_v24  ;;  %v6689_v18 = vld [vmem:[%s6839_s5 + $0x760] ss:$8 sps:$4 sm:$0xff]  }
 0x1d0   : > { %v3907_v36 = vmax.f32 %v3651_v30, 0.0  ;;  %5712 = vmatprep.mubr.msk.bf16.mxu0 %vm1754_vm0, %v6678_v27  ;;  %5776 = vmatprep.mubr.msk.bf16.mxu1 %vm1754_vm0, %v6680_v28 }
 0x1d1   : > { %v6098_v39 = vpack.c.bf16 %v3779_v35, %v3779_v35  ;;  %v3780_v41 = vmax.f32 %v3524_v37, 0.0  ;;  %v3908_v42 = vmax.f32 %v3652_v38, 0.0 }
 0x1d2   : > { %v6226_v40 = vpack.c.bf16 %v3907_v36, %v3907_v36  ;;  %v2388_v43 = vpop.f32.mrb[104].mxu0  ;;  %v2900_v44 = vpop.f32.mrb[104].mxu1 }
 0x1d3   : > { %5060 = vst.msk [vmem:[%s7051_s28 + $0xc8] sm:$0xf] %vm5009_vm3, %v6098_v39  ;;  %v6099_v45 = vpack.c.bf16 %v3780_v41, %v3780_v41  ;;  %v6227_v46 = vpack.c.bf16 %v3908_v42, %v3908_v42  ;;  %v3262_v47 = vmul.f32 %v7349_v21, %v2388_v43  ;;  %v3390_v48 = vmul.f32 %v7349_v21, %v2900_v44  ;;  %v2390_v49 = vpop.f32.mrb[105].mxu0  ;;  %v2902_v50 = vpop.f32.mrb[105].mxu1 }
 0x1d4   : > { %5188 = vst.msk [vmem:[%s7051_s28 + $0x2c8] sm:$0xf] %vm5009_vm3, %v6226_v40  ;;  %v2391_v53 = vpop.f32.mrb[106].mxu0  ;;  %v2903_v54 = vpop.f32.mrb[106].mxu1  ;;  %v6696_v49 = vld [vmem:[%s6839_s5 + $0x384] ss:$8 sps:$4 sm:$0xff]  }
 0x1d5   : > { %5061 = vst.msk [vmem:[%s7051_s28 + $0xcc] sm:$0xf] %vm5009_vm3, %v6099_v45  ;;  %5189 = vst.msk [vmem:[%s7051_s28 + $0x2cc] sm:$0xf] %vm5009_vm3, %v6227_v46  ;;  %v3525_v57 = vadd.f32 %v7363_v61, %v3262_v47  ;;  %v3653_v58 = vadd.f32 %v7363_v61, %v3390_v48  ;;  %v3263_v59 = vmul.f32 %v7349_v21, %v2391_v53  ;;  %v2393_v62 = vpop.f32.mrb[107].mxu0  ;;  %v2905_v0 = vpop.f32.mrb[107].mxu1 }
 0x1d6   : > { %v3391_v60 = vmul.f32 %v7349_v21, %v2903_v54  ;;  %v6694_v45 = vld [vmem:[%s6839_s5 + $0x370] ss:$8 sps:$4 sm:$0xff]   ;;  %v6698_v50 = vld [vmem:[%s6839_s5 + $0x784] ss:$8 sps:$4 sm:$0xff]  }
 0x1d7   : > { %v3781_v1 = vmax.f32 %v3525_v57, 0.0  ;;  %v3909_v2 = vmax.f32 %v3653_v58, 0.0  ;;  %v3526_v3 = vadd.f32 %v7363_v61, %v3263_v59  ;;  %2603 = vmatmul.mubr.bf16.gmra.mrb[212].mxu0 %v6682_v51  ;;  %3115 = vmatmul.mubr.bf16.gmra.mrb[212].mxu1 %v6683_v52  ;;  %v6695_v46 = vld [vmem:[%s6839_s5 + $0x770] ss:$8 sps:$4 sm:$0xff]   ;;  %v7685_v59 = vld [vmem:[%s8323_s3] ss:$0 sm:$0xff] }
 0x1d8   : > { %v3654_v4 = vadd.f32 %v7363_v61, %v3391_v60  ;;  %5713 = vmatprep.mubr.msk.bf16.mxu0 %vm1754_vm0, %v6684_v55  ;;  %5777 = vmatprep.mubr.msk.bf16.mxu1 %vm1754_vm0, %v6686_v56 }
 0x1d9   : > { %v6100_v5 = vpack.c.bf16 %v3781_v1, %v3781_v1  ;;  %v6228_v6 = vpack.c.bf16 %v3909_v2, %v3909_v2  ;;  %v3782_v7 = vmax.f32 %v3526_v3, 0.0 }
 0x1da   : > { %v3910_v8 = vmax.f32 %v3654_v4, 0.0  ;;  %v2396_v9 = vpop.f32.mrb[108].mxu0  ;;  %v2908_v10 = vpop.f32.mrb[108].mxu1 }
 0x1db   : > { %5062 = vst.msk [vmem:[%s7051_s28 + $0xd0] sm:$0xf] %vm5009_vm3, %v6100_v5  ;;  %5190 = vst.msk [vmem:[%s7051_s28 + $0x2d0] sm:$0xf] %vm5009_vm3, %v6228_v6  ;;  %v6101_v11 = vpack.c.bf16 %v3782_v7, %v3782_v7  ;;  %v3264_v13 = vmul.f32 %v7349_v21, %v2396_v9  ;;  %v3392_v14 = vmul.f32 %v7349_v21, %v2908_v10  ;;  %v2398_v15 = vpop.f32.mrb[109].mxu0  ;;  %v2910_v16 = vpop.f32.mrb[109].mxu1 }
 0x1dc   : > { %v6229_v12 = vpack.c.bf16 %v3910_v8, %v3910_v8  ;;  %v2399_v63 = vpop.f32.mrb[110].mxu0  ;;  %v2911_v19 = vpop.f32.mrb[110].mxu1  ;;  %v6702_v15 = vld [vmem:[%s6839_s5 + $0x394] ss:$8 sps:$4 sm:$0xff]  }
 0x1dd   : > { %5063 = vst.msk [vmem:[%s7051_s28 + $0xd4] sm:$0xf] %vm5009_vm3, %v6101_v11  ;;  %v3527_v23 = vadd.f32 %v7363_v61, %v3264_v13  ;;  %v3655_v24 = vadd.f32 %v7363_v61, %v3392_v14  ;;  %v3265_v25 = vmul.f32 %v7349_v21, %v2399_v63  ;;  %v3393_v26 = vmul.f32 %v7349_v21, %v2911_v19  ;;  %v2401_v27 = vpop.f32.mrb[111].mxu0  ;;  %v2913_v28 = vpop.f32.mrb[111].mxu1  ;;  %v6700_v11 = vld [vmem:[%s6839_s5 + $0x380] ss:$8 sps:$4 sm:$0xff]  }
 0x1de   : > { %5191 = vst.msk [vmem:[%s7051_s28 + $0x2d4] sm:$0xf] %vm5009_vm3, %v6229_v12  ;;  %v6701_v12 = vld [vmem:[%s6839_s5 + $0x780] ss:$8 sps:$4 sm:$0xff]   ;;  %v6704_v16 = vld [vmem:[%s6839_s5 + $0x794] ss:$8 sps:$4 sm:$0xff]  }
 0x1df   : > { %v3783_v29 = vmax.f32 %v3527_v23, 0.0  ;;  %v3911_v30 = vmax.f32 %v3655_v24, 0.0  ;;  %v3528_v31 = vadd.f32 %v7363_v61, %v3265_v25  ;;  %v3656_v32 = vadd.f32 %v7363_v61, %v3393_v26  ;;  %2611 = vmatmul.mubr.bf16.gmra.mrb[216].mxu0 %v6688_v17  ;;  %3123 = vmatmul.mubr.bf16.gmra.mrb[216].mxu1 %v6689_v18 }
 0x1e0   : > { %5714 = vmatprep.mubr.msk.bf16.mxu0 %vm1754_vm0, %v6690_v20  ;;  %5778 = vmatprep.mubr.msk.bf16.mxu1 %vm1754_vm0, %v6692_v22 }
 0x1e1   : > { %v6102_v33 = vpack.c.bf16 %v3783_v29, %v3783_v29  ;;  %v6230_v34 = vpack.c.bf16 %v3911_v30, %v3911_v30  ;;  %v3784_v35 = vmax.f32 %v3528_v31, 0.0  ;;  %v3912_v36 = vmax.f32 %v3656_v32, 0.0 }
 0x1e2   : > { %v2404_v37 = vpop.f32.mrb[112].mxu0  ;;  %v2916_v38 = vpop.f32.mrb[112].mxu1 }
 0x1e3   : > { %5064 = vst.msk [vmem:[%s7051_s28 + $0xd8] sm:$0xf] %vm5009_vm3, %v6102_v33  ;;  %5192 = vst.msk [vmem:[%s7051_s28 + $0x2d8] sm:$0xf] %vm5009_vm3, %v6230_v34  ;;  %v6103_v39 = vpack.c.bf16 %v3784_v35, %v3784_v35  ;;  %v6231_v40 = vpack.c.bf16 %v3912_v36, %v3912_v36  ;;  %v3266_v41 = vmul.f32 %v7349_v21, %v2404_v37  ;;  %v2406_v43 = vpop.f32.mrb[113].mxu0  ;;  %v2918_v44 = vpop.f32.mrb[113].mxu1 }
 0x1e4   : > { %v3394_v42 = vmul.f32 %v7349_v21, %v2916_v38  ;;  %v2407_v47 = vpop.f32.mrb[114].mxu0  ;;  %v2919_v48 = vpop.f32.mrb[114].mxu1  ;;  %v7678_v21 = vld [vmem:[%s8322_s2] ss:$0 sm:$0xff]  ;;  %v6708_v43 = vld [vmem:[%s6839_s5 + $0x3a4] ss:$8 sps:$4 sm:$0xff]  }
 0x1e5   : > { %5065 = vst.msk [vmem:[%s7051_s28 + $0xdc] sm:$0xf] %vm5009_vm3, %v6103_v39  ;;  %5193 = vst.msk [vmem:[%s7051_s28 + $0x2dc] sm:$0xf] %vm5009_vm3, %v6231_v40  ;;  %v3529_v51 = vadd.f32 %v7363_v61, %v3266_v41  ;;  %v3267_v53 = vmul.f32 %v7678_v21, %v2407_v47  ;;  %v3395_v54 = vmul.f32 %v7678_v21, %v2919_v48  ;;  %v2409_v55 = vpop.f32.mrb[115].mxu0  ;;  %v2921_v56 = vpop.f32.mrb[115].mxu1 }
 0x1e6   : > { %v3657_v52 = vadd.f32 %v7363_v61, %v3394_v42  ;;  %v6706_v39 = vld [vmem:[%s6839_s5 + $0x390] ss:$8 sps:$4 sm:$0xff]   ;;  %v6710_v44 = vld [vmem:[%s6839_s5 + $0x7a4] ss:$8 sps:$4 sm:$0xff]  }
 0x1e7   : > { %v3785_v57 = vmax.f32 %v3529_v51, 0.0  ;;  %v3530_v61 = vadd.f32 %v7685_v59, %v3267_v53  ;;  %v3658_v60 = vadd.f32 %v7685_v59, %v3395_v54  ;;  %2619 = vmatmul.mubr.bf16.gmra.mrb[220].mxu0 %v6694_v45  ;;  %3131 = vmatmul.mubr.bf16.gmra.mrb[220].mxu1 %v6695_v46  ;;  %v6707_v40 = vld [vmem:[%s6839_s5 + $0x790] ss:$8 sps:$4 sm:$0xff]  }
 0x1e8   : > { %v3913_v58 = vmax.f32 %v3657_v52, 0.0  ;;  %5715 = vmatprep.mubr.msk.bf16.mxu0 %vm1754_vm0, %v6696_v49  ;;  %5779 = vmatprep.mubr.msk.bf16.mxu1 %vm1754_vm0, %v6698_v50 }
 0x1e9   : > { %v6104_v62 = vpack.c.bf16 %v3785_v57, %v3785_v57  ;;  %v3786_v1 = vmax.f32 %v3530_v61, 0.0  ;;  %v3914_v2 = vmax.f32 %v3658_v60, 0.0 }
 0x1ea   : > { %v6232_v0 = vpack.c.bf16 %v3913_v58, %v3913_v58  ;;  %v2412_v3 = vpop.f32.mrb[116].mxu0  ;;  %v2924_v4 = vpop.f32.mrb[116].mxu1 }
 0x1eb   : > { %5066 = vst.msk [vmem:[%s7051_s28 + $0xe0] sm:$0xf] %vm5009_vm3, %v6104_v62  ;;  %v6105_v5 = vpack.c.bf16 %v3786_v1, %v3786_v1  ;;  %v6233_v6 = vpack.c.bf16 %v3914_v2, %v3914_v2  ;;  %v3268_v7 = vmul.f32 %v7678_v21, %v2412_v3  ;;  %v3396_v8 = vmul.f32 %v7678_v21, %v2924_v4  ;;  %v2414_v9 = vpop.f32.mrb[117].mxu0  ;;  %v2926_v10 = vpop.f32.mrb[117].mxu1 }
 0x1ec   : > { %5194 = vst.msk [vmem:[%s7051_s28 + $0x2e0] sm:$0xf] %vm5009_vm3, %v6232_v0  ;;  %v2415_v13 = vpop.f32.mrb[118].mxu0  ;;  %v2927_v14 = vpop.f32.mrb[118].mxu1  ;;  %v6714_v9 = vld [vmem:[%s6839_s5 + $0x3b4] ss:$8 sps:$4 sm:$0xff]  }
 0x1ed   : > { %5067 = vst.msk [vmem:[%s7051_s28 + $0xe4] sm:$0xf] %vm5009_vm3, %v6105_v5  ;;  %5195 = vst.msk [vmem:[%s7051_s28 + $0x2e4] sm:$0xf] %vm5009_vm3, %v6233_v6  ;;  %v3531_v17 = vadd.f32 %v7685_v59, %v3268_v7  ;;  %v3659_v18 = vadd.f32 %v7685_v59, %v3396_v8  ;;  %v3269_v63 = vmul.f32 %v7678_v21, %v2415_v13  ;;  %v2417_v20 = vpop.f32.mrb[119].mxu0  ;;  %v2929_v22 = vpop.f32.mrb[119].mxu1 }
 0x1ee   : > { %v3397_v19 = vmul.f32 %v7678_v21, %v2927_v14  ;;  %v6712_v5 = vld [vmem:[%s6839_s5 + $0x3a0] ss:$8 sps:$4 sm:$0xff]   ;;  %v6716_v10 = vld [vmem:[%s6839_s5 + $0x7b4] ss:$8 sps:$4 sm:$0xff]  }
 0x1ef   : > { %v3787_v23 = vmax.f32 %v3531_v17, 0.0  ;;  %v3915_v24 = vmax.f32 %v3659_v18, 0.0  ;;  %v3532_v25 = vadd.f32 %v7685_v59, %v3269_v63  ;;  %2627 = vmatmul.mubr.bf16.gmra.mrb[224].mxu0 %v6700_v11  ;;  %3139 = vmatmul.mubr.bf16.gmra.mrb[224].mxu1 %v6701_v12  ;;  %v6713_v6 = vld [vmem:[%s6839_s5 + $0x7a0] ss:$8 sps:$4 sm:$0xff]  }
 0x1f0   : > { %v3660_v26 = vadd.f32 %v7685_v59, %v3397_v19  ;;  %5716 = vmatprep.mubr.msk.bf16.mxu0 %vm1754_vm0, %v6702_v15  ;;  %5780 = vmatprep.mubr.msk.bf16.mxu1 %vm1754_vm0, %v6704_v16 }
 0x1f1   : > { %v6106_v27 = vpack.c.bf16 %v3787_v23, %v3787_v23  ;;  %v6234_v28 = vpack.c.bf16 %v3915_v24, %v3915_v24  ;;  %v3788_v29 = vmax.f32 %v3532_v25, 0.0 }
 0x1f2   : > { %v3916_v30 = vmax.f32 %v3660_v26, 0.0  ;;  %v2420_v31 = vpop.f32.mrb[120].mxu0  ;;  %v2932_v32 = vpop.f32.mrb[120].mxu1 }
 0x1f3   : > { %5068 = vst.msk [vmem:[%s7051_s28 + $0xe8] sm:$0xf] %vm5009_vm3, %v6106_v27  ;;  %5196 = vst.msk [vmem:[%s7051_s28 + $0x2e8] sm:$0xf] %vm5009_vm3, %v6234_v28  ;;  %v6107_v33 = vpack.c.bf16 %v3788_v29, %v3788_v29  ;;  %v3270_v35 = vmul.f32 %v7678_v21, %v2420_v31  ;;  %v3398_v36 = vmul.f32 %v7678_v21, %v2932_v32  ;;  %v2422_v37 = vpop.f32.mrb[121].mxu0  ;;  %v2934_v38 = vpop.f32.mrb[121].mxu1 }
 0x1f4   : > { %v6235_v34 = vpack.c.bf16 %v3916_v30, %v3916_v30  ;;  %v2423_v41 = vpop.f32.mrb[122].mxu0  ;;  %v2935_v42 = vpop.f32.mrb[122].mxu1  ;;  %v6720_v37 = vld [vmem:[%s6839_s5 + $0x3c4] ss:$8 sps:$4 sm:$0xff]  }
 0x1f5   : > { %5069 = vst.msk [vmem:[%s7051_s28 + $0xec] sm:$0xf] %vm5009_vm3, %v6107_v33  ;;  %v3533_v45 = vadd.f32 %v7685_v59, %v3270_v35  ;;  %v3661_v46 = vadd.f32 %v7685_v59, %v3398_v36  ;;  %v3271_v47 = vmul.f32 %v7678_v21, %v2423_v41  ;;  %v3399_v48 = vmul.f32 %v7678_v21, %v2935_v42  ;;  %v2425_v49 = vpop.f32.mrb[123].mxu0  ;;  %v2937_v50 = vpop.f32.mrb[123].mxu1  ;;  %v6718_v33 = vld [vmem:[%s6839_s5 + $0x3b0] ss:$8 sps:$4 sm:$0xff]  }
 0x1f6   : > { %5197 = vst.msk [vmem:[%s7051_s28 + $0x2ec] sm:$0xf] %vm5009_vm3, %v6235_v34  ;;  %v6719_v34 = vld [vmem:[%s6839_s5 + $0x7b0] ss:$8 sps:$4 sm:$0xff]   ;;  %v6722_v38 = vld [vmem:[%s6839_s5 + $0x7c4] ss:$8 sps:$4 sm:$0xff]  }
 0x1f7   : > { %v3789_v51 = vmax.f32 %v3533_v45, 0.0  ;;  %v3917_v52 = vmax.f32 %v3661_v46, 0.0  ;;  %v3534_v53 = vadd.f32 %v7685_v59, %v3271_v47  ;;  %v3662_v54 = vadd.f32 %v7685_v59, %v3399_v48  ;;  %2635 = vmatmul.mubr.bf16.gmra.mrb[228].mxu0 %v6706_v39  ;;  %3147 = vmatmul.mubr.bf16.gmra.mrb[228].mxu1 %v6707_v40 }
 0x1f8   : > { %5717 = vmatprep.mubr.msk.bf16.mxu0 %vm1754_vm0, %v6708_v43  ;;  %5781 = vmatprep.mubr.msk.bf16.mxu1 %vm1754_vm0, %v6710_v44 }
 0x1f9   : > { %v6108_v55 = vpack.c.bf16 %v3789_v51, %v3789_v51  ;;  %v6236_v56 = vpack.c.bf16 %v3917_v52, %v3917_v52  ;;  %v3790_v57 = vmax.f32 %v3534_v53, 0.0  ;;  %v3918_v58 = vmax.f32 %v3662_v54, 0.0 }
 0x1fa   : > { %v2428_v61 = vpop.f32.mrb[124].mxu0  ;;  %v2940_v60 = vpop.f32.mrb[124].mxu1 }
 0x1fb   : > { %5070 = vst.msk [vmem:[%s7051_s28 + $0xf0] sm:$0xf] %vm5009_vm3, %v6108_v55  ;;  %5198 = vst.msk [vmem:[%s7051_s28 + $0x2f0] sm:$0xf] %vm5009_vm3, %v6236_v56  ;;  %v6109_v62 = vpack.c.bf16 %v3790_v57, %v3790_v57  ;;  %v6237_v0 = vpack.c.bf16 %v3918_v58, %v3918_v58  ;;  %v3272_v1 = vmul.f32 %v7678_v21, %v2428_v61  ;;  %v2430_v3 = vpop.f32.mrb[125].mxu0  ;;  %v2942_v4 = vpop.f32.mrb[125].mxu1 }
 0x1fc   : > { %v3400_v2 = vmul.f32 %v7678_v21, %v2940_v60  ;;  %v2431_v7 = vpop.f32.mrb[126].mxu0  ;;  %v2943_v8 = vpop.f32.mrb[126].mxu1  ;;  %v6726_v3 = vld [vmem:[%s6839_s5 + $0x3d4] ss:$8 sps:$4 sm:$0xff]  }
 0x1fd   : > { %5071 = vst.msk [vmem:[%s7051_s28 + $0xf4] sm:$0xf] %vm5009_vm3, %v6109_v62  ;;  %5199 = vst.msk [vmem:[%s7051_s28 + $0x2f4] sm:$0xf] %vm5009_vm3, %v6237_v0  ;;  %v3535_v11 = vadd.f32 %v7685_v59, %v3272_v1  ;;  %v3273_v13 = vmul.f32 %v7678_v21, %v2431_v7  ;;  %v3401_v14 = vmul.f32 %v7678_v21, %v2943_v8  ;;  %v2433_v15 = vpop.f32.mrb[127].mxu0  ;;  %v2945_v16 = vpop.f32.mrb[127].mxu1 }
 0x1fe   : > { %v3663_v12 = vadd.f32 %v7685_v59, %v3400_v2  ;;  %v6724_v62 = vld [vmem:[%s6839_s5 + $0x3c0] ss:$8 sps:$4 sm:$0xff]   ;;  %v6728_v4 = vld [vmem:[%s6839_s5 + $0x7d4] ss:$8 sps:$4 sm:$0xff]  }
 0x1ff   : > { %v3791_v17 = vmax.f32 %v3535_v11, 0.0  ;;  %v3536_v63 = vadd.f32 %v7685_v59, %v3273_v13  ;;  %v3664_v19 = vadd.f32 %v7685_v59, %v3401_v14  ;;  %2643 = vmatmul.mubr.bf16.gmra.mrb[232].mxu0 %v6712_v5  ;;  %3155 = vmatmul.mubr.bf16.gmra.mrb[232].mxu1 %v6713_v6  ;;  %v6725_v0 = vld [vmem:[%s6839_s5 + $0x7c0] ss:$8 sps:$4 sm:$0xff]  }
 0x200   : > { %v3919_v18 = vmax.f32 %v3663_v12, 0.0  ;;  %5718 = vmatprep.mubr.msk.bf16.mxu0 %vm1754_vm0, %v6714_v9  ;;  %5782 = vmatprep.mubr.msk.bf16.mxu1 %vm1754_vm0, %v6716_v10 }
 0x201   : > { %v6110_v20 = vpack.c.bf16 %v3791_v17, %v3791_v17  ;;  %v3792_v23 = vmax.f32 %v3536_v63, 0.0  ;;  %v3920_v24 = vmax.f32 %v3664_v19, 0.0 }
 0x202   : > { %v6238_v22 = vpack.c.bf16 %v3919_v18, %v3919_v18  ;;  %v2436_v25 = vpop.f32.mrb[128].mxu0  ;;  %v2948_v26 = vpop.f32.mrb[128].mxu1 }
 0x203   : > { %5072 = vst.msk [vmem:[%s7051_s28 + $0xf8] sm:$0xf] %vm5009_vm3, %v6110_v20  ;;  %v6111_v27 = vpack.c.bf16 %v3792_v23, %v3792_v23  ;;  %v6239_v28 = vpack.c.bf16 %v3920_v24, %v3920_v24  ;;  %v3274_v29 = vmul.f32 %v7678_v21, %v2436_v25  ;;  %v3402_v30 = vmul.f32 %v7678_v21, %v2948_v26  ;;  %v2438_v31 = vpop.f32.mrb[129].mxu0  ;;  %v2950_v32 = vpop.f32.mrb[129].mxu1 }
 0x204   : > { %5200 = vst.msk [vmem:[%s7051_s28 + $0x2f8] sm:$0xf] %vm5009_vm3, %v6238_v22  ;;  %v2439_v35 = vpop.f32.mrb[130].mxu0  ;;  %v2951_v36 = vpop.f32.mrb[130].mxu1  ;;  %v6732_v31 = vld [vmem:[%s6839_s5 + $0x3e4] ss:$8 sps:$4 sm:$0xff]  }
 0x205   : > { %5073 = vst.msk [vmem:[%s7051_s28 + $0xfc] sm:$0xf] %vm5009_vm3, %v6111_v27  ;;  %5201 = vst.msk [vmem:[%s7051_s28 + $0x2fc] sm:$0xf] %vm5009_vm3, %v6239_v28  ;;  %v3537_v39 = vadd.f32 %v7685_v59, %v3274_v29  ;;  %v3665_v40 = vadd.f32 %v7685_v59, %v3402_v30  ;;  %v3275_v41 = vmul.f32 %v7678_v21, %v2439_v35  ;;  %v2441_v43 = vpop.f32.mrb[131].mxu0  ;;  %v2953_v44 = vpop.f32.mrb[131].mxu1 }
 0x206   : > { %v3403_v42 = vmul.f32 %v7678_v21, %v2951_v36  ;;  %v6730_v27 = vld [vmem:[%s6839_s5 + $0x3d0] ss:$8 sps:$4 sm:$0xff]   ;;  %v6734_v32 = vld [vmem:[%s6839_s5 + $0x7e4] ss:$8 sps:$4 sm:$0xff]  }
 0x207   : > { %v3793_v45 = vmax.f32 %v3537_v39, 0.0  ;;  %v3921_v46 = vmax.f32 %v3665_v40, 0.0  ;;  %v3538_v47 = vadd.f32 %v7685_v59, %v3275_v41  ;;  %2651 = vmatmul.mubr.bf16.gmra.mrb[236].mxu0 %v6718_v33  ;;  %3163 = vmatmul.mubr.bf16.gmra.mrb[236].mxu1 %v6719_v34  ;;  %v6731_v28 = vld [vmem:[%s6839_s5 + $0x7d0] ss:$8 sps:$4 sm:$0xff]  }
 0x208   : > { %v3666_v48 = vadd.f32 %v7685_v59, %v3403_v42  ;;  %5719 = vmatprep.mubr.msk.bf16.mxu0 %vm1754_vm0, %v6720_v37  ;;  %5783 = vmatprep.mubr.msk.bf16.mxu1 %vm1754_vm0, %v6722_v38 }
 0x209   : > { %v6112_v49 = vpack.c.bf16 %v3793_v45, %v3793_v45  ;;  %v6240_v50 = vpack.c.bf16 %v3921_v46, %v3921_v46  ;;  %v3794_v51 = vmax.f32 %v3538_v47, 0.0 }
 0x20a   : > { %v3922_v52 = vmax.f32 %v3666_v48, 0.0  ;;  %v2444_v53 = vpop.f32.mrb[132].mxu0  ;;  %v2956_v54 = vpop.f32.mrb[132].mxu1 }
 0x20b   : > { %5074 = vst.msk [vmem:[%s7051_s28 + $0x100] sm:$0xf] %vm5009_vm3, %v6112_v49  ;;  %5202 = vst.msk [vmem:[%s7051_s28 + $0x300] sm:$0xf] %vm5009_vm3, %v6240_v50  ;;  %v6113_v55 = vpack.c.bf16 %v3794_v51, %v3794_v51  ;;  %v3276_v57 = vmul.f32 %v7678_v21, %v2444_v53  ;;  %v3404_v58 = vmul.f32 %v7678_v21, %v2956_v54  ;;  %v2446_v61 = vpop.f32.mrb[133].mxu0  ;;  %v2958_v60 = vpop.f32.mrb[133].mxu1 }
 0x20c   : > { %v6241_v56 = vpack.c.bf16 %v3922_v52, %v3922_v52  ;;  %v2447_v1 = vpop.f32.mrb[134].mxu0  ;;  %v2959_v2 = vpop.f32.mrb[134].mxu1  ;;  %v6738_v61 = vld [vmem:[%s6839_s5 + $0x3f4] ss:$8 sps:$4 sm:$0xff]  }
 0x20d   : > { %5075 = vst.msk [vmem:[%s7051_s28 + $0x104] sm:$0xf] %vm5009_vm3, %v6113_v55  ;;  %v3539_v5 = vadd.f32 %v7685_v59, %v3276_v57  ;;  %v3667_v6 = vadd.f32 %v7685_v59, %v3404_v58  ;;  %v3277_v7 = vmul.f32 %v7678_v21, %v2447_v1  ;;  %v3405_v8 = vmul.f32 %v7678_v21, %v2959_v2  ;;  %v2449_v9 = vpop.f32.mrb[135].mxu0  ;;  %v2961_v10 = vpop.f32.mrb[135].mxu1  ;;  %v6736_v55 = vld [vmem:[%s6839_s5 + $0x3e0] ss:$8 sps:$4 sm:$0xff]  }
 0x20e   : > { %5203 = vst.msk [vmem:[%s7051_s28 + $0x304] sm:$0xf] %vm5009_vm3, %v6241_v56  ;;  %v6737_v56 = vld [vmem:[%s6839_s5 + $0x7e0] ss:$8 sps:$4 sm:$0xff]   ;;  %v6740_v60 = vld [vmem:[%s6839_s5 + $0x7f4] ss:$8 sps:$4 sm:$0xff]  }
 0x20f   : > { %v3795_v11 = vmax.f32 %v3539_v5, 0.0  ;;  %v3923_v12 = vmax.f32 %v3667_v6, 0.0  ;;  %v3540_v13 = vadd.f32 %v7685_v59, %v3277_v7  ;;  %v3668_v14 = vadd.f32 %v7685_v59, %v3405_v8  ;;  %2659 = vmatmul.mubr.bf16.gmra.mrb[240].mxu0 %v6724_v62  ;;  %3171 = vmatmul.mubr.bf16.gmra.mrb[240].mxu1 %v6725_v0 }
 0x210   : > { %5720 = vmatprep.mubr.msk.bf16.mxu0 %vm1754_vm0, %v6726_v3  ;;  %5784 = vmatprep.mubr.msk.bf16.mxu1 %vm1754_vm0, %v6728_v4 }
 0x211   : > { %v6114_v15 = vpack.c.bf16 %v3795_v11, %v3795_v11  ;;  %v6242_v16 = vpack.c.bf16 %v3923_v12, %v3923_v12  ;;  %v3796_v17 = vmax.f32 %v3540_v13, 0.0  ;;  %v3924_v18 = vmax.f32 %v3668_v14, 0.0 }
 0x212   : > { %v2452_v63 = vpop.f32.mrb[136].mxu0  ;;  %v2964_v19 = vpop.f32.mrb[136].mxu1 }
 0x213   : > { %5076 = vst.msk [vmem:[%s7051_s28 + $0x108] sm:$0xf] %vm5009_vm3, %v6114_v15  ;;  %5204 = vst.msk [vmem:[%s7051_s28 + $0x308] sm:$0xf] %vm5009_vm3, %v6242_v16  ;;  %v6115_v20 = vpack.c.bf16 %v3796_v17, %v3796_v17  ;;  %v6243_v22 = vpack.c.bf16 %v3924_v18, %v3924_v18  ;;  %v3278_v23 = vmul.f32 %v7678_v21, %v2452_v63  ;;  %v2454_v25 = vpop.f32.mrb[137].mxu0  ;;  %v2966_v26 = vpop.f32.mrb[137].mxu1 }
 0x214   : > { %v3406_v24 = vmul.f32 %v7678_v21, %v2964_v19  ;;  %v2455_v29 = vpop.f32.mrb[138].mxu0  ;;  %v2967_v30 = vpop.f32.mrb[138].mxu1 }
 0x215   : > { %5077 = vst.msk [vmem:[%s7051_s28 + $0x10c] sm:$0xf] %vm5009_vm3, %v6115_v20  ;;  %5205 = vst.msk [vmem:[%s7051_s28 + $0x30c] sm:$0xf] %vm5009_vm3, %v6243_v22  ;;  %v3541_v33 = vadd.f32 %v7685_v59, %v3278_v23  ;;  %v3279_v35 = vmul.f32 %v7678_v21, %v2455_v29  ;;  %v3407_v36 = vmul.f32 %v7678_v21, %v2967_v30  ;;  %v2457_v37 = vpop.f32.mrb[139].mxu0  ;;  %v2969_v38 = vpop.f32.mrb[139].mxu1 }
 0x216   : > { %v3669_v34 = vadd.f32 %v7685_v59, %v3406_v24  ;;  %v6742_v20 = vld [vmem:[%s6839_s5 + $0x3f0] ss:$8 sps:$4 sm:$0xff]  }
 0x217   : > { %v3797_v39 = vmax.f32 %v3541_v33, 0.0  ;;  %v3542_v41 = vadd.f32 %v7685_v59, %v3279_v35  ;;  %v3670_v42 = vadd.f32 %v7685_v59, %v3407_v36  ;;  %2667 = vmatmul.mubr.bf16.gmra.mrb[244].mxu0 %v6730_v27  ;;  %3179 = vmatmul.mubr.bf16.gmra.mrb[244].mxu1 %v6731_v28  ;;  %v6743_v22 = vld [vmem:[%s6839_s5 + $0x7f0] ss:$8 sps:$4 sm:$0xff]  }
 0x218   : > { %v3925_v40 = vmax.f32 %v3669_v34, 0.0  ;;  %5721 = vmatprep.mubr.msk.bf16.mxu0 %vm1754_vm0, %v6732_v31  ;;  %5785 = vmatprep.mubr.msk.bf16.mxu1 %vm1754_vm0, %v6734_v32 }
 0x219   : > { %v6116_v43 = vpack.c.bf16 %v3797_v39, %v3797_v39  ;;  %v3798_v45 = vmax.f32 %v3542_v41, 0.0  ;;  %v3926_v46 = vmax.f32 %v3670_v42, 0.0 }
 0x21a   : > { %v6244_v44 = vpack.c.bf16 %v3925_v40, %v3925_v40  ;;  %v2460_v47 = vpop.f32.mrb[140].mxu0  ;;  %v2972_v48 = vpop.f32.mrb[140].mxu1 }
 0x21b   : > { %5078 = vst.msk [vmem:[%s7051_s28 + $0x110] sm:$0xf] %vm5009_vm3, %v6116_v43  ;;  %v6117_v49 = vpack.c.bf16 %v3798_v45, %v3798_v45  ;;  %v6245_v50 = vpack.c.bf16 %v3926_v46, %v3926_v46  ;;  %v3280_v51 = vmul.f32 %v7678_v21, %v2460_v47  ;;  %v3408_v52 = vmul.f32 %v7678_v21, %v2972_v48  ;;  %v2462_v53 = vpop.f32.mrb[141].mxu0  ;;  %v2974_v54 = vpop.f32.mrb[141].mxu1 }
 0x21c   : > { %5206 = vst.msk [vmem:[%s7051_s28 + $0x310] sm:$0xf] %vm5009_vm3, %v6244_v44  ;;  %v2463_v57 = vpop.f32.mrb[142].mxu0  ;;  %v2975_v58 = vpop.f32.mrb[142].mxu1 }
 0x21d   : > { %5079 = vst.msk [vmem:[%s7051_s28 + $0x114] sm:$0xf] %vm5009_vm3, %v6117_v49  ;;  %5207 = vst.msk [vmem:[%s7051_s28 + $0x314] sm:$0xf] %vm5009_vm3, %v6245_v50  ;;  %v3543_v62 = vadd.f32 %v7685_v59, %v3280_v51  ;;  %v3671_v0 = vadd.f32 %v7685_v59, %v3408_v52  ;;  %v3281_v1 = vmul.f32 %v7678_v21, %v2463_v57  ;;  %v2465_v3 = vpop.f32.mrb[143].mxu0  ;;  %v2977_v4 = vpop.f32.mrb[143].mxu1 }
 0x21e   : > { %v3409_v2 = vmul.f32 %v7678_v21, %v2975_v58 }
 0x21f   : > { %v3799_v5 = vmax.f32 %v3543_v62, 0.0  ;;  %v3927_v6 = vmax.f32 %v3671_v0, 0.0  ;;  %v3544_v7 = vadd.f32 %v7685_v59, %v3281_v1  ;;  %2675 = vmatmul.mubr.bf16.gmra.mrb[248].mxu0 %v6736_v55  ;;  %3187 = vmatmul.mubr.bf16.gmra.mrb[248].mxu1 %v6737_v56 }
 0x220   : > { %v3672_v8 = vadd.f32 %v7685_v59, %v3409_v2  ;;  %5722 = vmatprep.mubr.msk.bf16.mxu0 %vm1754_vm0, %v6738_v61  ;;  %5786 = vmatprep.mubr.msk.bf16.mxu1 %vm1754_vm0, %v6740_v60 }
 0x221   : > { %v6118_v9 = vpack.c.bf16 %v3799_v5, %v3799_v5  ;;  %v6246_v10 = vpack.c.bf16 %v3927_v6, %v3927_v6  ;;  %v3800_v11 = vmax.f32 %v3544_v7, 0.0 }
 0x222   : > { %v3928_v12 = vmax.f32 %v3672_v8, 0.0  ;;  %v2468_v13 = vpop.f32.mrb[144].mxu0  ;;  %v2980_v14 = vpop.f32.mrb[144].mxu1 }
 0x223   : > { %5080 = vst.msk [vmem:[%s7051_s28 + $0x118] sm:$0xf] %vm5009_vm3, %v6118_v9  ;;  %5208 = vst.msk [vmem:[%s7051_s28 + $0x318] sm:$0xf] %vm5009_vm3, %v6246_v10  ;;  %v6119_v15 = vpack.c.bf16 %v3800_v11, %v3800_v11  ;;  %v3282_v17 = vmul.f32 %v7678_v21, %v2468_v13  ;;  %v3410_v18 = vmul.f32 %v7678_v21, %v2980_v14  ;;  %v2470_v63 = vpop.f32.mrb[145].mxu0  ;;  %v2982_v19 = vpop.f32.mrb[145].mxu1 }
 0x224   : > { %v6247_v16 = vpack.c.bf16 %v3928_v12, %v3928_v12  ;;  %v2471_v23 = vpop.f32.mrb[146].mxu0  ;;  %v2983_v24 = vpop.f32.mrb[146].mxu1 }
 0x225   : > { %5081 = vst.msk [vmem:[%s7051_s28 + $0x11c] sm:$0xf] %vm5009_vm3, %v6119_v15  ;;  %v3545_v25 = vadd.f32 %v7685_v59, %v3282_v17  ;;  %v3673_v26 = vadd.f32 %v7685_v59, %v3410_v18  ;;  %v3283_v27 = vmul.f32 %v7678_v21, %v2471_v23  ;;  %v3411_v28 = vmul.f32 %v7678_v21, %v2983_v24  ;;  %v2473_v29 = vpop.f32.mrb[147].mxu0  ;;  %v2985_v30 = vpop.f32.mrb[147].mxu1 }
 0x226   : > { %5209 = vst.msk [vmem:[%s7051_s28 + $0x31c] sm:$0xf] %vm5009_vm3, %v6247_v16 }
 0x227   : > { %v3801_v31 = vmax.f32 %v3545_v25, 0.0  ;;  %v3929_v32 = vmax.f32 %v3673_v26, 0.0  ;;  %v3546_v33 = vadd.f32 %v7685_v59, %v3283_v27  ;;  %v3674_v34 = vadd.f32 %v7685_v59, %v3411_v28  ;;  %2683 = vmatmul.mubr.bf16.gmra.mrb[252].mxu0 %v6742_v20  ;;  %3195 = vmatmul.mubr.bf16.gmra.mrb[252].mxu1 %v6743_v22 }
 0x229   : > { %v6120_v35 = vpack.c.bf16 %v3801_v31, %v3801_v31  ;;  %v6248_v36 = vpack.c.bf16 %v3929_v32, %v3929_v32  ;;  %v3802_v37 = vmax.f32 %v3546_v33, 0.0  ;;  %v3930_v38 = vmax.f32 %v3674_v34, 0.0 }
 0x22a   : > { %v2476_v39 = vpop.f32.mrb[148].mxu0  ;;  %v2988_v40 = vpop.f32.mrb[148].mxu1 }
 0x22b   : > { %5082 = vst.msk [vmem:[%s7051_s28 + $0x120] sm:$0xf] %vm5009_vm3, %v6120_v35  ;;  %5210 = vst.msk [vmem:[%s7051_s28 + $0x320] sm:$0xf] %vm5009_vm3, %v6248_v36  ;;  %v6121_v41 = vpack.c.bf16 %v3802_v37, %v3802_v37  ;;  %v6249_v42 = vpack.c.bf16 %v3930_v38, %v3930_v38  ;;  %v3284_v43 = vmul.f32 %v7678_v21, %v2476_v39  ;;  %v2478_v45 = vpop.f32.mrb[149].mxu0  ;;  %v2990_v46 = vpop.f32.mrb[149].mxu1 }
 0x22c   : > { %v3412_v44 = vmul.f32 %v7678_v21, %v2988_v40  ;;  %v2479_v47 = vpop.f32.mrb[150].mxu0  ;;  %v2991_v48 = vpop.f32.mrb[150].mxu1 }
 0x22d   : > { %5083 = vst.msk [vmem:[%s7051_s28 + $0x124] sm:$0xf] %vm5009_vm3, %v6121_v41  ;;  %5211 = vst.msk [vmem:[%s7051_s28 + $0x324] sm:$0xf] %vm5009_vm3, %v6249_v42  ;;  %v3547_v49 = vadd.f32 %v7685_v59, %v3284_v43  ;;  %v3285_v51 = vmul.f32 %v7678_v21, %v2479_v47  ;;  %v3413_v52 = vmul.f32 %v7678_v21, %v2991_v48  ;;  %v2481_v53 = vpop.f32.mrb[151].mxu0  ;;  %v2993_v54 = vpop.f32.mrb[151].mxu1 }
 0x22e   : > { %v3675_v50 = vadd.f32 %v7685_v59, %v3412_v44 }
 0x22f   : > { %v3803_v55 = vmax.f32 %v3547_v49, 0.0  ;;  %v3548_v57 = vadd.f32 %v7685_v59, %v3285_v51  ;;  %v3676_v58 = vadd.f32 %v7685_v59, %v3413_v52 }
 0x230   : > { %v3931_v56 = vmax.f32 %v3675_v50, 0.0 }
 0x231   : > { %v6122_v61 = vpack.c.bf16 %v3803_v55, %v3803_v55  ;;  %v3804_v62 = vmax.f32 %v3548_v57, 0.0  ;;  %v3932_v0 = vmax.f32 %v3676_v58, 0.0 }
 0x232   : > { %v6250_v60 = vpack.c.bf16 %v3931_v56, %v3931_v56  ;;  %v2484_v1 = vpop.f32.mrb[152].mxu0  ;;  %v2996_v2 = vpop.f32.mrb[152].mxu1 }
 0x233   : > { %5084 = vst.msk [vmem:[%s7051_s28 + $0x128] sm:$0xf] %vm5009_vm3, %v6122_v61  ;;  %v6123_v3 = vpack.c.bf16 %v3804_v62, %v3804_v62  ;;  %v6251_v4 = vpack.c.bf16 %v3932_v0, %v3932_v0  ;;  %v3286_v5 = vmul.f32 %v7678_v21, %v2484_v1  ;;  %v3414_v6 = vmul.f32 %v7678_v21, %v2996_v2  ;;  %v2486_v7 = vpop.f32.mrb[153].mxu0  ;;  %v2998_v8 = vpop.f32.mrb[153].mxu1 }
 0x234   : > { %5212 = vst.msk [vmem:[%s7051_s28 + $0x328] sm:$0xf] %vm5009_vm3, %v6250_v60  ;;  %v2487_v9 = vpop.f32.mrb[154].mxu0  ;;  %v2999_v10 = vpop.f32.mrb[154].mxu1 }
 0x235   : > { %5085 = vst.msk [vmem:[%s7051_s28 + $0x12c] sm:$0xf] %vm5009_vm3, %v6123_v3  ;;  %5213 = vst.msk [vmem:[%s7051_s28 + $0x32c] sm:$0xf] %vm5009_vm3, %v6251_v4  ;;  %v3549_v11 = vadd.f32 %v7685_v59, %v3286_v5  ;;  %v3677_v12 = vadd.f32 %v7685_v59, %v3414_v6  ;;  %v3287_v13 = vmul.f32 %v7678_v21, %v2487_v9  ;;  %v2489_v15 = vpop.f32.mrb[155].mxu0  ;;  %v3001_v16 = vpop.f32.mrb[155].mxu1 }
 0x236   : > { %v3415_v14 = vmul.f32 %v7678_v21, %v2999_v10 }
 0x237   : > { %v3805_v17 = vmax.f32 %v3549_v11, 0.0  ;;  %v3933_v18 = vmax.f32 %v3677_v12, 0.0  ;;  %v3550_v63 = vadd.f32 %v7685_v59, %v3287_v13 }
 0x238   : > { %v3678_v19 = vadd.f32 %v7685_v59, %v3415_v14 }
 0x239   : > { %v6124_v20 = vpack.c.bf16 %v3805_v17, %v3805_v17  ;;  %v6252_v22 = vpack.c.bf16 %v3933_v18, %v3933_v18  ;;  %v3806_v23 = vmax.f32 %v3550_v63, 0.0 }
 0x23a   : > { %v3934_v24 = vmax.f32 %v3678_v19, 0.0  ;;  %v2492_v25 = vpop.f32.mrb[156].mxu0  ;;  %v3004_v26 = vpop.f32.mrb[156].mxu1 }
 0x23b   : > { %5086 = vst.msk [vmem:[%s7051_s28 + $0x130] sm:$0xf] %vm5009_vm3, %v6124_v20  ;;  %5214 = vst.msk [vmem:[%s7051_s28 + $0x330] sm:$0xf] %vm5009_vm3, %v6252_v22  ;;  %v6125_v27 = vpack.c.bf16 %v3806_v23, %v3806_v23  ;;  %v3288_v29 = vmul.f32 %v7678_v21, %v2492_v25  ;;  %v3416_v30 = vmul.f32 %v7678_v21, %v3004_v26  ;;  %v2494_v31 = vpop.f32.mrb[157].mxu0  ;;  %v3006_v32 = vpop.f32.mrb[157].mxu1 }
 0x23c   : > { %v6253_v28 = vpack.c.bf16 %v3934_v24, %v3934_v24  ;;  %v2495_v33 = vpop.f32.mrb[158].mxu0  ;;  %v3007_v34 = vpop.f32.mrb[158].mxu1 }
 0x23d   : > { %5087 = vst.msk [vmem:[%s7051_s28 + $0x134] sm:$0xf] %vm5009_vm3, %v6125_v27  ;;  %v3551_v35 = vadd.f32 %v7685_v59, %v3288_v29  ;;  %v3679_v36 = vadd.f32 %v7685_v59, %v3416_v30  ;;  %v3289_v37 = vmul.f32 %v7678_v21, %v2495_v33  ;;  %v3417_v38 = vmul.f32 %v7678_v21, %v3007_v34  ;;  %v2497_v39 = vpop.f32.mrb[159].mxu0  ;;  %v3009_v40 = vpop.f32.mrb[159].mxu1 }
 0x23e   : > { %5215 = vst.msk [vmem:[%s7051_s28 + $0x334] sm:$0xf] %vm5009_vm3, %v6253_v28 }
 0x23f   : > { %v3807_v41 = vmax.f32 %v3551_v35, 0.0  ;;  %v3935_v42 = vmax.f32 %v3679_v36, 0.0  ;;  %v3552_v43 = vadd.f32 %v7685_v59, %v3289_v37  ;;  %v3680_v44 = vadd.f32 %v7685_v59, %v3417_v38 }
 0x241   : > { %v6126_v45 = vpack.c.bf16 %v3807_v41, %v3807_v41  ;;  %v6254_v46 = vpack.c.bf16 %v3935_v42, %v3935_v42  ;;  %v3808_v47 = vmax.f32 %v3552_v43, 0.0  ;;  %v3936_v48 = vmax.f32 %v3680_v44, 0.0 }
 0x242   : > { %v2500_v49 = vpop.f32.mrb[160].mxu0  ;;  %v3012_v50 = vpop.f32.mrb[160].mxu1 }
 0x243   : > { %5088 = vst.msk [vmem:[%s7051_s28 + $0x138] sm:$0xf] %vm5009_vm3, %v6126_v45  ;;  %5216 = vst.msk [vmem:[%s7051_s28 + $0x338] sm:$0xf] %vm5009_vm3, %v6254_v46  ;;  %v6127_v51 = vpack.c.bf16 %v3808_v47, %v3808_v47  ;;  %v6255_v52 = vpack.c.bf16 %v3936_v48, %v3936_v48  ;;  %v3290_v53 = vmul.f32 %v7678_v21, %v2500_v49  ;;  %v2502_v55 = vpop.f32.mrb[161].mxu0  ;;  %v3014_v56 = vpop.f32.mrb[161].mxu1 }
 0x244   : > { %v3418_v54 = vmul.f32 %v7678_v21, %v3012_v50  ;;  %v2503_v57 = vpop.f32.mrb[162].mxu0  ;;  %v3015_v58 = vpop.f32.mrb[162].mxu1 }
 0x245   : > { %5089 = vst.msk [vmem:[%s7051_s28 + $0x13c] sm:$0xf] %vm5009_vm3, %v6127_v51  ;;  %5217 = vst.msk [vmem:[%s7051_s28 + $0x33c] sm:$0xf] %vm5009_vm3, %v6255_v52  ;;  %v3553_v61 = vadd.f32 %v7685_v59, %v3290_v53  ;;  %v3291_v62 = vmul.f32 %v7678_v21, %v2503_v57  ;;  %v3419_v0 = vmul.f32 %v7678_v21, %v3015_v58  ;;  %v2505_v1 = vpop.f32.mrb[163].mxu0  ;;  %v3017_v2 = vpop.f32.mrb[163].mxu1 }
 0x246   : > { %v3681_v60 = vadd.f32 %v7685_v59, %v3418_v54 }
 0x247   : > { %v3809_v3 = vmax.f32 %v3553_v61, 0.0  ;;  %v3554_v5 = vadd.f32 %v7685_v59, %v3291_v62  ;;  %v3682_v6 = vadd.f32 %v7685_v59, %v3419_v0 }
 0x248   : > { %v3937_v4 = vmax.f32 %v3681_v60, 0.0 }
 0x249   : > { %v6128_v7 = vpack.c.bf16 %v3809_v3, %v3809_v3  ;;  %v3810_v9 = vmax.f32 %v3554_v5, 0.0  ;;  %v3938_v10 = vmax.f32 %v3682_v6, 0.0 }
 0x24a   : > { %v6256_v8 = vpack.c.bf16 %v3937_v4, %v3937_v4  ;;  %v2508_v11 = vpop.f32.mrb[164].mxu0  ;;  %v3020_v12 = vpop.f32.mrb[164].mxu1 }
 0x24b   : > { %5090 = vst.msk [vmem:[%s7051_s28 + $0x140] sm:$0xf] %vm5009_vm3, %v6128_v7  ;;  %v6129_v13 = vpack.c.bf16 %v3810_v9, %v3810_v9  ;;  %v6257_v14 = vpack.c.bf16 %v3938_v10, %v3938_v10  ;;  %v3292_v15 = vmul.f32 %v7678_v21, %v2508_v11  ;;  %v3420_v16 = vmul.f32 %v7678_v21, %v3020_v12  ;;  %v2510_v17 = vpop.f32.mrb[165].mxu0  ;;  %v3022_v18 = vpop.f32.mrb[165].mxu1 }
 0x24c   : > { %5218 = vst.msk [vmem:[%s7051_s28 + $0x340] sm:$0xf] %vm5009_vm3, %v6256_v8  ;;  %v2511_v63 = vpop.f32.mrb[166].mxu0  ;;  %v3023_v19 = vpop.f32.mrb[166].mxu1 }
 0x24d   : > { %5091 = vst.msk [vmem:[%s7051_s28 + $0x144] sm:$0xf] %vm5009_vm3, %v6129_v13  ;;  %5219 = vst.msk [vmem:[%s7051_s28 + $0x344] sm:$0xf] %vm5009_vm3, %v6257_v14  ;;  %v3555_v20 = vadd.f32 %v7685_v59, %v3292_v15  ;;  %v3683_v22 = vadd.f32 %v7685_v59, %v3420_v16  ;;  %v3293_v23 = vmul.f32 %v7678_v21, %v2511_v63  ;;  %v2513_v25 = vpop.f32.mrb[167].mxu0  ;;  %v3025_v26 = vpop.f32.mrb[167].mxu1 }
 0x24e   : > { %v3421_v24 = vmul.f32 %v7678_v21, %v3023_v19 }
 0x24f   : > { %v3811_v27 = vmax.f32 %v3555_v20, 0.0  ;;  %v3939_v28 = vmax.f32 %v3683_v22, 0.0  ;;  %v3556_v29 = vadd.f32 %v7685_v59, %v3293_v23 }
 0x250   : > { %v3684_v30 = vadd.f32 %v7685_v59, %v3421_v24 }
 0x251   : > { %v6130_v31 = vpack.c.bf16 %v3811_v27, %v3811_v27  ;;  %v6258_v32 = vpack.c.bf16 %v3939_v28, %v3939_v28  ;;  %v3812_v33 = vmax.f32 %v3556_v29, 0.0 }
 0x252   : > { %v3940_v34 = vmax.f32 %v3684_v30, 0.0  ;;  %v2516_v35 = vpop.f32.mrb[168].mxu0  ;;  %v3028_v36 = vpop.f32.mrb[168].mxu1 }
 0x253   : > { %5092 = vst.msk [vmem:[%s7051_s28 + $0x148] sm:$0xf] %vm5009_vm3, %v6130_v31  ;;  %5220 = vst.msk [vmem:[%s7051_s28 + $0x348] sm:$0xf] %vm5009_vm3, %v6258_v32  ;;  %v6131_v37 = vpack.c.bf16 %v3812_v33, %v3812_v33  ;;  %v3294_v39 = vmul.f32 %v7678_v21, %v2516_v35  ;;  %v3422_v40 = vmul.f32 %v7678_v21, %v3028_v36  ;;  %v2518_v41 = vpop.f32.mrb[169].mxu0  ;;  %v3030_v42 = vpop.f32.mrb[169].mxu1 }
 0x254   : > { %v6259_v38 = vpack.c.bf16 %v3940_v34, %v3940_v34  ;;  %v2519_v43 = vpop.f32.mrb[170].mxu0  ;;  %v3031_v44 = vpop.f32.mrb[170].mxu1  ;;  %v7990_v33 = vld [vmem:[%s8322_s2] ss:$0 sm:$0xff] }
 0x255   : > { %5093 = vst.msk [vmem:[%s7051_s28 + $0x14c] sm:$0xf] %vm5009_vm3, %v6131_v37  ;;  %v3557_v45 = vadd.f32 %v7685_v59, %v3294_v39  ;;  %v3685_v46 = vadd.f32 %v7685_v59, %v3422_v40  ;;  %v3295_v47 = vmul.f32 %v7678_v21, %v2519_v43  ;;  %v3423_v48 = vmul.f32 %v7678_v21, %v3031_v44  ;;  %v2521_v49 = vpop.f32.mrb[171].mxu0  ;;  %v3033_v50 = vpop.f32.mrb[171].mxu1  ;;  %v7997_v39 = vld [vmem:[%s8323_s3] ss:$0 sm:$0xff] }
 0x256   : > { %5221 = vst.msk [vmem:[%s7051_s28 + $0x34c] sm:$0xf] %vm5009_vm3, %v6259_v38 }
 0x257   : > { %v3813_v51 = vmax.f32 %v3557_v45, 0.0  ;;  %v3941_v52 = vmax.f32 %v3685_v46, 0.0  ;;  %v3558_v53 = vadd.f32 %v7685_v59, %v3295_v47  ;;  %v3686_v54 = vadd.f32 %v7685_v59, %v3423_v48 }
 0x259   : > { %v6132_v55 = vpack.c.bf16 %v3813_v51, %v3813_v51  ;;  %v6260_v56 = vpack.c.bf16 %v3941_v52, %v3941_v52  ;;  %v3814_v57 = vmax.f32 %v3558_v53, 0.0  ;;  %v3942_v58 = vmax.f32 %v3686_v54, 0.0 }
 0x25a   : > { %v2524_v61 = vpop.f32.mrb[172].mxu0  ;;  %v3036_v60 = vpop.f32.mrb[172].mxu1 }
 0x25b   : > { %5094 = vst.msk [vmem:[%s7051_s28 + $0x150] sm:$0xf] %vm5009_vm3, %v6132_v55  ;;  %5222 = vst.msk [vmem:[%s7051_s28 + $0x350] sm:$0xf] %vm5009_vm3, %v6260_v56  ;;  %v6133_v62 = vpack.c.bf16 %v3814_v57, %v3814_v57  ;;  %v6261_v0 = vpack.c.bf16 %v3942_v58, %v3942_v58  ;;  %v3296_v1 = vmul.f32 %v7678_v21, %v2524_v61  ;;  %v2526_v3 = vpop.f32.mrb[173].mxu0  ;;  %v3038_v4 = vpop.f32.mrb[173].mxu1 }
 0x25c   : > { %v3424_v2 = vmul.f32 %v7678_v21, %v3036_v60  ;;  %v2527_v5 = vpop.f32.mrb[174].mxu0  ;;  %v3039_v6 = vpop.f32.mrb[174].mxu1 }
 0x25d   : > { %5095 = vst.msk [vmem:[%s7051_s28 + $0x154] sm:$0xf] %vm5009_vm3, %v6133_v62  ;;  %5223 = vst.msk [vmem:[%s7051_s28 + $0x354] sm:$0xf] %vm5009_vm3, %v6261_v0  ;;  %v3559_v7 = vadd.f32 %v7685_v59, %v3296_v1  ;;  %v3297_v9 = vmul.f32 %v7678_v21, %v2527_v5  ;;  %v3425_v10 = vmul.f32 %v7678_v21, %v3039_v6  ;;  %v2529_v11 = vpop.f32.mrb[175].mxu0  ;;  %v3041_v12 = vpop.f32.mrb[175].mxu1 }
 0x25e   : > { %v3687_v8 = vadd.f32 %v7685_v59, %v3424_v2 }
 0x25f   : > { %v3815_v13 = vmax.f32 %v3559_v7, 0.0  ;;  %v3560_v15 = vadd.f32 %v7685_v59, %v3297_v9  ;;  %v3688_v16 = vadd.f32 %v7685_v59, %v3425_v10 }
 0x260   : > { %v3943_v14 = vmax.f32 %v3687_v8, 0.0 }
 0x261   : > { %v6134_v17 = vpack.c.bf16 %v3815_v13, %v3815_v13  ;;  %v3816_v63 = vmax.f32 %v3560_v15, 0.0  ;;  %v3944_v19 = vmax.f32 %v3688_v16, 0.0 }
 0x262   : > { %v6262_v18 = vpack.c.bf16 %v3943_v14, %v3943_v14  ;;  %v2532_v20 = vpop.f32.mrb[176].mxu0  ;;  %v3044_v22 = vpop.f32.mrb[176].mxu1 }
 0x263   : > { %5096 = vst.msk [vmem:[%s7051_s28 + $0x158] sm:$0xf] %vm5009_vm3, %v6134_v17  ;;  %v6135_v23 = vpack.c.bf16 %v3816_v63, %v3816_v63  ;;  %v6263_v24 = vpack.c.bf16 %v3944_v19, %v3944_v19  ;;  %v3298_v25 = vmul.f32 %v7678_v21, %v2532_v20  ;;  %v3426_v26 = vmul.f32 %v7678_v21, %v3044_v22  ;;  %v2534_v27 = vpop.f32.mrb[177].mxu0  ;;  %v3046_v28 = vpop.f32.mrb[177].mxu1 }
 0x264   : > { %5224 = vst.msk [vmem:[%s7051_s28 + $0x358] sm:$0xf] %vm5009_vm3, %v6262_v18  ;;  %v2535_v29 = vpop.f32.mrb[178].mxu0  ;;  %v3047_v30 = vpop.f32.mrb[178].mxu1 }
 0x265   : > { %5097 = vst.msk [vmem:[%s7051_s28 + $0x15c] sm:$0xf] %vm5009_vm3, %v6135_v23  ;;  %5225 = vst.msk [vmem:[%s7051_s28 + $0x35c] sm:$0xf] %vm5009_vm3, %v6263_v24  ;;  %v3561_v31 = vadd.f32 %v7685_v59, %v3298_v25  ;;  %v3689_v32 = vadd.f32 %v7685_v59, %v3426_v26  ;;  %v3299_v21 = vmul.f32 %v7990_v33, %v2535_v29  ;;  %v2537_v35 = vpop.f32.mrb[179].mxu0  ;;  %v3049_v36 = vpop.f32.mrb[179].mxu1 }
 0x266   : > { %v3427_v34 = vmul.f32 %v7990_v33, %v3047_v30 }
 0x267   : > { %v3817_v37 = vmax.f32 %v3561_v31, 0.0  ;;  %v3945_v38 = vmax.f32 %v3689_v32, 0.0  ;;  %v3562_v59 = vadd.f32 %v7997_v39, %v3299_v21 }
 0x268   : > { %v3690_v40 = vadd.f32 %v7997_v39, %v3427_v34 }
 0x269   : > { %v6136_v41 = vpack.c.bf16 %v3817_v37, %v3817_v37  ;;  %v6264_v42 = vpack.c.bf16 %v3945_v38, %v3945_v38  ;;  %v3818_v43 = vmax.f32 %v3562_v59, 0.0 }
 0x26a   : > { %v3946_v44 = vmax.f32 %v3690_v40, 0.0  ;;  %v2540_v45 = vpop.f32.mrb[180].mxu0  ;;  %v3052_v46 = vpop.f32.mrb[180].mxu1 }
 0x26b   : > { %5098 = vst.msk [vmem:[%s7051_s28 + $0x160] sm:$0xf] %vm5009_vm3, %v6136_v41  ;;  %5226 = vst.msk [vmem:[%s7051_s28 + $0x360] sm:$0xf] %vm5009_vm3, %v6264_v42  ;;  %v6137_v47 = vpack.c.bf16 %v3818_v43, %v3818_v43  ;;  %v3300_v49 = vmul.f32 %v7990_v33, %v2540_v45  ;;  %v3428_v50 = vmul.f32 %v7990_v33, %v3052_v46  ;;  %v2542_v51 = vpop.f32.mrb[181].mxu0  ;;  %v3054_v52 = vpop.f32.mrb[181].mxu1 }
 0x26c   : > { %v6265_v48 = vpack.c.bf16 %v3946_v44, %v3946_v44  ;;  %v2543_v53 = vpop.f32.mrb[182].mxu0  ;;  %v3055_v54 = vpop.f32.mrb[182].mxu1 }
 0x26d   : > { %5099 = vst.msk [vmem:[%s7051_s28 + $0x164] sm:$0xf] %vm5009_vm3, %v6137_v47  ;;  %v3563_v55 = vadd.f32 %v7997_v39, %v3300_v49  ;;  %v3691_v56 = vadd.f32 %v7997_v39, %v3428_v50  ;;  %v3301_v57 = vmul.f32 %v7990_v33, %v2543_v53  ;;  %v3429_v58 = vmul.f32 %v7990_v33, %v3055_v54  ;;  %v2545_v61 = vpop.f32.mrb[183].mxu0  ;;  %v3057_v60 = vpop.f32.mrb[183].mxu1 }
 0x26e   : > { %5227 = vst.msk [vmem:[%s7051_s28 + $0x364] sm:$0xf] %vm5009_vm3, %v6265_v48 }
 0x26f   : > { %v3819_v62 = vmax.f32 %v3563_v55, 0.0  ;;  %v3947_v0 = vmax.f32 %v3691_v56, 0.0  ;;  %v3564_v1 = vadd.f32 %v7997_v39, %v3301_v57  ;;  %v3692_v2 = vadd.f32 %v7997_v39, %v3429_v58 }
 0x271   : > { %v6138_v3 = vpack.c.bf16 %v3819_v62, %v3819_v62  ;;  %v6266_v4 = vpack.c.bf16 %v3947_v0, %v3947_v0  ;;  %v3820_v5 = vmax.f32 %v3564_v1, 0.0  ;;  %v3948_v6 = vmax.f32 %v3692_v2, 0.0 }
 0x272   : > { %v2548_v7 = vpop.f32.mrb[184].mxu0  ;;  %v3060_v8 = vpop.f32.mrb[184].mxu1 }
 0x273   : > { %5100 = vst.msk [vmem:[%s7051_s28 + $0x168] sm:$0xf] %vm5009_vm3, %v6138_v3  ;;  %5228 = vst.msk [vmem:[%s7051_s28 + $0x368] sm:$0xf] %vm5009_vm3, %v6266_v4  ;;  %v6139_v9 = vpack.c.bf16 %v3820_v5, %v3820_v5  ;;  %v6267_v10 = vpack.c.bf16 %v3948_v6, %v3948_v6  ;;  %v3302_v11 = vmul.f32 %v7990_v33, %v2548_v7  ;;  %v2550_v13 = vpop.f32.mrb[185].mxu0  ;;  %v3062_v14 = vpop.f32.mrb[185].mxu1 }
 0x274   : > { %v3430_v12 = vmul.f32 %v7990_v33, %v3060_v8  ;;  %v2551_v15 = vpop.f32.mrb[186].mxu0  ;;  %v3063_v16 = vpop.f32.mrb[186].mxu1 }
 0x275   : > { %5101 = vst.msk [vmem:[%s7051_s28 + $0x16c] sm:$0xf] %vm5009_vm3, %v6139_v9  ;;  %5229 = vst.msk [vmem:[%s7051_s28 + $0x36c] sm:$0xf] %vm5009_vm3, %v6267_v10  ;;  %v3565_v17 = vadd.f32 %v7997_v39, %v3302_v11  ;;  %v3303_v63 = vmul.f32 %v7990_v33, %v2551_v15  ;;  %v3431_v19 = vmul.f32 %v7990_v33, %v3063_v16  ;;  %v2553_v20 = vpop.f32.mrb[187].mxu0  ;;  %v3065_v22 = vpop.f32.mrb[187].mxu1 }
 0x276   : > { %v3693_v18 = vadd.f32 %v7997_v39, %v3430_v12 }
 0x277   : > { %v3821_v23 = vmax.f32 %v3565_v17, 0.0  ;;  %v3566_v25 = vadd.f32 %v7997_v39, %v3303_v63  ;;  %v3694_v26 = vadd.f32 %v7997_v39, %v3431_v19 }
 0x278   : > { %v3949_v24 = vmax.f32 %v3693_v18, 0.0 }
 0x279   : > { %v6140_v27 = vpack.c.bf16 %v3821_v23, %v3821_v23  ;;  %v3822_v29 = vmax.f32 %v3566_v25, 0.0  ;;  %v3950_v30 = vmax.f32 %v3694_v26, 0.0 }
 0x27a   : > { %v6268_v28 = vpack.c.bf16 %v3949_v24, %v3949_v24  ;;  %v2556_v31 = vpop.f32.mrb[188].mxu0  ;;  %v3068_v32 = vpop.f32.mrb[188].mxu1 }
 0x27b   : > { %5102 = vst.msk [vmem:[%s7051_s28 + $0x170] sm:$0xf] %vm5009_vm3, %v6140_v27  ;;  %v6141_v21 = vpack.c.bf16 %v3822_v29, %v3822_v29  ;;  %v6269_v34 = vpack.c.bf16 %v3950_v30, %v3950_v30  ;;  %v3304_v35 = vmul.f32 %v7990_v33, %v2556_v31  ;;  %v3432_v36 = vmul.f32 %v7990_v33, %v3068_v32  ;;  %v2558_v37 = vpop.f32.mrb[189].mxu0  ;;  %v3070_v38 = vpop.f32.mrb[189].mxu1 }
 0x27c   : > { %5230 = vst.msk [vmem:[%s7051_s28 + $0x370] sm:$0xf] %vm5009_vm3, %v6268_v28  ;;  %v2559_v59 = vpop.f32.mrb[190].mxu0  ;;  %v3071_v40 = vpop.f32.mrb[190].mxu1 }
 0x27d   : > { %5103 = vst.msk [vmem:[%s7051_s28 + $0x174] sm:$0xf] %vm5009_vm3, %v6141_v21  ;;  %5231 = vst.msk [vmem:[%s7051_s28 + $0x374] sm:$0xf] %vm5009_vm3, %v6269_v34  ;;  %v3567_v41 = vadd.f32 %v7997_v39, %v3304_v35  ;;  %v3695_v42 = vadd.f32 %v7997_v39, %v3432_v36  ;;  %v3305_v43 = vmul.f32 %v7990_v33, %v2559_v59  ;;  %v2561_v45 = vpop.f32.mrb[191].mxu0  ;;  %v3073_v46 = vpop.f32.mrb[191].mxu1 }
 0x27e   : > { %v3433_v44 = vmul.f32 %v7990_v33, %v3071_v40 }
 0x27f   : > { %v3823_v47 = vmax.f32 %v3567_v41, 0.0  ;;  %v3951_v48 = vmax.f32 %v3695_v42, 0.0  ;;  %v3568_v49 = vadd.f32 %v7997_v39, %v3305_v43 }
 0x280   : > { %v3696_v50 = vadd.f32 %v7997_v39, %v3433_v44 }
 0x281   : > { %v6142_v51 = vpack.c.bf16 %v3823_v47, %v3823_v47  ;;  %v6270_v52 = vpack.c.bf16 %v3951_v48, %v3951_v48  ;;  %v3824_v53 = vmax.f32 %v3568_v49, 0.0 }
 0x282   : > { %v3952_v54 = vmax.f32 %v3696_v50, 0.0  ;;  %v2564_v55 = vpop.f32.mrb[192].mxu0  ;;  %v3076_v56 = vpop.f32.mrb[192].mxu1 }
 0x283   : > { %5104 = vst.msk [vmem:[%s7051_s28 + $0x178] sm:$0xf] %vm5009_vm3, %v6142_v51  ;;  %5232 = vst.msk [vmem:[%s7051_s28 + $0x378] sm:$0xf] %vm5009_vm3, %v6270_v52  ;;  %v6143_v57 = vpack.c.bf16 %v3824_v53, %v3824_v53  ;;  %v3306_v61 = vmul.f32 %v7990_v33, %v2564_v55  ;;  %v3434_v60 = vmul.f32 %v7990_v33, %v3076_v56  ;;  %v2566_v62 = vpop.f32.mrb[193].mxu0  ;;  %v3078_v0 = vpop.f32.mrb[193].mxu1 }
 0x284   : > { %v6271_v58 = vpack.c.bf16 %v3952_v54, %v3952_v54  ;;  %v2567_v1 = vpop.f32.mrb[194].mxu0  ;;  %v3079_v2 = vpop.f32.mrb[194].mxu1 }
 0x285   : > { %5105 = vst.msk [vmem:[%s7051_s28 + $0x17c] sm:$0xf] %vm5009_vm3, %v6143_v57  ;;  %v3569_v3 = vadd.f32 %v7997_v39, %v3306_v61  ;;  %v3697_v4 = vadd.f32 %v7997_v39, %v3434_v60  ;;  %v3307_v5 = vmul.f32 %v7990_v33, %v2567_v1  ;;  %v3435_v6 = vmul.f32 %v7990_v33, %v3079_v2  ;;  %v2569_v7 = vpop.f32.mrb[195].mxu0  ;;  %v3081_v8 = vpop.f32.mrb[195].mxu1 }
 0x286   : > { %5233 = vst.msk [vmem:[%s7051_s28 + $0x37c] sm:$0xf] %vm5009_vm3, %v6271_v58 }
 0x287   : > { %v3825_v9 = vmax.f32 %v3569_v3, 0.0  ;;  %v3953_v10 = vmax.f32 %v3697_v4, 0.0  ;;  %v3570_v11 = vadd.f32 %v7997_v39, %v3307_v5  ;;  %v3698_v12 = vadd.f32 %v7997_v39, %v3435_v6 }
 0x289   : > { %v6144_v13 = vpack.c.bf16 %v3825_v9, %v3825_v9  ;;  %v6272_v14 = vpack.c.bf16 %v3953_v10, %v3953_v10  ;;  %v3826_v15 = vmax.f32 %v3570_v11, 0.0  ;;  %v3954_v16 = vmax.f32 %v3698_v12, 0.0 }
 0x28a   : > { %v2572_v17 = vpop.f32.mrb[196].mxu0  ;;  %v3084_v18 = vpop.f32.mrb[196].mxu1 }
 0x28b   : > { %5106 = vst.msk [vmem:[%s7051_s28 + $0x180] sm:$0xf] %vm5009_vm3, %v6144_v13  ;;  %5234 = vst.msk [vmem:[%s7051_s28 + $0x380] sm:$0xf] %vm5009_vm3, %v6272_v14  ;;  %v6145_v63 = vpack.c.bf16 %v3826_v15, %v3826_v15  ;;  %v6273_v19 = vpack.c.bf16 %v3954_v16, %v3954_v16  ;;  %v3308_v20 = vmul.f32 %v7990_v33, %v2572_v17  ;;  %v2574_v23 = vpop.f32.mrb[197].mxu0  ;;  %v3086_v24 = vpop.f32.mrb[197].mxu1 }
 0x28c   : > { %v3436_v22 = vmul.f32 %v7990_v33, %v3084_v18  ;;  %v2575_v25 = vpop.f32.mrb[198].mxu0  ;;  %v3087_v26 = vpop.f32.mrb[198].mxu1 }
 0x28d   : > { %5107 = vst.msk [vmem:[%s7051_s28 + $0x184] sm:$0xf] %vm5009_vm3, %v6145_v63  ;;  %5235 = vst.msk [vmem:[%s7051_s28 + $0x384] sm:$0xf] %vm5009_vm3, %v6273_v19  ;;  %v3571_v27 = vadd.f32 %v7997_v39, %v3308_v20  ;;  %v3309_v29 = vmul.f32 %v7990_v33, %v2575_v25  ;;  %v3437_v30 = vmul.f32 %v7990_v33, %v3087_v26  ;;  %v2577_v31 = vpop.f32.mrb[199].mxu0  ;;  %v3089_v32 = vpop.f32.mrb[199].mxu1 }
 0x28e   : > { %v3699_v28 = vadd.f32 %v7997_v39, %v3436_v22 }
 0x28f   : > { %v3827_v21 = vmax.f32 %v3571_v27, 0.0  ;;  %v3572_v35 = vadd.f32 %v7997_v39, %v3309_v29  ;;  %v3700_v36 = vadd.f32 %v7997_v39, %v3437_v30 }
 0x290   : > { %v3955_v34 = vmax.f32 %v3699_v28, 0.0 }
 0x291   : > { %v6146_v37 = vpack.c.bf16 %v3827_v21, %v3827_v21  ;;  %v3828_v59 = vmax.f32 %v3572_v35, 0.0  ;;  %v3956_v40 = vmax.f32 %v3700_v36, 0.0 }
 0x292   : > { %v6274_v38 = vpack.c.bf16 %v3955_v34, %v3955_v34  ;;  %v2580_v41 = vpop.f32.mrb[200].mxu0  ;;  %v3092_v42 = vpop.f32.mrb[200].mxu1 }
 0x293   : > { %5108 = vst.msk [vmem:[%s7051_s28 + $0x188] sm:$0xf] %vm5009_vm3, %v6146_v37  ;;  %v6147_v43 = vpack.c.bf16 %v3828_v59, %v3828_v59  ;;  %v6275_v44 = vpack.c.bf16 %v3956_v40, %v3956_v40  ;;  %v3310_v45 = vmul.f32 %v7990_v33, %v2580_v41  ;;  %v3438_v46 = vmul.f32 %v7990_v33, %v3092_v42  ;;  %v2582_v47 = vpop.f32.mrb[201].mxu0  ;;  %v3094_v48 = vpop.f32.mrb[201].mxu1 }
 0x294   : > { %5236 = vst.msk [vmem:[%s7051_s28 + $0x388] sm:$0xf] %vm5009_vm3, %v6274_v38  ;;  %v2583_v49 = vpop.f32.mrb[202].mxu0  ;;  %v3095_v50 = vpop.f32.mrb[202].mxu1 }
 0x295   : > { %5109 = vst.msk [vmem:[%s7051_s28 + $0x18c] sm:$0xf] %vm5009_vm3, %v6147_v43  ;;  %5237 = vst.msk [vmem:[%s7051_s28 + $0x38c] sm:$0xf] %vm5009_vm3, %v6275_v44  ;;  %v3573_v51 = vadd.f32 %v7997_v39, %v3310_v45  ;;  %v3701_v52 = vadd.f32 %v7997_v39, %v3438_v46  ;;  %v3311_v53 = vmul.f32 %v7990_v33, %v2583_v49  ;;  %v2585_v55 = vpop.f32.mrb[203].mxu0  ;;  %v3097_v56 = vpop.f32.mrb[203].mxu1 }
 0x296   : > { %v3439_v54 = vmul.f32 %v7990_v33, %v3095_v50 }
 0x297   : > { %v3829_v57 = vmax.f32 %v3573_v51, 0.0  ;;  %v3957_v58 = vmax.f32 %v3701_v52, 0.0  ;;  %v3574_v61 = vadd.f32 %v7997_v39, %v3311_v53 }
 0x298   : > { %v3702_v60 = vadd.f32 %v7997_v39, %v3439_v54 }
 0x299   : > { %v6148_v62 = vpack.c.bf16 %v3829_v57, %v3829_v57  ;;  %v6276_v0 = vpack.c.bf16 %v3957_v58, %v3957_v58  ;;  %v3830_v1 = vmax.f32 %v3574_v61, 0.0 }
 0x29a   : > { %v3958_v2 = vmax.f32 %v3702_v60, 0.0  ;;  %v2588_v3 = vpop.f32.mrb[204].mxu0  ;;  %v3100_v4 = vpop.f32.mrb[204].mxu1 }
 0x29b   : > { %5110 = vst.msk [vmem:[%s7051_s28 + $0x190] sm:$0xf] %vm5009_vm3, %v6148_v62  ;;  %5238 = vst.msk [vmem:[%s7051_s28 + $0x390] sm:$0xf] %vm5009_vm3, %v6276_v0  ;;  %v6149_v5 = vpack.c.bf16 %v3830_v1, %v3830_v1  ;;  %v3312_v7 = vmul.f32 %v7990_v33, %v2588_v3  ;;  %v3440_v8 = vmul.f32 %v7990_v33, %v3100_v4  ;;  %v2590_v9 = vpop.f32.mrb[205].mxu0  ;;  %v3102_v10 = vpop.f32.mrb[205].mxu1 }
 0x29c   : > { %v6277_v6 = vpack.c.bf16 %v3958_v2, %v3958_v2  ;;  %v2591_v11 = vpop.f32.mrb[206].mxu0  ;;  %v3103_v12 = vpop.f32.mrb[206].mxu1 }
 0x29d   : > { %5111 = vst.msk [vmem:[%s7051_s28 + $0x194] sm:$0xf] %vm5009_vm3, %v6149_v5  ;;  %v3575_v13 = vadd.f32 %v7997_v39, %v3312_v7  ;;  %v3703_v14 = vadd.f32 %v7997_v39, %v3440_v8  ;;  %v3313_v15 = vmul.f32 %v7990_v33, %v2591_v11  ;;  %v3441_v16 = vmul.f32 %v7990_v33, %v3103_v12  ;;  %v2593_v17 = vpop.f32.mrb[207].mxu0  ;;  %v3105_v18 = vpop.f32.mrb[207].mxu1 }
 0x29e   : > { %5239 = vst.msk [vmem:[%s7051_s28 + $0x394] sm:$0xf] %vm5009_vm3, %v6277_v6 }
 0x29f   : > { %v3831_v63 = vmax.f32 %v3575_v13, 0.0  ;;  %v3959_v19 = vmax.f32 %v3703_v14, 0.0  ;;  %v3576_v20 = vadd.f32 %v7997_v39, %v3313_v15  ;;  %v3704_v22 = vadd.f32 %v7997_v39, %v3441_v16 }
 0x2a1   : > { %v6150_v23 = vpack.c.bf16 %v3831_v63, %v3831_v63  ;;  %v6278_v24 = vpack.c.bf16 %v3959_v19, %v3959_v19  ;;  %v3832_v25 = vmax.f32 %v3576_v20, 0.0  ;;  %v3960_v26 = vmax.f32 %v3704_v22, 0.0 }
 0x2a2   : > { %v2596_v27 = vpop.f32.mrb[208].mxu0  ;;  %v3108_v28 = vpop.f32.mrb[208].mxu1 }
 0x2a3   : > { %5112 = vst.msk [vmem:[%s7051_s28 + $0x198] sm:$0xf] %vm5009_vm3, %v6150_v23  ;;  %5240 = vst.msk [vmem:[%s7051_s28 + $0x398] sm:$0xf] %vm5009_vm3, %v6278_v24  ;;  %v6151_v29 = vpack.c.bf16 %v3832_v25, %v3832_v25  ;;  %v6279_v30 = vpack.c.bf16 %v3960_v26, %v3960_v26  ;;  %v3314_v31 = vmul.f32 %v7990_v33, %v2596_v27  ;;  %v2598_v21 = vpop.f32.mrb[209].mxu0  ;;  %v3110_v34 = vpop.f32.mrb[209].mxu1 }
 0x2a4   : > { %v3442_v32 = vmul.f32 %v7990_v33, %v3108_v28  ;;  %v2599_v35 = vpop.f32.mrb[210].mxu0  ;;  %v3111_v36 = vpop.f32.mrb[210].mxu1 }
 0x2a5   : > { %5113 = vst.msk [vmem:[%s7051_s28 + $0x19c] sm:$0xf] %vm5009_vm3, %v6151_v29  ;;  %5241 = vst.msk [vmem:[%s7051_s28 + $0x39c] sm:$0xf] %vm5009_vm3, %v6279_v30  ;;  %v3577_v37 = vadd.f32 %v7997_v39, %v3314_v31  ;;  %v3315_v59 = vmul.f32 %v7990_v33, %v2599_v35  ;;  %v3443_v40 = vmul.f32 %v7990_v33, %v3111_v36  ;;  %v2601_v41 = vpop.f32.mrb[211].mxu0  ;;  %v3113_v42 = vpop.f32.mrb[211].mxu1 }
 0x2a6   : > { %v3705_v38 = vadd.f32 %v7997_v39, %v3442_v32 }
 0x2a7   : > { %v3833_v43 = vmax.f32 %v3577_v37, 0.0  ;;  %v3578_v45 = vadd.f32 %v7997_v39, %v3315_v59  ;;  %v3706_v46 = vadd.f32 %v7997_v39, %v3443_v40 }
 0x2a8   : > { %v3961_v44 = vmax.f32 %v3705_v38, 0.0 }
 0x2a9   : > { %v6152_v47 = vpack.c.bf16 %v3833_v43, %v3833_v43  ;;  %v3834_v49 = vmax.f32 %v3578_v45, 0.0  ;;  %v3962_v50 = vmax.f32 %v3706_v46, 0.0 }
 0x2aa   : > { %v6280_v48 = vpack.c.bf16 %v3961_v44, %v3961_v44  ;;  %v2604_v51 = vpop.f32.mrb[212].mxu0  ;;  %v3116_v52 = vpop.f32.mrb[212].mxu1 }
 0x2ab   : > { %5114 = vst.msk [vmem:[%s7051_s28 + $0x1a0] sm:$0xf] %vm5009_vm3, %v6152_v47  ;;  %v6153_v53 = vpack.c.bf16 %v3834_v49, %v3834_v49  ;;  %v6281_v54 = vpack.c.bf16 %v3962_v50, %v3962_v50  ;;  %v3316_v55 = vmul.f32 %v7990_v33, %v2604_v51  ;;  %v3444_v56 = vmul.f32 %v7990_v33, %v3116_v52  ;;  %v2606_v57 = vpop.f32.mrb[213].mxu0  ;;  %v3118_v58 = vpop.f32.mrb[213].mxu1 }
 0x2ac   : > { %5242 = vst.msk [vmem:[%s7051_s28 + $0x3a0] sm:$0xf] %vm5009_vm3, %v6280_v48  ;;  %v2607_v61 = vpop.f32.mrb[214].mxu0  ;;  %v3119_v60 = vpop.f32.mrb[214].mxu1 }
 0x2ad   : > { %5115 = vst.msk [vmem:[%s7051_s28 + $0x1a4] sm:$0xf] %vm5009_vm3, %v6153_v53  ;;  %5243 = vst.msk [vmem:[%s7051_s28 + $0x3a4] sm:$0xf] %vm5009_vm3, %v6281_v54  ;;  %v3579_v62 = vadd.f32 %v7997_v39, %v3316_v55  ;;  %v3707_v0 = vadd.f32 %v7997_v39, %v3444_v56  ;;  %v3317_v1 = vmul.f32 %v7990_v33, %v2607_v61  ;;  %v2609_v3 = vpop.f32.mrb[215].mxu0  ;;  %v3121_v4 = vpop.f32.mrb[215].mxu1 }
 0x2ae   : > { %v3445_v2 = vmul.f32 %v7990_v33, %v3119_v60 }
 0x2af   : > { %v3835_v5 = vmax.f32 %v3579_v62, 0.0  ;;  %v3963_v6 = vmax.f32 %v3707_v0, 0.0  ;;  %v3580_v7 = vadd.f32 %v7997_v39, %v3317_v1 }
 0x2b0   : > { %v3708_v8 = vadd.f32 %v7997_v39, %v3445_v2 }
 0x2b1   : > { %v6154_v9 = vpack.c.bf16 %v3835_v5, %v3835_v5  ;;  %v6282_v10 = vpack.c.bf16 %v3963_v6, %v3963_v6  ;;  %v3836_v11 = vmax.f32 %v3580_v7, 0.0 }
 0x2b2   : > { %v3964_v12 = vmax.f32 %v3708_v8, 0.0  ;;  %v2612_v13 = vpop.f32.mrb[216].mxu0  ;;  %v3124_v14 = vpop.f32.mrb[216].mxu1 }
 0x2b3   : > { %5116 = vst.msk [vmem:[%s7051_s28 + $0x1a8] sm:$0xf] %vm5009_vm3, %v6154_v9  ;;  %5244 = vst.msk [vmem:[%s7051_s28 + $0x3a8] sm:$0xf] %vm5009_vm3, %v6282_v10  ;;  %v6155_v15 = vpack.c.bf16 %v3836_v11, %v3836_v11  ;;  %v3318_v17 = vmul.f32 %v7990_v33, %v2612_v13  ;;  %v3446_v18 = vmul.f32 %v7990_v33, %v3124_v14  ;;  %v2614_v63 = vpop.f32.mrb[217].mxu0  ;;  %v3126_v19 = vpop.f32.mrb[217].mxu1 }
 0x2b4   : > { %v6283_v16 = vpack.c.bf16 %v3964_v12, %v3964_v12  ;;  %v2615_v20 = vpop.f32.mrb[218].mxu0  ;;  %v3127_v22 = vpop.f32.mrb[218].mxu1 }
 0x2b5   : > { %5117 = vst.msk [vmem:[%s7051_s28 + $0x1ac] sm:$0xf] %vm5009_vm3, %v6155_v15  ;;  %v3581_v23 = vadd.f32 %v7997_v39, %v3318_v17  ;;  %v3709_v24 = vadd.f32 %v7997_v39, %v3446_v18  ;;  %v3319_v25 = vmul.f32 %v7990_v33, %v2615_v20  ;;  %v3447_v26 = vmul.f32 %v7990_v33, %v3127_v22  ;;  %v2617_v27 = vpop.f32.mrb[219].mxu0  ;;  %v3129_v28 = vpop.f32.mrb[219].mxu1 }
 0x2b6   : > { %5245 = vst.msk [vmem:[%s7051_s28 + $0x3ac] sm:$0xf] %vm5009_vm3, %v6283_v16 }
 0x2b7   : > { %v3837_v29 = vmax.f32 %v3581_v23, 0.0  ;;  %v3965_v30 = vmax.f32 %v3709_v24, 0.0  ;;  %v3582_v31 = vadd.f32 %v7997_v39, %v3319_v25  ;;  %v3710_v32 = vadd.f32 %v7997_v39, %v3447_v26 }
 0x2b9   : > { %v6156_v21 = vpack.c.bf16 %v3837_v29, %v3837_v29  ;;  %v6284_v34 = vpack.c.bf16 %v3965_v30, %v3965_v30  ;;  %v3838_v35 = vmax.f32 %v3582_v31, 0.0  ;;  %v3966_v36 = vmax.f32 %v3710_v32, 0.0 }
 0x2ba   : > { %v2620_v37 = vpop.f32.mrb[220].mxu0  ;;  %v3132_v38 = vpop.f32.mrb[220].mxu1 }
 0x2bb   : > { %5118 = vst.msk [vmem:[%s7051_s28 + $0x1b0] sm:$0xf] %vm5009_vm3, %v6156_v21  ;;  %5246 = vst.msk [vmem:[%s7051_s28 + $0x3b0] sm:$0xf] %vm5009_vm3, %v6284_v34  ;;  %v6157_v59 = vpack.c.bf16 %v3838_v35, %v3838_v35  ;;  %v6285_v40 = vpack.c.bf16 %v3966_v36, %v3966_v36  ;;  %v3320_v41 = vmul.f32 %v7990_v33, %v2620_v37  ;;  %v2622_v43 = vpop.f32.mrb[221].mxu0  ;;  %v3134_v44 = vpop.f32.mrb[221].mxu1 }
 0x2bc   : > { %v3448_v42 = vmul.f32 %v7990_v33, %v3132_v38  ;;  %v2623_v45 = vpop.f32.mrb[222].mxu0  ;;  %v3135_v46 = vpop.f32.mrb[222].mxu1 }
 0x2bd   : > { %5119 = vst.msk [vmem:[%s7051_s28 + $0x1b4] sm:$0xf] %vm5009_vm3, %v6157_v59  ;;  %5247 = vst.msk [vmem:[%s7051_s28 + $0x3b4] sm:$0xf] %vm5009_vm3, %v6285_v40  ;;  %v3583_v47 = vadd.f32 %v7997_v39, %v3320_v41  ;;  %v3321_v49 = vmul.f32 %v7990_v33, %v2623_v45  ;;  %v3449_v50 = vmul.f32 %v7990_v33, %v3135_v46  ;;  %v2625_v51 = vpop.f32.mrb[223].mxu0  ;;  %v3137_v52 = vpop.f32.mrb[223].mxu1 }
 0x2be   : > { %v3711_v48 = vadd.f32 %v7997_v39, %v3448_v42 }
 0x2bf   : > { %v3839_v53 = vmax.f32 %v3583_v47, 0.0  ;;  %v3584_v55 = vadd.f32 %v7997_v39, %v3321_v49  ;;  %v3712_v56 = vadd.f32 %v7997_v39, %v3449_v50 }
 0x2c0   : > { %v3967_v54 = vmax.f32 %v3711_v48, 0.0 }
 0x2c1   : > { %v6158_v57 = vpack.c.bf16 %v3839_v53, %v3839_v53  ;;  %v3840_v61 = vmax.f32 %v3584_v55, 0.0  ;;  %v3968_v60 = vmax.f32 %v3712_v56, 0.0 }
 0x2c2   : > { %v6286_v58 = vpack.c.bf16 %v3967_v54, %v3967_v54  ;;  %v2628_v62 = vpop.f32.mrb[224].mxu0  ;;  %v3140_v0 = vpop.f32.mrb[224].mxu1 }
 0x2c3   : > { %5120 = vst.msk [vmem:[%s7051_s28 + $0x1b8] sm:$0xf] %vm5009_vm3, %v6158_v57  ;;  %v6159_v1 = vpack.c.bf16 %v3840_v61, %v3840_v61  ;;  %v6287_v2 = vpack.c.bf16 %v3968_v60, %v3968_v60  ;;  %v3322_v3 = vmul.f32 %v7990_v33, %v2628_v62  ;;  %v3450_v4 = vmul.f32 %v7990_v33, %v3140_v0  ;;  %v2630_v5 = vpop.f32.mrb[225].mxu0  ;;  %v3142_v6 = vpop.f32.mrb[225].mxu1 }
 0x2c4   : > { %5248 = vst.msk [vmem:[%s7051_s28 + $0x3b8] sm:$0xf] %vm5009_vm3, %v6286_v58  ;;  %v2631_v7 = vpop.f32.mrb[226].mxu0  ;;  %v3143_v8 = vpop.f32.mrb[226].mxu1 }
 0x2c5   : > { %5121 = vst.msk [vmem:[%s7051_s28 + $0x1bc] sm:$0xf] %vm5009_vm3, %v6159_v1  ;;  %5249 = vst.msk [vmem:[%s7051_s28 + $0x3bc] sm:$0xf] %vm5009_vm3, %v6287_v2  ;;  %v3585_v9 = vadd.f32 %v7997_v39, %v3322_v3  ;;  %v3713_v10 = vadd.f32 %v7997_v39, %v3450_v4  ;;  %v3323_v11 = vmul.f32 %v7990_v33, %v2631_v7  ;;  %v2633_v13 = vpop.f32.mrb[227].mxu0  ;;  %v3145_v14 = vpop.f32.mrb[227].mxu1 }
 0x2c6   : > { %v3451_v12 = vmul.f32 %v7990_v33, %v3143_v8 }
 0x2c7   : > { %v3841_v15 = vmax.f32 %v3585_v9, 0.0  ;;  %v3969_v16 = vmax.f32 %v3713_v10, 0.0  ;;  %v3586_v17 = vadd.f32 %v7997_v39, %v3323_v11 }
 0x2c8   : > { %v3714_v18 = vadd.f32 %v7997_v39, %v3451_v12 }
 0x2c9   : > { %v6160_v63 = vpack.c.bf16 %v3841_v15, %v3841_v15  ;;  %v6288_v19 = vpack.c.bf16 %v3969_v16, %v3969_v16  ;;  %v3842_v20 = vmax.f32 %v3586_v17, 0.0 }
 0x2ca   : > { %v3970_v22 = vmax.f32 %v3714_v18, 0.0  ;;  %v2636_v23 = vpop.f32.mrb[228].mxu0  ;;  %v3148_v24 = vpop.f32.mrb[228].mxu1 }
 0x2cb   : > { %5122 = vst.msk [vmem:[%s7051_s28 + $0x1c0] sm:$0xf] %vm5009_vm3, %v6160_v63  ;;  %5250 = vst.msk [vmem:[%s7051_s28 + $0x3c0] sm:$0xf] %vm5009_vm3, %v6288_v19  ;;  %v6161_v25 = vpack.c.bf16 %v3842_v20, %v3842_v20  ;;  %v3324_v27 = vmul.f32 %v7990_v33, %v2636_v23  ;;  %v3452_v28 = vmul.f32 %v7990_v33, %v3148_v24  ;;  %v2638_v29 = vpop.f32.mrb[229].mxu0  ;;  %v3150_v30 = vpop.f32.mrb[229].mxu1 }
 0x2cc   : > { %v6289_v26 = vpack.c.bf16 %v3970_v22, %v3970_v22  ;;  %v2639_v31 = vpop.f32.mrb[230].mxu0  ;;  %v3151_v32 = vpop.f32.mrb[230].mxu1 }
 0x2cd   : > { %5123 = vst.msk [vmem:[%s7051_s28 + $0x1c4] sm:$0xf] %vm5009_vm3, %v6161_v25  ;;  %v3587_v21 = vadd.f32 %v7997_v39, %v3324_v27  ;;  %v3715_v34 = vadd.f32 %v7997_v39, %v3452_v28  ;;  %v3325_v35 = vmul.f32 %v7990_v33, %v2639_v31  ;;  %v3453_v36 = vmul.f32 %v7990_v33, %v3151_v32  ;;  %v2641_v37 = vpop.f32.mrb[231].mxu0  ;;  %v3153_v38 = vpop.f32.mrb[231].mxu1 }
 0x2ce   : > { %5251 = vst.msk [vmem:[%s7051_s28 + $0x3c4] sm:$0xf] %vm5009_vm3, %v6289_v26 }
 0x2cf   : > { %v3843_v59 = vmax.f32 %v3587_v21, 0.0  ;;  %v3971_v40 = vmax.f32 %v3715_v34, 0.0  ;;  %v3588_v41 = vadd.f32 %v7997_v39, %v3325_v35  ;;  %v3716_v42 = vadd.f32 %v7997_v39, %v3453_v36 }
 0x2d1   : > { %v6162_v43 = vpack.c.bf16 %v3843_v59, %v3843_v59  ;;  %v6290_v44 = vpack.c.bf16 %v3971_v40, %v3971_v40  ;;  %v3844_v45 = vmax.f32 %v3588_v41, 0.0  ;;  %v3972_v46 = vmax.f32 %v3716_v42, 0.0 }
 0x2d2   : > { %v2644_v47 = vpop.f32.mrb[232].mxu0  ;;  %v3156_v48 = vpop.f32.mrb[232].mxu1 }
 0x2d3   : > { %5124 = vst.msk [vmem:[%s7051_s28 + $0x1c8] sm:$0xf] %vm5009_vm3, %v6162_v43  ;;  %5252 = vst.msk [vmem:[%s7051_s28 + $0x3c8] sm:$0xf] %vm5009_vm3, %v6290_v44  ;;  %v6163_v49 = vpack.c.bf16 %v3844_v45, %v3844_v45  ;;  %v6291_v50 = vpack.c.bf16 %v3972_v46, %v3972_v46  ;;  %v3326_v51 = vmul.f32 %v7990_v33, %v2644_v47  ;;  %v2646_v53 = vpop.f32.mrb[233].mxu0  ;;  %v3158_v54 = vpop.f32.mrb[233].mxu1 }
 0x2d4   : > { %v3454_v52 = vmul.f32 %v7990_v33, %v3156_v48  ;;  %v2647_v55 = vpop.f32.mrb[234].mxu0  ;;  %v3159_v56 = vpop.f32.mrb[234].mxu1 }
 0x2d5   : > { %5125 = vst.msk [vmem:[%s7051_s28 + $0x1cc] sm:$0xf] %vm5009_vm3, %v6163_v49  ;;  %5253 = vst.msk [vmem:[%s7051_s28 + $0x3cc] sm:$0xf] %vm5009_vm3, %v6291_v50  ;;  %v3589_v57 = vadd.f32 %v7997_v39, %v3326_v51  ;;  %v3327_v61 = vmul.f32 %v7990_v33, %v2647_v55  ;;  %v3455_v60 = vmul.f32 %v7990_v33, %v3159_v56  ;;  %v2649_v62 = vpop.f32.mrb[235].mxu0  ;;  %v3161_v0 = vpop.f32.mrb[235].mxu1 }
 0x2d6   : > { %v3717_v58 = vadd.f32 %v7997_v39, %v3454_v52 }
 0x2d7   : > { %v3845_v1 = vmax.f32 %v3589_v57, 0.0  ;;  %v3590_v3 = vadd.f32 %v7997_v39, %v3327_v61  ;;  %v3718_v4 = vadd.f32 %v7997_v39, %v3455_v60 }
 0x2d8   : > { %v3973_v2 = vmax.f32 %v3717_v58, 0.0 }
 0x2d9   : > { %v6164_v5 = vpack.c.bf16 %v3845_v1, %v3845_v1  ;;  %v3846_v7 = vmax.f32 %v3590_v3, 0.0  ;;  %v3974_v8 = vmax.f32 %v3718_v4, 0.0 }
 0x2da   : > { %v6292_v6 = vpack.c.bf16 %v3973_v2, %v3973_v2  ;;  %v2652_v9 = vpop.f32.mrb[236].mxu0  ;;  %v3164_v10 = vpop.f32.mrb[236].mxu1 }
 0x2db   : > { %5126 = vst.msk [vmem:[%s7051_s28 + $0x1d0] sm:$0xf] %vm5009_vm3, %v6164_v5  ;;  %v6165_v11 = vpack.c.bf16 %v3846_v7, %v3846_v7  ;;  %v6293_v12 = vpack.c.bf16 %v3974_v8, %v3974_v8  ;;  %v3328_v13 = vmul.f32 %v7990_v33, %v2652_v9  ;;  %v3456_v14 = vmul.f32 %v7990_v33, %v3164_v10  ;;  %v2654_v15 = vpop.f32.mrb[237].mxu0  ;;  %v3166_v16 = vpop.f32.mrb[237].mxu1 }
 0x2dc   : > { %5254 = vst.msk [vmem:[%s7051_s28 + $0x3d0] sm:$0xf] %vm5009_vm3, %v6292_v6  ;;  %v2655_v17 = vpop.f32.mrb[238].mxu0  ;;  %v3167_v18 = vpop.f32.mrb[238].mxu1 }
 0x2dd   : > { %5127 = vst.msk [vmem:[%s7051_s28 + $0x1d4] sm:$0xf] %vm5009_vm3, %v6165_v11  ;;  %5255 = vst.msk [vmem:[%s7051_s28 + $0x3d4] sm:$0xf] %vm5009_vm3, %v6293_v12  ;;  %v3591_v63 = vadd.f32 %v7997_v39, %v3328_v13  ;;  %v3719_v19 = vadd.f32 %v7997_v39, %v3456_v14  ;;  %v3329_v20 = vmul.f32 %v7990_v33, %v2655_v17  ;;  %v2657_v23 = vpop.f32.mrb[239].mxu0  ;;  %v3169_v24 = vpop.f32.mrb[239].mxu1 }
 0x2de   : > { %v3457_v22 = vmul.f32 %v7990_v33, %v3167_v18 }
 0x2df   : > { %v3847_v25 = vmax.f32 %v3591_v63, 0.0  ;;  %v3975_v26 = vmax.f32 %v3719_v19, 0.0  ;;  %v3592_v27 = vadd.f32 %v7997_v39, %v3329_v20 }
 0x2e0   : > { %v3720_v28 = vadd.f32 %v7997_v39, %v3457_v22 }
 0x2e1   : > { %v6166_v29 = vpack.c.bf16 %v3847_v25, %v3847_v25  ;;  %v6294_v30 = vpack.c.bf16 %v3975_v26, %v3975_v26  ;;  %v3848_v31 = vmax.f32 %v3592_v27, 0.0 }
 0x2e2   : > { %v3976_v32 = vmax.f32 %v3720_v28, 0.0  ;;  %v2660_v21 = vpop.f32.mrb[240].mxu0  ;;  %v3172_v34 = vpop.f32.mrb[240].mxu1 }
 0x2e3   : > { %5128 = vst.msk [vmem:[%s7051_s28 + $0x1d8] sm:$0xf] %vm5009_vm3, %v6166_v29  ;;  %5256 = vst.msk [vmem:[%s7051_s28 + $0x3d8] sm:$0xf] %vm5009_vm3, %v6294_v30  ;;  %v6167_v35 = vpack.c.bf16 %v3848_v31, %v3848_v31  ;;  %v3330_v37 = vmul.f32 %v7990_v33, %v2660_v21  ;;  %v3458_v38 = vmul.f32 %v7990_v33, %v3172_v34  ;;  %v2662_v59 = vpop.f32.mrb[241].mxu0  ;;  %v3174_v40 = vpop.f32.mrb[241].mxu1 }
 0x2e4   : > { %v6295_v36 = vpack.c.bf16 %v3976_v32, %v3976_v32  ;;  %v2663_v41 = vpop.f32.mrb[242].mxu0  ;;  %v3175_v42 = vpop.f32.mrb[242].mxu1 }
 0x2e5   : > { %5129 = vst.msk [vmem:[%s7051_s28 + $0x1dc] sm:$0xf] %vm5009_vm3, %v6167_v35  ;;  %v3593_v43 = vadd.f32 %v7997_v39, %v3330_v37  ;;  %v3721_v44 = vadd.f32 %v7997_v39, %v3458_v38  ;;  %v3331_v45 = vmul.f32 %v7990_v33, %v2663_v41  ;;  %v3459_v46 = vmul.f32 %v7990_v33, %v3175_v42  ;;  %v2665_v47 = vpop.f32.mrb[243].mxu0  ;;  %v3177_v48 = vpop.f32.mrb[243].mxu1 }
 0x2e6   : > { %5257 = vst.msk [vmem:[%s7051_s28 + $0x3dc] sm:$0xf] %vm5009_vm3, %v6295_v36 }
 0x2e7   : > { %v3849_v49 = vmax.f32 %v3593_v43, 0.0  ;;  %v3977_v50 = vmax.f32 %v3721_v44, 0.0  ;;  %v3594_v51 = vadd.f32 %v7997_v39, %v3331_v45  ;;  %v3722_v52 = vadd.f32 %v7997_v39, %v3459_v46  ;;  %v6750_v46 = vld [vmem:[%s8322_s2] ss:$0 sm:$0xff] }
 0x2e9   : > { %v6168_v53 = vpack.c.bf16 %v3849_v49, %v3849_v49  ;;  %v6296_v54 = vpack.c.bf16 %v3977_v50, %v3977_v50  ;;  %v3850_v55 = vmax.f32 %v3594_v51, 0.0  ;;  %v3978_v56 = vmax.f32 %v3722_v52, 0.0  ;;  %v6751_v52 = vld [vmem:[%s8323_s3] ss:$0 sm:$0xff] }
 0x2ea   : > { %v2668_v57 = vpop.f32.mrb[244].mxu0  ;;  %v3180_v58 = vpop.f32.mrb[244].mxu1 }
 0x2eb   : > { %5130 = vst.msk [vmem:[%s7051_s28 + $0x1e0] sm:$0xf] %vm5009_vm3, %v6168_v53  ;;  %5258 = vst.msk [vmem:[%s7051_s28 + $0x3e0] sm:$0xf] %vm5009_vm3, %v6296_v54  ;;  %v6169_v61 = vpack.c.bf16 %v3850_v55, %v3850_v55  ;;  %v6297_v60 = vpack.c.bf16 %v3978_v56, %v3978_v56  ;;  %v3332_v62 = vmul.f32 %v7990_v33, %v2668_v57  ;;  %v2670_v1 = vpop.f32.mrb[245].mxu0  ;;  %v3182_v2 = vpop.f32.mrb[245].mxu1 }
 0x2ec   : > { %v3460_v0 = vmul.f32 %v7990_v33, %v3180_v58  ;;  %v2671_v3 = vpop.f32.mrb[246].mxu0  ;;  %v3183_v4 = vpop.f32.mrb[246].mxu1 }
 0x2ed   : > { %5131 = vst.msk [vmem:[%s7051_s28 + $0x1e4] sm:$0xf] %vm5009_vm3, %v6169_v61  ;;  %5259 = vst.msk [vmem:[%s7051_s28 + $0x3e4] sm:$0xf] %vm5009_vm3, %v6297_v60  ;;  %v3595_v5 = vadd.f32 %v7997_v39, %v3332_v62  ;;  %v3333_v7 = vmul.f32 %v7990_v33, %v2671_v3  ;;  %v3461_v8 = vmul.f32 %v7990_v33, %v3183_v4  ;;  %v2673_v9 = vpop.f32.mrb[247].mxu0  ;;  %v3185_v10 = vpop.f32.mrb[247].mxu1 }
 0x2ee   : > { %v3723_v6 = vadd.f32 %v7997_v39, %v3460_v0 }
 0x2ef   : > { %v3851_v11 = vmax.f32 %v3595_v5, 0.0  ;;  %v3596_v13 = vadd.f32 %v7997_v39, %v3333_v7  ;;  %v3724_v14 = vadd.f32 %v7997_v39, %v3461_v8 }
 0x2f0   : > { %v3979_v12 = vmax.f32 %v3723_v6, 0.0 }
 0x2f1   : > { %v6170_v15 = vpack.c.bf16 %v3851_v11, %v3851_v11  ;;  %v3852_v17 = vmax.f32 %v3596_v13, 0.0  ;;  %v3980_v18 = vmax.f32 %v3724_v14, 0.0 }
 0x2f2   : > { %v6298_v16 = vpack.c.bf16 %v3979_v12, %v3979_v12  ;;  %v2676_v63 = vpop.f32.mrb[248].mxu0  ;;  %v3188_v19 = vpop.f32.mrb[248].mxu1 }
 0x2f3   : > { %5132 = vst.msk [vmem:[%s7051_s28 + $0x1e8] sm:$0xf] %vm5009_vm3, %v6170_v15  ;;  %v6171_v20 = vpack.c.bf16 %v3852_v17, %v3852_v17  ;;  %v6299_v22 = vpack.c.bf16 %v3980_v18, %v3980_v18  ;;  %v3334_v23 = vmul.f32 %v7990_v33, %v2676_v63  ;;  %v3462_v24 = vmul.f32 %v7990_v33, %v3188_v19  ;;  %v2678_v25 = vpop.f32.mrb[249].mxu0  ;;  %v3190_v26 = vpop.f32.mrb[249].mxu1 }
 0x2f4   : > { %5260 = vst.msk [vmem:[%s7051_s28 + $0x3e8] sm:$0xf] %vm5009_vm3, %v6298_v16  ;;  %v2679_v27 = vpop.f32.mrb[250].mxu0  ;;  %v3191_v28 = vpop.f32.mrb[250].mxu1 }
 0x2f5   : > { %5133 = vst.msk [vmem:[%s7051_s28 + $0x1ec] sm:$0xf] %vm5009_vm3, %v6171_v20  ;;  %5261 = vst.msk [vmem:[%s7051_s28 + $0x3ec] sm:$0xf] %vm5009_vm3, %v6299_v22  ;;  %v3597_v29 = vadd.f32 %v7997_v39, %v3334_v23  ;;  %v3725_v30 = vadd.f32 %v7997_v39, %v3462_v24  ;;  %v3335_v31 = vmul.f32 %v7990_v33, %v2679_v27  ;;  %v2681_v21 = vpop.f32.mrb[251].mxu0  ;;  %v3193_v34 = vpop.f32.mrb[251].mxu1 }
 0x2f6   : > { %v3463_v32 = vmul.f32 %v7990_v33, %v3191_v28 }
 0x2f7   : > { %v3853_v35 = vmax.f32 %v3597_v29, 0.0  ;;  %v3981_v36 = vmax.f32 %v3725_v30, 0.0  ;;  %v3598_v37 = vadd.f32 %v7997_v39, %v3335_v31 }
 0x2f8   : > { %v3726_v38 = vadd.f32 %v7997_v39, %v3463_v32 }
 0x2f9   : > { %v6172_v59 = vpack.c.bf16 %v3853_v35, %v3853_v35  ;;  %v6300_v40 = vpack.c.bf16 %v3981_v36, %v3981_v36  ;;  %v3854_v41 = vmax.f32 %v3598_v37, 0.0 }
 0x2fa   : > { %v3982_v42 = vmax.f32 %v3726_v38, 0.0  ;;  %v2684_v43 = vpop.f32.mrb[252].mxu0  ;;  %v3196_v44 = vpop.f32.mrb[252].mxu1 }
 0x2fb   : > { %5134 = vst.msk [vmem:[%s7051_s28 + $0x1f0] sm:$0xf] %vm5009_vm3, %v6172_v59  ;;  %5262 = vst.msk [vmem:[%s7051_s28 + $0x3f0] sm:$0xf] %vm5009_vm3, %v6300_v40  ;;  %v6173_v33 = vpack.c.bf16 %v3854_v41, %v3854_v41  ;;  %v3336_v47 = vmul.f32 %v6750_v46, %v2684_v43  ;;  %v3464_v39 = vmul.f32 %v6750_v46, %v3196_v44  ;;  %v2686_v48 = vpop.f32.mrb[253].mxu0  ;;  %v3198_v49 = vpop.f32.mrb[253].mxu1 }
 0x2fc   : > { %v6301_v45 = vpack.c.bf16 %v3982_v42, %v3982_v42  ;;  %v2687_v50 = vpop.f32.mrb[254].mxu0  ;;  %v3199_v51 = vpop.f32.mrb[254].mxu1 }
 0x2fd   : > { %5135 = vst.msk [vmem:[%s7051_s28 + $0x1f4] sm:$0xf] %vm5009_vm3, %v6173_v33  ;;  %v3599_v53 = vadd.f32 %v6751_v52, %v3336_v47  ;;  %v3727_v54 = vadd.f32 %v6751_v52, %v3464_v39  ;;  %v3337_v55 = vmul.f32 %v6750_v46, %v2687_v50  ;;  %v3465_v56 = vmul.f32 %v6750_v46, %v3199_v51  ;;  %v2689_v57 = vpop.f32.mrb[255].mxu0  ;;  %v3201_v58 = vpop.f32.mrb[255].mxu1 }
 0x2fe   : > { %5263 = vst.msk [vmem:[%s7051_s28 + $0x3f4] sm:$0xf] %vm5009_vm3, %v6301_v45 }
 0x2ff   : > { %v3855_v61 = vmax.f32 %v3599_v53, 0.0  ;;  %v3983_v60 = vmax.f32 %v3727_v54, 0.0  ;;  %v3600_v62 = vadd.f32 %v6751_v52, %v3337_v55  ;;  %v3728_v0 = vadd.f32 %v6751_v52, %v3465_v56 }
 0x301   : > { %v6174_v1 = vpack.c.bf16 %v3855_v61, %v3855_v61  ;;  %v6302_v2 = vpack.c.bf16 %v3983_v60, %v3983_v60  ;;  %v3856_v3 = vmax.f32 %v3600_v62, 0.0  ;;  %v3984_v4 = vmax.f32 %v3728_v0, 0.0 }
 0x303   : > { %5136 = vst.msk [vmem:[%s7051_s28 + $0x1f8] sm:$0xf] %vm5009_vm3, %v6174_v1  ;;  %5264 = vst.msk [vmem:[%s7051_s28 + $0x3f8] sm:$0xf] %vm5009_vm3, %v6302_v2  ;;  %v6175_v5 = vpack.c.bf16 %v3856_v3, %v3856_v3  ;;  %v6303_v6 = vpack.c.bf16 %v3984_v4, %v3984_v4 }
 0x305   : > { %5137 = vst.msk [vmem:[%s7051_s28 + $0x1fc] sm:$0xf] %vm5009_vm3, %v6175_v5  ;;  %5265 = vst.msk [vmem:[%s7051_s28 + $0x3fc] sm:$0xf] %vm5009_vm3, %v6303_v6 }
 0x306 PF: > { %s14_s17 = sadd.s32 1, %s6774_s17   ;;  %s8325_s15 = smov %s6770_s16 }
 0x307   : > { %p11_p5 = scmp.ge.s32.totalorder %s14_s17, 4   ;;  %s8326_s16 = smov %s8328_s18 }
 0x309   :  { %13 = sbr.rel (!%p11_p5) target bundleno = 2 (0x2), region = 75 }

</bundles_post_ra>
